<compile_context>
chip_gen: v7x
topology: tpu7x:2x2x1
jax: 0.10.0
libtpu: 0.0.40
codegen_flags: <defaults>
</compile_context>

<pallas_src>
import functools

import jax
import jax.numpy as jnp
from jax.experimental import pallas as pl
from jax.experimental.pallas import tpu as pltpu


def _round_up(x, m):
    return ((x + m - 1) // m) * m


def _mish(v):
    # mish(x) = x * tanh(softplus(x)).  Single-transcendental rational form:
    #   t = exp(x);  tanh(log1p(t)) = (t^2 + 2t) / (t^2 + 2t + 2)
    # Clamping the exp argument at 20 keeps t^2 finite; for x >= 20 the ratio
    # is 1.0 to f32 precision so mish(x) == x there.  The exact divide is
    # replaced by an approximate EUP reciprocal (drops the Newton-iteration
    # VALU ops; exp + rcp both use the otherwise-free EUP slot).
    t = jnp.exp(jnp.minimum(v, 20.0))
    p = t * (t + 2.0)
    return v * p * pl.reciprocal(p + 2.0, approx=True)


def critic_kernel(x_ref,
                  w1_ref, b1_ref,
                  w2_ref, b2_ref,
                  w3_ref, b3_ref,
                  w4_ref, b4_ref,
                  out_ref):
    """One batch tile of BOTH Q heads (head parameters stacked on axis 0)."""
    # Cast the x tile to bf16 once; it is reused by both heads' layer-1 dot.
    # (x crosses the pallas boundary in f32 so the batch tile only needs the
    # f32 (8,128) alignment; the tile is tiny, so the extra DMA is noise.)
    x = x_ref[...].astype(jnp.bfloat16)                       # (bb, in_dim)
    for h in range(2):                                        # static unroll
        z = jnp.dot(x, w1_ref[h],
                    preferred_element_type=jnp.float32) + b1_ref[h]
        z = _mish(z)
        z = _mish(jnp.dot(z.astype(jnp.bfloat16), w2_ref[h],
                          preferred_element_type=jnp.float32) + b2_ref[h])
        z = _mish(jnp.dot(z.astype(jnp.bfloat16), w3_ref[h],
                          preferred_element_type=jnp.float32) + b3_ref[h])
        # Final Linear(H, 1): f32 VPU multiply + XLU lane reduction instead of
        # a 1-wide MXU matmul; write this head's column directly (no concat).
        q = jnp.sum(z * w4_ref[h], axis=-1, keepdims=True) + b4_ref[h]
        out_ref[:, h:h + 1] = q


def _choose_batch_tile(B, block_b):
    """Adaptive batch tile: minimise padding, keep bb a multiple of 8, and
    force >= 2 grid steps (when possible) so v7x's two TensorCores both get
    work via the "parallel" grid axis."""
    n_tiles = max(1, -(-B // block_b))
    if n_tiles == 1 and B > 8:
        n_tiles = 2
    bb = max(8, _round_up(-(-B // n_tiles), 8))
    Bp = _round_up(B, bb)
    return bb, Bp


def critic_forward(state, action, q1_params, q2_params, *, block_b=1024):
    """Equivalent of Critic.forward: returns (q1, q2), each (B, 1) float32."""
    state = state.astype(jnp.float32)
    action = action.astype(jnp.float32)
    B = state.shape[0]

    # Single layer-1 operand: x = [state | action] (one K=in_dim dot per head).
    x = jnp.concatenate([state, action], axis=-1)
    in_dim = x.shape[1]

    # Stack the two heads' parameters along a leading axis of size 2.
    def stack(f):
        return jnp.stack([f(q1_params), f(q2_params)], axis=0)

    w1 = stack(lambda p: p[0]).astype(jnp.bfloat16)   # (2, in_dim, H)
    b1 = stack(lambda p: p[1])                        # (2, 1, H)  f32
    w2 = stack(lambda p: p[2]).astype(jnp.bfloat16)   # (2, H, H)
    b2 = stack(lambda p: p[3])                        # (2, 1, H)  f32
    w3 = stack(lambda p: p[4]).astype(jnp.bfloat16)   # (2, H, H)
    b3 = stack(lambda p: p[5])                        # (2, 1, H)  f32
    w4 = stack(lambda p: p[6].reshape(1, -1))         # (2, 1, H)  f32 row vec
    b4 = stack(lambda p: p[7])                        # (2, 1, 1)  f32
    H = w2.shape[-1]

    bb, Bp = _choose_batch_tile(B, int(block_b))
    if Bp != B:
        x = jnp.pad(x, ((0, Bp - B), (0, 0)))

    # Constant-index weight/bias specs: DMA'd once, VMEM-resident for the
    # whole batch grid.
    full3 = lambda shape: pl.BlockSpec(shape, lambda i: (0, 0, 0))

    out = pl.pallas_call(
        critic_kernel,
        out_shape=jax.ShapeDtypeStruct((Bp, 2), jnp.float32),
        grid_spec=pltpu.PrefetchScalarGridSpec(
            num_scalar_prefetch=0,
            grid=(Bp // bb,),
            in_specs=[
                pl.BlockSpec((bb, in_dim), lambda i: (i, 0)),   # x tile
                full3((2, in_dim, H)), full3((2, 1, H)),        # layer 1
                full3((2, H, H)), full3((2, 1, H)),             # layer 2
                full3((2, H, H)), full3((2, 1, H)),             # layer 3
                full3((2, 1, H)), full3((2, 1, 1)),             # layer 4
            ],
            out_specs=pl.BlockSpec((bb, 2), lambda i: (i, 0)),
        ),
        compiler_params=pltpu.CompilerParams(
            dimension_semantics=("parallel",)),
    )(x, w1, b1, w2, b2, w3, b3, w4, b4)

    out = out[:B]
    return out[:, 0:1], out[:, 1:2]


def critic_q_min(state, action, q1_params, q2_params, *, block_b=1024):
    q1, q2 = critic_forward(state, action, q1_params, q2_params,
                            block_b=block_b)
    return jnp.minimum(q1, q2)


# ---------------------------------------------------------------------------
# Parameter init (PyTorch nn.Linear default) and pure-JAX references.
# ---------------------------------------------------------------------------

def init_linear(key, fan_in, fan_out):
    """PyTorch-style default Linear init: U(-1/sqrt(fan_in), 1/sqrt(fan_in))."""
    kw, kb = jax.random.split(key)
    bound = 1.0 / jnp.sqrt(jnp.float32(fan_in))
    w = jax.random.uniform(kw, (fan_in, fan_out), jnp.float32, -bound, bound)
    b = jax.random.uniform(kb, (1, fan_out), jnp.float32, -bound, bound)
    return w, b


def init_q_params(key, in_dim, hidden_dim):
    k1, k2, k3, k4 = jax.random.split(key, 4)
    w1, b1 = init_linear(k1, in_dim, hidden_dim)
    w2, b2 = init_linear(k2, hidden_dim, hidden_dim)
    w3, b3 = init_linear(k3, hidden_dim, hidden_dim)
    w4, b4 = init_linear(k4, hidden_dim, 1)
    return (w1, b1, w2, b2, w3, b3, w4, b4)


def reference_forward(state, action, q1_params, q2_params,
                      *, matmul_dtype=jnp.float32):
    """Pure-JAX reference with canonical mish = x * tanh(softplus(x)).

    matmul_dtype=jnp.bfloat16 mirrors the kernel's mixed precision (bf16
    operands for layers 1-3 with f32 accumulation; f32 final layer)."""
    def mish(v):
        sp = jnp.maximum(v, 0.0) + jnp.log1p(jnp.exp(-jnp.abs(v)))
        return v * jnp.tanh(sp)

    def mm(a, w):
        return jnp.dot(a.astype(matmul_dtype), w.astype(matmul_dtype),
                       preferred_element_type=jnp.float32)

    def head(x, params):
        w1, b1, w2, b2, w3, b3, w4, b4 = params
        h = mish(mm(x, w1) + b1)
        h = mish(mm(h, w2) + b2)
        h = mish(mm(h, w3) + b3)
        return h @ w4 + b4        # final Linear(H,1) stays f32, like the kernel

    x = jnp.concatenate([state, action], axis=-1)
    return head(x, q1_params), head(x, q2_params)


if __name__ == "__main__":
    # Small shapes consistent with the module (hidden_dim=256 is the module
    # default).  batch=200 exercises the adaptive tiling: bb=104, 2 parallel
    # grid steps, 8 padded rows that are sliced off.
    batch = 200
    state_dim = 11
    action_dim = 3
    hidden_dim = 256

    key = jax.random.PRNGKey(0)
    ks, ka, kq1, kq2 = jax.random.split(key, 4)

    state = jax.random.normal(ks, (batch, state_dim), jnp.float32)
    action = jax.random.normal(ka, (batch, action_dim), jnp.float32)

    q1_params = init_q_params(kq1, state_dim + action_dim, hidden_dim)
    q2_params = init_q_params(kq2, state_dim + action_dim, hidden_dim)

    fwd = jax.jit(functools.partial(critic_forward, block_b=1024))
    q1, q2 = fwd(state, action, q1_params, q2_params)
    jax.block_until_ready((q1, q2))

    assert q1.shape == (batch, 1) and q2.shape == (batch, 1)

    # Tighter check against a mixed-precision (bf16-matmul) reference that
    # mirrors the kernel's arithmetic ...
    r1m, r2m = reference_forward(state, action, q1_params, q2_params,
                                 matmul_dtype=jnp.bfloat16)
    assert jnp.allclose(q1, r1m, atol=1e-2, rtol=1e-2), \
        float(jnp.max(jnp.abs(q1 - r1m)))
    assert jnp.allclose(q2, r2m, atol=1e-2, rtol=1e-2), \
        float(jnp.max(jnp.abs(q2 - r2m)))

    # ... plus a looser sanity check against the full-f32 reference
    # (tolerance deliberately widened for the bf16 MXU path).
    r1, r2 = reference_forward(state, action, q1_params, q2_params)
    assert jnp.allclose(q1, r1, atol=5e-2, rtol=5e-2), \
        float(jnp.max(jnp.abs(q1 - r1)))
    assert jnp.allclose(q2, r2, atol=5e-2, rtol=5e-2), \
        float(jnp.max(jnp.abs(q2 - r2)))

    # q_min path (matches Critic.q_min).
    qmin = critic_q_min(state, action, q1_params, q2_params)
    jax.block_until_ready(qmin)
    assert jnp.allclose(qmin, jnp.minimum(q1, q2))

    print("KERNEL_OK")
</pallas_src>

<mosaic_0001>
module attributes {stable_mosaic.version = 11 : i64} {
  func.func @critic_kernel(%arg0: i32, %arg1: memref<104x14xf32, #tpu.memory_space<vmem>>, %arg2: memref<2x14x256xbf16, #tpu.memory_space<vmem>>, %arg3: memref<2x1x256xf32, #tpu.memory_space<vmem>>, %arg4: memref<2x256x256xbf16, #tpu.memory_space<vmem>>, %arg5: memref<2x1x256xf32, #tpu.memory_space<vmem>>, %arg6: memref<2x256x256xbf16, #tpu.memory_space<vmem>>, %arg7: memref<2x1x256xf32, #tpu.memory_space<vmem>>, %arg8: memref<2x1x256xf32, #tpu.memory_space<vmem>>, %arg9: memref<2x1x1xf32, #tpu.memory_space<vmem>>, %arg10: memref<104x2xf32, #tpu.memory_space<vmem>>) attributes {dimension_semantics = [#tpu.dimension_semantics<parallel>], iteration_bounds = array<i64: 2>, scalar_prefetch = 0 : i64, scratch_operands = 0 : i64, tpu.core_type = #tpu.core_type<tc>, window_params = [{transform_indices = @transform_0, window_bounds = array<i64: 104, 14>}, {pipeline_mode = #tpu.pipeline_mode<synchronous>, transform_indices = @transform_1, window_bounds = array<i64: 2, 14, 256>}, {pipeline_mode = #tpu.pipeline_mode<synchronous>, transform_indices = @transform_2, window_bounds = array<i64: 2, 1, 256>}, {pipeline_mode = #tpu.pipeline_mode<synchronous>, transform_indices = @transform_3, window_bounds = array<i64: 2, 256, 256>}, {pipeline_mode = #tpu.pipeline_mode<synchronous>, transform_indices = @transform_4, window_bounds = array<i64: 2, 1, 256>}, {pipeline_mode = #tpu.pipeline_mode<synchronous>, transform_indices = @transform_5, window_bounds = array<i64: 2, 256, 256>}, {pipeline_mode = #tpu.pipeline_mode<synchronous>, transform_indices = @transform_6, window_bounds = array<i64: 2, 1, 256>}, {pipeline_mode = #tpu.pipeline_mode<synchronous>, transform_indices = @transform_7, window_bounds = array<i64: 2, 1, 256>}, {pipeline_mode = #tpu.pipeline_mode<synchronous>, transform_indices = @transform_8, window_bounds = array<i64: 2, 1, 1>}, {transform_indices = @transform_9, window_bounds = array<i64: 104, 2>}]} {
    %c0 = arith.constant 0 : index
    %c0_0 = arith.constant 0 : index
    %0 = vector.load %arg1[%c0, %c0_0] : memref<104x14xf32, #tpu.memory_space<vmem>>, vector<104x14xf32>
    %1 = arith.truncf %0 : vector<104x14xf32> to vector<104x14xbf16>
    %c0_1 = arith.constant 0 : index
    %c0_2 = arith.constant 0 : index
    %c0_3 = arith.constant 0 : index
    %2 = vector.load %arg2[%c0_1, %c0_2, %c0_3] : memref<2x14x256xbf16, #tpu.memory_space<vmem>>, vector<1x14x256xbf16>
    %3 = vector.shape_cast %2 : vector<1x14x256xbf16> to vector<14x256xbf16>
    %cst = arith.constant dense<0.000000e+00> : vector<104x256xf32>
    %4 = tpu.matmul %1, %3, %cst {dimension_numbers = #tpu.dot_dimension_numbers<[1], [0], [0], [1], [0, 0, 1, 1], [], []>} : vector<104x14xbf16>, vector<14x256xbf16>, vector<104x256xf32> -> vector<104x256xf32>
    %c0_4 = arith.constant 0 : index
    %c0_5 = arith.constant 0 : index
    %c0_6 = arith.constant 0 : index
    %5 = vector.load %arg3[%c0_4, %c0_5, %c0_6] : memref<2x1x256xf32, #tpu.memory_space<vmem>>, vector<1x1x256xf32>
    %6 = vector.shape_cast %5 : vector<1x1x256xf32> to vector<1x256xf32>
    %7 = vector.broadcast %6 : vector<1x256xf32> to vector<104x256xf32>
    %8 = arith.addf %4, %7 : vector<104x256xf32>
    %cst_7 = arith.constant 2.000000e+01 : f32
    %9 = vector.broadcast %cst_7 : f32 to vector<104x256xf32>
    %10 = arith.minimumf %8, %9 : vector<104x256xf32>
    %11 = math.exp %10 : vector<104x256xf32>
    %cst_8 = arith.constant 2.000000e+00 : f32
    %12 = vector.broadcast %cst_8 : f32 to vector<104x256xf32>
    %13 = arith.addf %11, %12 : vector<104x256xf32>
    %14 = arith.mulf %11, %13 : vector<104x256xf32>
    %15 = arith.mulf %8, %14 : vector<104x256xf32>
    %cst_9 = arith.constant 2.000000e+00 : f32
    %16 = vector.broadcast %cst_9 : f32 to vector<104x256xf32>
    %17 = arith.addf %14, %16 : vector<104x256xf32>
    %18 = tpu.reciprocal %17 {approx = true} : vector<104x256xf32> -> vector<104x256xf32>
    %19 = arith.mulf %15, %18 : vector<104x256xf32>
    %20 = arith.truncf %19 : vector<104x256xf32> to vector<104x256xbf16>
    %c0_10 = arith.constant 0 : index
    %c0_11 = arith.constant 0 : index
    %c0_12 = arith.constant 0 : index
    %21 = vector.load %arg4[%c0_10, %c0_11, %c0_12] : memref<2x256x256xbf16, #tpu.memory_space<vmem>>, vector<1x256x256xbf16>
    %22 = vector.shape_cast %21 : vector<1x256x256xbf16> to vector<256x256xbf16>
    %cst_13 = arith.constant dense<0.000000e+00> : vector<104x256xf32>
    %23 = tpu.matmul %20, %22, %cst_13 {dimension_numbers = #tpu.dot_dimension_numbers<[1], [0], [0], [1], [0, 0, 1, 1], [], []>} : vector<104x256xbf16>, vector<256x256xbf16>, vector<104x256xf32> -> vector<104x256xf32>
    %c0_14 = arith.constant 0 : index
    %c0_15 = arith.constant 0 : index
    %c0_16 = arith.constant 0 : index
    %24 = vector.load %arg5[%c0_14, %c0_15, %c0_16] : memref<2x1x256xf32, #tpu.memory_space<vmem>>, vector<1x1x256xf32>
    %25 = vector.shape_cast %24 : vector<1x1x256xf32> to vector<1x256xf32>
    %26 = vector.broadcast %25 : vector<1x256xf32> to vector<104x256xf32>
    %27 = arith.addf %23, %26 : vector<104x256xf32>
    %cst_17 = arith.constant 2.000000e+01 : f32
    %28 = vector.broadcast %cst_17 : f32 to vector<104x256xf32>
    %29 = arith.minimumf %27, %28 : vector<104x256xf32>
    %30 = math.exp %29 : vector<104x256xf32>
    %cst_18 = arith.constant 2.000000e+00 : f32
    %31 = vector.broadcast %cst_18 : f32 to vector<104x256xf32>
    %32 = arith.addf %30, %31 : vector<104x256xf32>
    %33 = arith.mulf %30, %32 : vector<104x256xf32>
    %34 = arith.mulf %27, %33 : vector<104x256xf32>
    %cst_19 = arith.constant 2.000000e+00 : f32
    %35 = vector.broadcast %cst_19 : f32 to vector<104x256xf32>
    %36 = arith.addf %33, %35 : vector<104x256xf32>
    %37 = tpu.reciprocal %36 {approx = true} : vector<104x256xf32> -> vector<104x256xf32>
    %38 = arith.mulf %34, %37 : vector<104x256xf32>
    %39 = arith.truncf %38 : vector<104x256xf32> to vector<104x256xbf16>
    %c0_20 = arith.constant 0 : index
    %c0_21 = arith.constant 0 : index
    %c0_22 = arith.constant 0 : index
    %40 = vector.load %arg6[%c0_20, %c0_21, %c0_22] : memref<2x256x256xbf16, #tpu.memory_space<vmem>>, vector<1x256x256xbf16>
    %41 = vector.shape_cast %40 : vector<1x256x256xbf16> to vector<256x256xbf16>
    %cst_23 = arith.constant dense<0.000000e+00> : vector<104x256xf32>
    %42 = tpu.matmul %39, %41, %cst_23 {dimension_numbers = #tpu.dot_dimension_numbers<[1], [0], [0], [1], [0, 0, 1, 1], [], []>} : vector<104x256xbf16>, vector<256x256xbf16>, vector<104x256xf32> -> vector<104x256xf32>
    %c0_24 = arith.constant 0 : index
    %c0_25 = arith.constant 0 : index
    %c0_26 = arith.constant 0 : index
    %43 = vector.load %arg7[%c0_24, %c0_25, %c0_26] : memref<2x1x256xf32, #tpu.memory_space<vmem>>, vector<1x1x256xf32>
    %44 = vector.shape_cast %43 : vector<1x1x256xf32> to vector<1x256xf32>
    %45 = vector.broadcast %44 : vector<1x256xf32> to vector<104x256xf32>
    %46 = arith.addf %42, %45 : vector<104x256xf32>
    %cst_27 = arith.constant 2.000000e+01 : f32
    %47 = vector.broadcast %cst_27 : f32 to vector<104x256xf32>
    %48 = arith.minimumf %46, %47 : vector<104x256xf32>
    %49 = math.exp %48 : vector<104x256xf32>
    %cst_28 = arith.constant 2.000000e+00 : f32
    %50 = vector.broadcast %cst_28 : f32 to vector<104x256xf32>
    %51 = arith.addf %49, %50 : vector<104x256xf32>
    %52 = arith.mulf %49, %51 : vector<104x256xf32>
    %53 = arith.mulf %46, %52 : vector<104x256xf32>
    %cst_29 = arith.constant 2.000000e+00 : f32
    %54 = vector.broadcast %cst_29 : f32 to vector<104x256xf32>
    %55 = arith.addf %52, %54 : vector<104x256xf32>
    %56 = tpu.reciprocal %55 {approx = true} : vector<104x256xf32> -> vector<104x256xf32>
    %57 = arith.mulf %53, %56 : vector<104x256xf32>
    %c0_30 = arith.constant 0 : index
    %c0_31 = arith.constant 0 : index
    %c0_32 = arith.constant 0 : index
    %58 = vector.load %arg8[%c0_30, %c0_31, %c0_32] : memref<2x1x256xf32, #tpu.memory_space<vmem>>, vector<1x1x256xf32>
    %59 = vector.shape_cast %58 : vector<1x1x256xf32> to vector<1x256xf32>
    %60 = vector.broadcast %59 : vector<1x256xf32> to vector<104x256xf32>
    %61 = arith.mulf %57, %60 : vector<104x256xf32>
    %cst_33 = arith.constant dense<0.000000e+00> : vector<104xf32>
    %62 = vector.multi_reduction <add>, %61, %cst_33 [1] : vector<104x256xf32> to vector<104xf32>
    %63 = vector.shape_cast %62 : vector<104xf32> to vector<104x1xf32>
    %c0_34 = arith.constant 0 : index
    %c0_35 = arith.constant 0 : index
    %c0_36 = arith.constant 0 : index
    %64 = vector.load %arg9[%c0_34, %c0_35, %c0_36] : memref<2x1x1xf32, #tpu.memory_space<vmem>>, vector<1x1x1xf32>
    %65 = vector.shape_cast %64 : vector<1x1x1xf32> to vector<1x1xf32>
    %66 = vector.broadcast %65 : vector<1x1xf32> to vector<104x1xf32>
    %67 = arith.addf %63, %66 : vector<104x1xf32>
    %c0_37 = arith.constant 0 : index
    %c0_38 = arith.constant 0 : index
    %68 = vector.load %arg10[%c0_37, %c0_38] : memref<104x2xf32, #tpu.memory_space<vmem>>, vector<104x1xf32>
    tpu.vector_store %arg10[%c0_37, %c0_38], %67 {strides = array<i32>} : memref<104x2xf32, #tpu.memory_space<vmem>>, vector<104x1xf32>,
    %c1 = arith.constant 1 : index
    %c0_39 = arith.constant 0 : index
    %c0_40 = arith.constant 0 : index
    %69 = vector.load %arg2[%c1, %c0_39, %c0_40] : memref<2x14x256xbf16, #tpu.memory_space<vmem>>, vector<1x14x256xbf16>
    %70 = vector.shape_cast %69 : vector<1x14x256xbf16> to vector<14x256xbf16>
    %cst_41 = arith.constant dense<0.000000e+00> : vector<104x256xf32>
    %71 = tpu.matmul %1, %70, %cst_41 {dimension_numbers = #tpu.dot_dimension_numbers<[1], [0], [0], [1], [0, 0, 1, 1], [], []>} : vector<104x14xbf16>, vector<14x256xbf16>, vector<104x256xf32> -> vector<104x256xf32>
    %c1_42 = arith.constant 1 : index
    %c0_43 = arith.constant 0 : index
    %c0_44 = arith.constant 0 : index
    %72 = vector.load %arg3[%c1_42, %c0_43, %c0_44] : memref<2x1x256xf32, #tpu.memory_space<vmem>>, vector<1x1x256xf32>
    %73 = vector.shape_cast %72 : vector<1x1x256xf32> to vector<1x256xf32>
    %74 = vector.broadcast %73 : vector<1x256xf32> to vector<104x256xf32>
    %75 = arith.addf %71, %74 : vector<104x256xf32>
    %cst_45 = arith.constant 2.000000e+01 : f32
    %76 = vector.broadcast %cst_45 : f32 to vector<104x256xf32>
    %77 = arith.minimumf %75, %76 : vector<104x256xf32>
    %78 = math.exp %77 : vector<104x256xf32>
    %cst_46 = arith.constant 2.000000e+00 : f32
    %79 = vector.broadcast %cst_46 : f32 to vector<104x256xf32>
    %80 = arith.addf %78, %79 : vector<104x256xf32>
    %81 = arith.mulf %78, %80 : vector<104x256xf32>
    %82 = arith.mulf %75, %81 : vector<104x256xf32>
    %cst_47 = arith.constant 2.000000e+00 : f32
    %83 = vector.broadcast %cst_47 : f32 to vector<104x256xf32>
    %84 = arith.addf %81, %83 : vector<104x256xf32>
    %85 = tpu.reciprocal %84 {approx = true} : vector<104x256xf32> -> vector<104x256xf32>
    %86 = arith.mulf %82, %85 : vector<104x256xf32>
    %87 = arith.truncf %86 : vector<104x256xf32> to vector<104x256xbf16>
    %c1_48 = arith.constant 1 : index
    %c0_49 = arith.constant 0 : index
    %c0_50 = arith.constant 0 : index
    %88 = vector.load %arg4[%c1_48, %c0_49, %c0_50] : memref<2x256x256xbf16, #tpu.memory_space<vmem>>, vector<1x256x256xbf16>
    %89 = vector.shape_cast %88 : vector<1x256x256xbf16> to vector<256x256xbf16>
    %cst_51 = arith.constant dense<0.000000e+00> : vector<104x256xf32>
    %90 = tpu.matmul %87, %89, %cst_51 {dimension_numbers = #tpu.dot_dimension_numbers<[1], [0], [0], [1], [0, 0, 1, 1], [], []>} : vector<104x256xbf16>, vector<256x256xbf16>, vector<104x256xf32> -> vector<104x256xf32>
    %c1_52 = arith.constant 1 : index
    %c0_53 = arith.constant 0 : index
    %c0_54 = arith.constant 0 : index
    %91 = vector.load %arg5[%c1_52, %c0_53, %c0_54] : memref<2x1x256xf32, #tpu.memory_space<vmem>>, vector<1x1x256xf32>
    %92 = vector.shape_cast %91 : vector<1x1x256xf32> to vector<1x256xf32>
    %93 = vector.broadcast %92 : vector<1x256xf32> to vector<104x256xf32>
    %94 = arith.addf %90, %93 : vector<104x256xf32>
    %cst_55 = arith.constant 2.000000e+01 : f32
    %95 = vector.broadcast %cst_55 : f32 to vector<104x256xf32>
    %96 = arith.minimumf %94, %95 : vector<104x256xf32>
    %97 = math.exp %96 : vector<104x256xf32>
    %cst_56 = arith.constant 2.000000e+00 : f32
    %98 = vector.broadcast %cst_56 : f32 to vector<104x256xf32>
    %99 = arith.addf %97, %98 : vector<104x256xf32>
    %100 = arith.mulf %97, %99 : vector<104x256xf32>
    %101 = arith.mulf %94, %100 : vector<104x256xf32>
    %cst_57 = arith.constant 2.000000e+00 : f32
    %102 = vector.broadcast %cst_57 : f32 to vector<104x256xf32>
    %103 = arith.addf %100, %102 : vector<104x256xf32>
    %104 = tpu.reciprocal %103 {approx = true} : vector<104x256xf32> -> vector<104x256xf32>
    %105 = arith.mulf %101, %104 : vector<104x256xf32>
    %106 = arith.truncf %105 : vector<104x256xf32> to vector<104x256xbf16>
    %c1_58 = arith.constant 1 : index
    %c0_59 = arith.constant 0 : index
    %c0_60 = arith.constant 0 : index
    %107 = vector.load %arg6[%c1_58, %c0_59, %c0_60] : memref<2x256x256xbf16, #tpu.memory_space<vmem>>, vector<1x256x256xbf16>
    %108 = vector.shape_cast %107 : vector<1x256x256xbf16> to vector<256x256xbf16>
    %cst_61 = arith.constant dense<0.000000e+00> : vector<104x256xf32>
    %109 = tpu.matmul %106, %108, %cst_61 {dimension_numbers = #tpu.dot_dimension_numbers<[1], [0], [0], [1], [0, 0, 1, 1], [], []>} : vector<104x256xbf16>, vector<256x256xbf16>, vector<104x256xf32> -> vector<104x256xf32>
    %c1_62 = arith.constant 1 : index
    %c0_63 = arith.constant 0 : index
    %c0_64 = arith.constant 0 : index
    %110 = vector.load %arg7[%c1_62, %c0_63, %c0_64] : memref<2x1x256xf32, #tpu.memory_space<vmem>>, vector<1x1x256xf32>
    %111 = vector.shape_cast %110 : vector<1x1x256xf32> to vector<1x256xf32>
    %112 = vector.broadcast %111 : vector<1x256xf32> to vector<104x256xf32>
    %113 = arith.addf %109, %112 : vector<104x256xf32>
    %cst_65 = arith.constant 2.000000e+01 : f32
    %114 = vector.broadcast %cst_65 : f32 to vector<104x256xf32>
    %115 = arith.minimumf %113, %114 : vector<104x256xf32>
    %116 = math.exp %115 : vector<104x256xf32>
    %cst_66 = arith.constant 2.000000e+00 : f32
    %117 = vector.broadcast %cst_66 : f32 to vector<104x256xf32>
    %118 = arith.addf %116, %117 : vector<104x256xf32>
    %119 = arith.mulf %116, %118 : vector<104x256xf32>
    %120 = arith.mulf %113, %119 : vector<104x256xf32>
    %cst_67 = arith.constant 2.000000e+00 : f32
    %121 = vector.broadcast %cst_67 : f32 to vector<104x256xf32>
    %122 = arith.addf %119, %121 : vector<104x256xf32>
    %123 = tpu.reciprocal %122 {approx = true} : vector<104x256xf32> -> vector<104x256xf32>
    %124 = arith.mulf %120, %123 : vector<104x256xf32>
    %c1_68 = arith.constant 1 : index
    %c0_69 = arith.constant 0 : index
    %c0_70 = arith.constant 0 : index
    %125 = vector.load %arg8[%c1_68, %c0_69, %c0_70] : memref<2x1x256xf32, #tpu.memory_space<vmem>>, vector<1x1x256xf32>
    %126 = vector.shape_cast %125 : vector<1x1x256xf32> to vector<1x256xf32>
    %127 = vector.broadcast %126 : vector<1x256xf32> to vector<104x256xf32>
    %128 = arith.mulf %124, %127 : vector<104x256xf32>
    %cst_71 = arith.constant dense<0.000000e+00> : vector<104xf32>
    %129 = vector.multi_reduction <add>, %128, %cst_71 [1] : vector<104x256xf32> to vector<104xf32>
    %130 = vector.shape_cast %129 : vector<104xf32> to vector<104x1xf32>
    %c1_72 = arith.constant 1 : index
    %c0_73 = arith.constant 0 : index
    %c0_74 = arith.constant 0 : index
    %131 = vector.load %arg9[%c1_72, %c0_73, %c0_74] : memref<2x1x1xf32, #tpu.memory_space<vmem>>, vector<1x1x1xf32>
    %132 = vector.shape_cast %131 : vector<1x1x1xf32> to vector<1x1xf32>
    %133 = vector.broadcast %132 : vector<1x1xf32> to vector<104x1xf32>
    %134 = arith.addf %130, %133 : vector<104x1xf32>
    %c0_75 = arith.constant 0 : index
    %c1_76 = arith.constant 1 : index
    %135 = vector.load %arg10[%c0_75, %c1_76] : memref<104x2xf32, #tpu.memory_space<vmem>>, vector<104x1xf32>
    tpu.vector_store %arg10[%c0_75, %c1_76], %134 {strides = array<i32>} : memref<104x2xf32, #tpu.memory_space<vmem>>, vector<104x1xf32>,
    return
  }
  func.func @transform_0(%arg0: i32) -> (i32, i32) {
    %c0_i32 = arith.constant 0 : i32
    %c0_i32_0 = arith.constant 0 : i32
    return %arg0, %c0_i32 : i32, i32
  }
  func.func @transform_1(%arg0: i32) -> (i32, i32, i32) {
    %c0_i32 = arith.constant 0 : i32
    %c0_i32_0 = arith.constant 0 : i32
    %c0_i32_1 = arith.constant 0 : i32
    %c0_i32_2 = arith.constant 0 : i32
    return %c0_i32, %c0_i32_0, %c0_i32_1 : i32, i32, i32
  }
  func.func @transform_2(%arg0: i32) -> (i32, i32, i32) {
    %c0_i32 = arith.constant 0 : i32
    %c0_i32_0 = arith.constant 0 : i32
    %c0_i32_1 = arith.constant 0 : i32
    %c0_i32_2 = arith.constant 0 : i32
    return %c0_i32, %c0_i32_0, %c0_i32_1 : i32, i32, i32
  }
  func.func @transform_3(%arg0: i32) -> (i32, i32, i32) {
    %c0_i32 = arith.constant 0 : i32
    %c0_i32_0 = arith.constant 0 : i32
    %c0_i32_1 = arith.constant 0 : i32
    %c0_i32_2 = arith.constant 0 : i32
    return %c0_i32, %c0_i32_0, %c0_i32_1 : i32, i32, i32
  }
  func.func @transform_4(%arg0: i32) -> (i32, i32, i32) {
    %c0_i32 = arith.constant 0 : i32
    %c0_i32_0 = arith.constant 0 : i32
    %c0_i32_1 = arith.constant 0 : i32
    %c0_i32_2 = arith.constant 0 : i32
    return %c0_i32, %c0_i32_0, %c0_i32_1 : i32, i32, i32
  }
  func.func @transform_5(%arg0: i32) -> (i32, i32, i32) {
    %c0_i32 = arith.constant 0 : i32
    %c0_i32_0 = arith.constant 0 : i32
    %c0_i32_1 = arith.constant 0 : i32
    %c0_i32_2 = arith.constant 0 : i32
    return %c0_i32, %c0_i32_0, %c0_i32_1 : i32, i32, i32
  }
  func.func @transform_6(%arg0: i32) -> (i32, i32, i32) {
    %c0_i32 = arith.constant 0 : i32
    %c0_i32_0 = arith.constant 0 : i32
    %c0_i32_1 = arith.constant 0 : i32
    %c0_i32_2 = arith.constant 0 : i32
    return %c0_i32, %c0_i32_0, %c0_i32_1 : i32, i32, i32
  }
  func.func @transform_7(%arg0: i32) -> (i32, i32, i32) {
    %c0_i32 = arith.constant 0 : i32
    %c0_i32_0 = arith.constant 0 : i32
    %c0_i32_1 = arith.constant 0 : i32
    %c0_i32_2 = arith.constant 0 : i32
    return %c0_i32, %c0_i32_0, %c0_i32_1 : i32, i32, i32
  }
  func.func @transform_8(%arg0: i32) -> (i32, i32, i32) {
    %c0_i32 = arith.constant 0 : i32
    %c0_i32_0 = arith.constant 0 : i32
    %c0_i32_1 = arith.constant 0 : i32
    %c0_i32_2 = arith.constant 0 : i32
    return %c0_i32, %c0_i32_0, %c0_i32_1 : i32, i32, i32
  }
  func.func @transform_9(%arg0: i32) -> (i32, i32) {
    %c0_i32 = arith.constant 0 : i32
    %c0_i32_0 = arith.constant 0 : i32
    return %arg0, %c0_i32 : i32, i32
  }
}

</mosaic_0001>

<bundles_post_ra>
// kernel: critic_forward.1
= control target key start
LH: loop header
LB: loop body
LE: loop exit
PB: predicated region body
PF: predicated region fallthrough
CT: control target
= control target key end

     0   :  { %s4810_s30 = smov 0   ;;  %s6917_s0 = inlined_call_operand.vmem [shape: f32[208,14], index: 0, kind: input, shape index: {}]   ;;  %s6918_s1 = inlined_call_operand.vmem [shape: bf16[2,14,256], index: 1, kind: input, shape index: {}]   ;;  %s6919_s2 = inlined_call_operand.vmem [shape: f32[2,1,256], index: 2, kind: input, shape index: {}]   ;;  %s6920_s3 = inlined_call_operand.vmem [shape: bf16[2,256,256], index: 3, kind: input, shape index: {}]   ;;  %s6921_s4 = inlined_call_operand.vmem [shape: f32[2,1,256], index: 4, kind: input, shape index: {}]   ;;  %s6922_s5 = inlined_call_operand.vmem [shape: bf16[2,256,256], index: 5, kind: input, shape index: {}]   ;;  %s6923_s6 = inlined_call_operand.vmem [shape: f32[2,1,256], index: 6, kind: input, shape index: {}]   ;;  %s6924_s7 = inlined_call_operand.vmem [shape: f32[2,1,256], index: 7, kind: input, shape index: {}]   ;;  %s6925_s8 = inlined_call_operand.vmem [shape: f32[2,1,1], index: 8, kind: input, shape index: {}]   ;;  %s6926_s9 = inlined_call_operand.vmem [shape: f32[208,2], index: 9, kind: output, shape index: {}]  }
   0x1 LB: > { %s3656_s10 = sadd.s32 4294967295, %s4756_s30   ;;  %p3660_p0 = scmp.ge.s32.totalorder %s4756_s30, 1  ;;  %s4756_s30 = sphi %s4810_s30, %s19_s30  }
   0x2   : > { %p288_p1 = scmp.lt.s32.totalorder %s4756_s30, 3 }
   0x4   : > { %p289_p2 = pnand %p3660_p0, %p288_p1 }
   0x6   : > { %292 = sbr.rel (%p289_p2) target bundleno = 1466 (0x5ba), region = 56 }
   0xd   : > { %v3928_v0 = vld [vmem:[%s6918_s1 + $0x4] ss:$8 sps:$4 sm:$0x7f]   ;;  %vm401_vm0 = vcmask 1046528   ;;  %s324_s15 = smul.u32 13, %s3656_s10  ;;  %v4758_v2 = vmov 0   ;;  %v361_v57 = vlaneseq }
   0xe   : > { %v3930_v1 = vld [vmem:[%s6918_s1] ss:$8 sps:$4 sm:$0x7f]   ;;  %3665 = vmatprep.subr.msk.bf16.mxu0 %vm401_vm0, %v3928_v0  ;;  %440 = vmatprep.mubr.bf16.mxu0 %v4758_v2  ;;  %v3931_v3 = vld [vmem:[%s6920_s3 + $0x4] ss:$8 sps:$4 sm:$0xff]   ;;  %vm379_vm1 = vcmask 113664  }
   0xf   : > { %v403_v4 = vsel %vm401_vm0, %v3930_v1, 0  ;;  %p325_p3 = scmp.lt.s32.totalorder %s324_s15, 25  ;;  %v3933_v5 = vld [vmem:[%s6920_s3] ss:$8 sps:$4 sm:$0xff]   ;;  %961 = vmatprep.subr.bf16.mxu1 %v3931_v3  ;;  %v3934_v6 = vld [vmem:[%s6920_s3 + $0x14] ss:$8 sps:$4 sm:$0xff]  }
  0x10   : > { %409 = vmatpush1.bf16.msra.mxu0 %v403_v4  ;;  %962 = vmatpush1.bf16.msra.mxu1 %v3933_v5  ;;  %v3936_v7 = vld [vmem:[%s6920_s3 + $0x10] ss:$8 sps:$4 sm:$0xff]   ;;  %v3937_v8 = vld [vmem:[%s6920_s3 + $0x24] ss:$8 sps:$4 sm:$0xff]   ;;  %v3939_v11 = vld [vmem:[%s6920_s3 + $0x20] ss:$8 sps:$4 sm:$0xff]  }
  0x11   : > { %s6962_s15 = smov (!%p325_p3, %s324_s15), 25  ;;  %963 = vmatprep.subr.bf16.mxu1 %v3934_v6  ;;  %v3940_v13 = vld [vmem:[%s6920_s3 + $0x34] ss:$8 sps:$4 sm:$0xff]   ;;  %v3942_v14 = vld [vmem:[%s6920_s3 + $0x30] ss:$8 sps:$4 sm:$0xff]   ;;  %v362_v58 = vshrl.u32 %v361_v57, 7 }
  0x12   : > { %s3661_s26 = sshll.u32 %s6962_s15, 3  ;;  %v3943_v17 = vld [vmem:[%s6920_s3 + $0x44] ss:$8 sps:$4 sm:$0xff]   ;;  %v3945_v18 = vld [vmem:[%s6920_s3 + $0x40] ss:$8 sps:$4 sm:$0xff]   ;;  %vm1946_vm2 = vcmask 7168  }
  0x13   : > { %s4850_s29 = scalar_lea.vmem %s6917_s0, %s3661_s26  ;;  %v3946_v20 = vld [vmem:[%s6920_s3 + $0x54] ss:$8 sps:$4 sm:$0xff]   ;;  %v3948_v35 = vld [vmem:[%s6920_s3 + $0x50] ss:$8 sps:$4 sm:$0xff]   ;;  %v3949_v36 = vld [vmem:[%s6920_s3 + $0x64] ss:$8 sps:$4 sm:$0xff]   ;;  %s6584_s25 = scalar_lea.vmem %s6926_s9, %s3661_s26 }
  0x14   : > { %v337_v9 = vld [vmem:[%s4850_s29] sm:$0xff]  ;;  %v338_v10 = vld [vmem:[%s4850_s29 + $0x8] sm:$0xff]  ;;  %964 = vmatpush1.bf16.msra.mxu1 %v3936_v7  ;;  %v339_v15 = vld [vmem:[%s4850_s29 + $0x10] sm:$0xff]  ;;  %v4984_v59 = vsub.s32 0, %v362_v58  ;;  %v4989_v61 = vsub.s32 1, %v362_v58  ;;  %s4759_s11 = smov 1  }
  0x15   : > { %v4857_v12 = vpack.c.bf16 %v338_v10, %v337_v9  ;;  %965 = vmatprep.subr.bf16.mxu1 %v3937_v8  ;;  %v340_v16 = vld [vmem:[%s4850_s29 + $0x18] sm:$0xff]  ;;  %v341_v21 = vld [vmem:[%s4850_s29 + $0x20] sm:$0xff]  ;;  %v342_v22 = vld [vmem:[%s4850_s29 + $0x28] sm:$0xff]  ;;  %vm3586_vm3 = vcmask 15368  }
  0x16   : > { %v4876_v19 = vpack.c.bf16 %v340_v16, %v339_v15  ;;  %v4886_v23 = vpack.c.bf16 %v342_v22, %v341_v21  ;;  %v343_v24 = vld [vmem:[%s4850_s29 + $0x30] sm:$0xff]  ;;  %v344_v25 = vld [vmem:[%s4850_s29 + $0x38] sm:$0xff]  ;;  %v345_v27 = vld [vmem:[%s4850_s29 + $0x40] sm:$0xff]  ;;  %6934 = vst [vmem:[#allocation2_spill] sm:$0xff] %v4984_v59 }
  0x17   : > { %3666 = vmatmul.mubr.msk.bf16.vlgmr.msra.gmra.mrb[0].mxu0 %vm379_vm1, %v4857_v12  ;;  %v4893_v26 = vpack.c.bf16 %v344_v25, %v343_v24  ;;  %v346_v28 = vld [vmem:[%s4850_s29 + $0x48] sm:$0xff]  ;;  %v347_v30 = vld [vmem:[%s4850_s29 + $0x50] sm:$0xff]  ;;  %v348_v31 = vld [vmem:[%s4850_s29 + $0x58] sm:$0xff]  ;;  %6935 = vst [vmem:[#allocation3_spill] sm:$0xff] %v4989_v61 }
  0x18   : > { %450 = vmatprep.mubr.bf16.mxu0 %v4758_v2  ;;  %966 = vmatpush1.bf16.msra.mxu1 %v3939_v11  ;;  %v4900_v29 = vpack.c.bf16 %v346_v28, %v345_v27  ;;  %v4907_v32 = vpack.c.bf16 %v348_v31, %v347_v30  ;;  %v349_v33 = vld [vmem:[%s4850_s29 + $0x60] sm:$0xff]  ;;  %v3952_v38 = vld [vmem:[%s6920_s3 + $0x74] ss:$8 sps:$4 sm:$0xff]   ;;  %v3954_v39 = vld [vmem:[%s6920_s3 + $0x70] ss:$8 sps:$4 sm:$0xff]  }
  0x19   : > { %967 = vmatprep.subr.bf16.mxu1 %v3940_v13  ;;  %v4913_v34 = vpack.c.bf16 %v349_v33, %v349_v33  ;;  %v3951_v37 = vld [vmem:[%s6920_s3 + $0x60] ss:$8 sps:$4 sm:$0xff]   ;;  %v3955_v40 = vld [vmem:[%s6920_s3 + $0x84] ss:$8 sps:$4 sm:$0xff]   ;;  %v3958_v42 = vld [vmem:[%s6920_s3 + $0x94] ss:$8 sps:$4 sm:$0xff]  }
  0x1a   : > { %v3957_v41 = vld [vmem:[%s6920_s3 + $0x80] ss:$8 sps:$4 sm:$0xff]   ;;  %v3960_v43 = vld [vmem:[%s6920_s3 + $0x90] ss:$8 sps:$4 sm:$0xff]   ;;  %v3961_v44 = vld [vmem:[%s6920_s3 + $0xa4] ss:$8 sps:$4 sm:$0xff]  }
  0x1b   : > { %v3963_v45 = vld [vmem:[%s6920_s3 + $0xa0] ss:$8 sps:$4 sm:$0xff]   ;;  %v3964_v46 = vld [vmem:[%s6920_s3 + $0xb4] ss:$8 sps:$4 sm:$0xff]   ;;  %v3966_v47 = vld [vmem:[%s6920_s3 + $0xb0] ss:$8 sps:$4 sm:$0xff]  }
  0x1c   : > { %968 = vmatpush1.bf16.msra.mxu1 %v3942_v14  ;;  %v3967_v48 = vld [vmem:[%s6920_s3 + $0xc4] ss:$8 sps:$4 sm:$0xff]   ;;  %v3969_v49 = vld [vmem:[%s6920_s3 + $0xc0] ss:$8 sps:$4 sm:$0xff]   ;;  %v3970_v50 = vld [vmem:[%s6920_s3 + $0xd4] ss:$8 sps:$4 sm:$0xff]  }
  0x1d   : > { %969 = vmatprep.subr.bf16.mxu1 %v3943_v17  ;;  %v3972_v51 = vld [vmem:[%s6920_s3 + $0xd0] ss:$8 sps:$4 sm:$0xff]   ;;  %v3973_v52 = vld [vmem:[%s6920_s3 + $0xe4] ss:$8 sps:$4 sm:$0xff]   ;;  %v3975_v53 = vld [vmem:[%s6920_s3 + $0xe0] ss:$8 sps:$4 sm:$0xff]  }
  0x1e   : > { %v3976_v54 = vld [vmem:[%s6920_s3 + $0xf4] ss:$8 sps:$4 sm:$0xff]   ;;  %v3978_v55 = vld [vmem:[%s6920_s3 + $0xf0] ss:$8 sps:$4 sm:$0xff]   ;;  %v359_v60 = vld [vmem:[%s6919_s2] sm:$0x3] }
  0x1f   : > { %3667 = vmatmul.mubr.msk.bf16.gmra.mrb[4].mxu0 %vm379_vm1, %v4876_v19  ;;  %v3979_v56 = vld [vmem:[%s6918_s1 + $0x14] ss:$8 sps:$4 sm:$0x7f]   ;;  %v4992_v62 = vrot.slane %v359_v60, %v4984_v59  ;;  %v4995_v63 = vrot.slane %v359_v60, %v4989_v61 }
  0x20   : > { %460 = vmatprep.mubr.bf16.mxu0 %v4758_v2  ;;  %970 = vmatpush1.bf16.msra.mxu1 %v3945_v18 }
  0x21   : > { %971 = vmatprep.subr.bf16.mxu1 %v3946_v20 }
  0x24   : > { %972 = vmatpush1.bf16.msra.mxu1 %v3948_v35 }
  0x25   : > { %973 = vmatprep.subr.bf16.mxu1 %v3949_v36 }
  0x27   : > { %3668 = vmatmul.mubr.msk.bf16.gmra.mrb[8].mxu0 %vm379_vm1, %v4886_v23 }
  0x28   : > { %470 = vmatprep.mubr.bf16.mxu0 %v4758_v2  ;;  %974 = vmatpush1.bf16.msra.mxu1 %v3951_v37 }
  0x29   : > { %975 = vmatprep.subr.bf16.mxu1 %v3952_v38 }
  0x2c   : > { %976 = vmatpush1.bf16.msra.mxu1 %v3954_v39 }
  0x2d   : > { %977 = vmatprep.subr.bf16.mxu1 %v3955_v40 }
  0x2f   : > { %3669 = vmatmul.mubr.msk.bf16.gmra.mrb[12].mxu0 %vm379_vm1, %v4893_v26 }
  0x30   : > { %480 = vmatprep.mubr.bf16.mxu0 %v4758_v2  ;;  %978 = vmatpush1.bf16.msra.mxu1 %v3957_v41 }
  0x31   : > { %979 = vmatprep.subr.bf16.mxu1 %v3958_v42 }
  0x34   : > { %980 = vmatpush1.bf16.msra.mxu1 %v3960_v43 }
  0x35   : > { %981 = vmatprep.subr.bf16.mxu1 %v3961_v44 }
  0x37   : > { %3670 = vmatmul.mubr.msk.bf16.gmra.mrb[16].mxu0 %vm379_vm1, %v4900_v29 }
  0x38   : > { %490 = vmatprep.mubr.bf16.mxu0 %v4758_v2  ;;  %982 = vmatpush1.bf16.msra.mxu1 %v3963_v45 }
  0x39   : > { %983 = vmatprep.subr.bf16.mxu1 %v3964_v46 }
  0x3c   : > { %984 = vmatpush1.bf16.msra.mxu1 %v3966_v47 }
  0x3d   : > { %985 = vmatprep.subr.bf16.mxu1 %v3967_v48 }
  0x3f   : > { %3671 = vmatmul.mubr.msk.bf16.gmra.mrb[20].mxu0 %vm379_vm1, %v4907_v32 }
  0x40   : > { %500 = vmatprep.mubr.bf16.mxu0 %v4758_v2  ;;  %986 = vmatpush1.bf16.msra.mxu1 %v3969_v49 }
  0x41   : > { %987 = vmatprep.subr.bf16.mxu1 %v3970_v50 }
  0x44   : > { %988 = vmatpush1.bf16.msra.mxu1 %v3972_v51 }
  0x45   : > { %989 = vmatprep.subr.bf16.mxu1 %v3973_v52 }
  0x47   : > { %3672 = vmatmul.mubr.msk.bf16.gmra.mrb[24].mxu0 %vm379_vm1, %v4913_v34 }
  0x48   : > { %990 = vmatpush1.bf16.msra.mxu1 %v3975_v53 }
  0x49   : > { %991 = vmatprep.subr.bf16.mxu1 %v3976_v54 }
  0x4c   : > { %992 = vmatpush1.bf16.msra.mxu1 %v3978_v55 }
  0x4d   : > { %3743 = vmatprep.subr.msk.bf16.mxu1 %vm401_vm0, %v3979_v56 }
  0xea   : > { %v442_v0 = vpop.f32.mrb[0].mxu0 }
  0xeb   : > { %v4998_v1 = vadd.f32 %v442_v0, %v4992_v62  ;;  %v444_v3 = vpop.f32.mrb[1].mxu0 }
  0xec   : > { %v5001_v4 = vadd.f32 %v444_v3, %v4995_v63  ;;  %v446_v5 = vpop.f32.mrb[2].mxu0 }
  0xed   : > { %v509_v6 = vmin.f32 %v4998_v1, 20.0  ;;  %v5005_v7 = vadd.f32 %v446_v5, %v4992_v62  ;;  %v448_v8 = vpop.f32.mrb[3].mxu0 }
  0xee   : > { %v510_v9 = vmin.f32 %v5001_v4, 20.0  ;;  %v5009_v10 = vadd.f32 %v448_v8, %v4995_v63 }
  0xef   : > { %v535_v11 = vmul.f32 1.442695, %v509_v6  ;;  %v511_v13 = vmin.f32 %v5005_v7, 20.0 }
  0xf0   : > { %v537_v14 = vmul.f32 1.442695, %v510_v9  ;;  %v512_v15 = vmin.f32 %v5009_v10, 20.0 }
  0xf1   : > { %4126 = vpow2.f32 %v535_v11  ;;  %v539_v16 = vmul.f32 1.442695, %v511_v13 }
  0xf2   : > { %4128 = vpow2.f32 %v537_v14  ;;  %v541_v17 = vmul.f32 1.442695, %v512_v15  ;;  %v452_v18 = vpop.f32.mrb[4].mxu0 }
  0xf3   : > { %4130 = vpow2.f32 %v539_v16  ;;  %v5014_v20 = vadd.f32 %v452_v18, %v4992_v62  ;;  %v454_v21 = vpop.f32.mrb[5].mxu0 }
  0xf4   : > { %4132 = vpow2.f32 %v541_v17  ;;  %v5017_v22 = vadd.f32 %v454_v21, %v4995_v63  ;;  %v456_v24 = vpop.f32.mrb[6].mxu0 }
  0xf5   : > { %v513_v25 = vmin.f32 %v5014_v20, 20.0  ;;  %v5021_v27 = vadd.f32 %v456_v24, %v4992_v62  ;;  %v458_v28 = vpop.f32.mrb[7].mxu0 }
  0xf6   : > { %v514_v30 = vmin.f32 %v5017_v22, 20.0  ;;  %v5025_v31 = vadd.f32 %v458_v28, %v4995_v63 }
  0xf7   : > { %v543_v33 = vmul.f32 1.442695, %v513_v25  ;;  %v515_v35 = vmin.f32 %v5021_v27, 20.0 }
  0xf8   : > { %v545_v36 = vmul.f32 1.442695, %v514_v30  ;;  %v516_v37 = vmin.f32 %v5025_v31, 20.0 }
  0xf9   : > { %4134 = vpow2.f32 %v543_v33  ;;  %v547_v38 = vmul.f32 1.442695, %v515_v35  ;;  %v3981_v33 = vld [vmem:[%s6918_s1 + $0x10] ss:$8 sps:$4 sm:$0x7f]  }
  0xfa   : > { %4136 = vpow2.f32 %v545_v36  ;;  %v549_v39 = vmul.f32 1.442695, %v516_v37  ;;  %v462_v40 = vpop.f32.mrb[8].mxu0 }
  0xfb   : > { %v4127_v41 = vpop.eup %4126  ;;  %4138 = vpow2.f32 %v547_v38  ;;  %v5030_v42 = vadd.f32 %v462_v40, %v4992_v62  ;;  %v464_v43 = vpop.f32.mrb[9].mxu0 }
  0xfc   : > { %v4129_v44 = vpop.eup %4128  ;;  %v587_v45 = vadd.f32 2.0, %v4127_v41  ;;  %4140 = vpow2.f32 %v549_v39  ;;  %v5033_v46 = vadd.f32 %v464_v43, %v4995_v63  ;;  %v466_v47 = vpop.f32.mrb[10].mxu0 }
  0xfd   : > { %v4131_v48 = vpop.eup %4130  ;;  %v588_v49 = vadd.f32 2.0, %v4129_v44  ;;  %v517_v50 = vmin.f32 %v5030_v42, 20.0  ;;  %v5037_v51 = vadd.f32 %v466_v47, %v4992_v62  ;;  %v468_v52 = vpop.f32.mrb[11].mxu0 }
  0xfe   : > { %v4133_v53 = vpop.eup %4132  ;;  %v613_v54 = vmul.f32 %v4127_v41, %v587_v45  ;;  %v589_v55 = vadd.f32 2.0, %v4131_v48  ;;  %v518_v56 = vmin.f32 %v5033_v46, 20.0  ;;  %v5041_v57 = vadd.f32 %v468_v52, %v4995_v63 }
  0xff   : > { %v614_v58 = vmul.f32 %v4129_v44, %v588_v49  ;;  %v590_v60 = vadd.f32 2.0, %v4133_v53  ;;  %v551_v0 = vmul.f32 1.442695, %v517_v50  ;;  %v519_v3 = vmin.f32 %v5037_v51, 20.0 }
 0x100   : > { %v665_v5 = vadd.f32 2.0, %v613_v54  ;;  %v615_v6 = vmul.f32 %v4131_v48, %v589_v55  ;;  %v553_v9 = vmul.f32 1.442695, %v518_v56  ;;  %v520_v16 = vmin.f32 %v5041_v57, 20.0 }
 0x101   : > { %v616_v8 = vmul.f32 %v4133_v53, %v590_v60  ;;  %4142 = vpow2.f32 %v551_v0  ;;  %v666_v14 = vadd.f32 2.0, %v614_v58  ;;  %v555_v15 = vmul.f32 1.442695, %v519_v3 }
 0x102   : > { %v472_v11 = vpop.f32.mrb[12].mxu0  ;;  %4144 = vrcp.f32 %v665_v5  ;;  %v667_v21 = vadd.f32 2.0, %v615_v6  ;;  %v557_v38 = vmul.f32 1.442695, %v520_v16  ;;  %v5060_v50 = vmul.f32 %v613_v54, %v4998_v1 }
 0x103   : > { %v4135_v13 = vpop.eup %4134  ;;  %v474_v17 = vpop.f32.mrb[13].mxu0  ;;  %v5046_v25 = vadd.f32 %v472_v11, %v4992_v62  ;;  %v668_v36 = vadd.f32 2.0, %v616_v8  ;;  %4146 = vpow2.f32 %v553_v9  ;;  %v5063_v53 = vsel %vm401_vm0, %v3981_v33, 0  ;;  %v3984_v33 = vld [vmem:[%s6922_s5 + $0x4] ss:$8 sps:$4 sm:$0xff]  }
 0x104   : > { %v4137_v18 = vpop.eup %4136  ;;  %v591_v24 = vadd.f32 2.0, %v4135_v13  ;;  %v5049_v28 = vadd.f32 %v474_v17, %v4995_v63  ;;  %v476_v30 = vpop.f32.mrb[14].mxu0  ;;  %4148 = vpow2.f32 %v555_v15  ;;  %v5066_v55 = vmul.f32 %v614_v58, %v5001_v4  ;;  %1514 = vmatprep.subr.bf16.mxu0 %v3984_v33 }
 0x105   : > { %v4139_v35 = vpop.eup %4138  ;;  %v592_v37 = vadd.f32 2.0, %v4137_v18  ;;  %v5055_v39 = vadd.f32 %v476_v30, %v4992_v62  ;;  %v478_v40 = vpop.f32.mrb[15].mxu0  ;;  %v521_v45 = vmin.f32 %v5046_v25, 20.0  ;;  %4150 = vpow2.f32 %v557_v38  ;;  %v3982_v30 = vld [vmem:[%s6922_s5] ss:$8 sps:$4 sm:$0xff]  }
 0x106   : > { %v4141_v41 = vpop.eup %4140  ;;  %v617_v43 = vmul.f32 %v4135_v13, %v591_v24  ;;  %v593_v44 = vadd.f32 2.0, %v4139_v35  ;;  %v522_v49 = vmin.f32 %v5049_v28, 20.0  ;;  %4152 = vrcp.f32 %v667_v21  ;;  %1515 = vmatpush1.bf16.msra.mxu0 %v3982_v30 }
 0x107   : > { %v618_v47 = vmul.f32 %v4137_v18, %v592_v37  ;;  %v594_v48 = vadd.f32 2.0, %v4141_v41  ;;  %4154 = vrcp.f32 %v666_v14  ;;  %v5069_v0 = vmul.f32 %v615_v6, %v5005_v7  ;;  %v3987_v37 = vld [vmem:[%s6922_s5 + $0x14] ss:$8 sps:$4 sm:$0xff]  }
 0x108   : > { %v669_v52 = vadd.f32 2.0, %v617_v43  ;;  %v619_v60 = vmul.f32 %v4139_v35, %v593_v44  ;;  %v5072_v3 = vmul.f32 %v616_v8, %v5009_v10  ;;  %v559_v1 = vmul.f32 1.442695, %v521_v45  ;;  %v3985_v44 = vld [vmem:[%s6922_s5 + $0x10] ss:$8 sps:$4 sm:$0xff]   ;;  %1516 = vmatprep.subr.bf16.mxu0 %v3987_v37 }
 0x109   : > { %v670_v56 = vadd.f32 2.0, %v618_v47  ;;  %4156 = vrcp.f32 %v668_v36  ;;  %v620_v9 = vmul.f32 %v4141_v41, %v594_v48  ;;  %v561_v11 = vmul.f32 1.442695, %v522_v49 }
 0x10a   : > { %v482_v54 = vpop.f32.mrb[16].mxu0  ;;  %v523_v13 = vmin.f32 %v5055_v39, 20.0  ;;  %4158 = vrcp.f32 %v669_v52  ;;  %v5076_v15 = vadd.f32 %v478_v40, %v4995_v63  ;;  %v671_v8 = vadd.f32 2.0, %v619_v60  ;;  %1517 = vmatpush1.bf16.msra.mxu0 %v3985_v44 }
 0x10b   : > { %v4143_v5 = vpop.eup %4142  ;;  %v484_v4 = vpop.f32.mrb[17].mxu0  ;;  %v5079_v7 = vadd.f32 %v482_v54, %v4992_v62  ;;  %4160 = vrcp.f32 %v670_v56  ;;  %v5085_v18 = vmul.f32 %v617_v43, %v5014_v20  ;;  %v5103_v40 = vmul.f32 %v618_v47, %v5017_v22  ;;  %v3990_v54 = vld [vmem:[%s6922_s5 + $0x24] ss:$8 sps:$4 sm:$0xff]  }
 0x10c   : > { %v595_v58 = vadd.f32 2.0, %v4143_v5  ;;  %v486_v6 = vpop.f32.mrb[18].mxu0  ;;  %v4145_v10 = vpop.eup %4144  ;;  %v563_v14 = vmul.f32 1.442695, %v523_v13  ;;  %v5082_v16 = vadd.f32 %v484_v4, %v4995_v63  ;;  %4162 = vpow2.f32 %v559_v1  ;;  %1518 = vmatprep.subr.bf16.mxu0 %v3990_v54 }
 0x10d   : > { %v488_v17 = vpop.f32.mrb[19].mxu0  ;;  %v524_v21 = vmin.f32 %v5076_v15, 20.0  ;;  %v525_v24 = vmin.f32 %v5079_v7, 20.0  ;;  %4164 = vpow2.f32 %v561_v11  ;;  %v5097_v20 = vadd.f32 %v486_v6, %v4992_v62  ;;  %v4147_v38 = vpop.eup %4146 }
 0x10e   : > { %v621_v35 = vmul.f32 %v4143_v5, %v595_v58  ;;  %v526_v36 = vmin.f32 %v5082_v16, 20.0  ;;  %v5106_v41 = vmul.f32 %v619_v60, %v5021_v27  ;;  %4166 = vpow2.f32 %v563_v14  ;;  %v4149_v45 = vpop.eup %4148 }
 0x10f   : > { %v565_v43 = vmul.f32 1.442695, %v524_v21  ;;  %v672_v48 = vadd.f32 2.0, %v620_v9  ;;  %v596_v49 = vadd.f32 2.0, %v4147_v38  ;;  %v567_v52 = vmul.f32 1.442695, %v525_v24  ;;  %v4151_v1 = vpop.eup %4150 }
 0x110   : > { %v569_v56 = vmul.f32 1.442695, %v526_v36  ;;  %4168 = vrcp.f32 %v671_v8  ;;  %v597_v22 = vadd.f32 2.0, %v4149_v45  ;;  %v527_v47 = vmin.f32 %v5097_v20, 20.0  ;;  %v4153_v5 = vpop.eup %4152 }
 0x111   : > { %v5113_v27 = vadd.f32 %v488_v17, %v4995_v63  ;;  %v673_v11 = vadd.f32 2.0, %v621_v35  ;;  %v622_v13 = vmul.f32 %v4147_v38, %v596_v49  ;;  %v598_v4 = vadd.f32 2.0, %v4151_v1  ;;  %v4155_v6 = vpop.eup %4154  ;;  %v3988_v38 = vld [vmem:[%s6922_s5 + $0x20] ss:$8 sps:$4 sm:$0xff]  }
 0x112   : > { %v492_v60 = vpop.f32.mrb[20].mxu0  ;;  %4170 = vpow2.f32 %v565_v43  ;;  %v5118_v8 = vmul.f32 %v4149_v45, %v597_v22  ;;  %v5125_v30 = vmul.f32 %v4145_v10, %v5060_v50  ;;  %v5128_v33 = vmul.f32 %v620_v9, %v5025_v31  ;;  %v3993_v31 = vld [vmem:[%s6922_s5 + $0x34] ss:$8 sps:$4 sm:$0xff]   ;;  %1519 = vmatpush1.bf16.msra.mxu0 %v3988_v38 }
 0x113   : > { %v494_v58 = vpop.f32.mrb[21].mxu0  ;;  %4172 = vpow2.f32 %v567_v52  ;;  %v528_v14 = vmin.f32 %v5113_v27, 20.0  ;;  %v5122_v17 = vadd.f32 %v492_v60, %v4992_v62  ;;  %v4157_v24 = vpop.eup %4156  ;;  %v5130_v36 = vmul.f32 %v4151_v1, %v598_v4  ;;  %1520 = vmatprep.subr.bf16.mxu0 %v3993_v31 }
 0x114   : > { %v496_v21 = vpop.f32.mrb[22].mxu0  ;;  %4174 = vrcp.f32 %v672_v48  ;;  %v4159_v43 = vpop.eup %4158  ;;  %v5138_v45 = vmul.f32 %v4153_v5, %v5069_v0  ;;  %v675_v50 = vadd.f32 2.0, %v5118_v8  ;;  %v571_v10 = vmul.f32 1.442695, %v527_v47 }
 0x115   : > { %v5132_v37 = vpop.f32.mrb[23].mxu0  ;;  %4176 = vpow2.f32 %v569_v56  ;;  %v4161_v9 = vpop.eup %4160  ;;  %v5145_v44 = vmul.f32 %v621_v35, %v5030_v42  ;;  %v676_v48 = vadd.f32 2.0, %v5130_v36  ;;  %v718_v49 = vmul.f32 %v4155_v6, %v5066_v55  ;;  %v3991_v55 = vld [vmem:[%s6922_s5 + $0x30] ss:$8 sps:$4 sm:$0xff]  }
 0x116   : > { %4178 = vrcp.f32 %v673_v11  ;;  %v4163_v0 = vpop.eup %4162  ;;  %v674_v52 = vadd.f32 2.0, %v622_v13  ;;  %v573_v1 = vmul.f32 1.442695, %v528_v14  ;;  %v529_v56 = vmin.f32 %v5122_v17, 20.0  ;;  %1521 = vmatpush1.bf16.msra.mxu0 %v3991_v55 }
 0x117   : > { %4180 = vrcp.f32 %v675_v50  ;;  %v4165_v22 = vpop.eup %4164  ;;  %v599_v47 = vadd.f32 2.0, %v4163_v0  ;;  %v5151_v60 = vadd.f32 %v494_v58, %v4995_v63  ;;  %v5154_v42 = vadd.f32 %v496_v21, %v4992_v62  ;;  %v3996_v58 = vld [vmem:[%s6922_s5 + $0x44] ss:$8 sps:$4 sm:$0xff]  }
 0x118   : > { %4182 = vrcp.f32 %v676_v48  ;;  %v4167_v35 = vpop.eup %4166  ;;  %v600_v54 = vadd.f32 2.0, %v4165_v22  ;;  %v575_v5 = vmul.f32 1.442695, %v529_v56  ;;  %v720_v11 = vmul.f32 %v4157_v24, %v5072_v3  ;;  %1522 = vmatprep.subr.bf16.mxu0 %v3996_v58 }
 0x119   : > { %4184 = vpow2.f32 %v571_v10  ;;  %v5165_v6 = vmul.f32 %v4163_v0, %v599_v47  ;;  %v601_v14 = vadd.f32 2.0, %v4167_v35  ;;  %v530_v21 = vmin.f32 %v5151_v60, 20.0 }
 0x11a   : > { %v5160_v4 = vpop.f32.mrb[24].mxu0  ;;  %4186 = vpow2.f32 %v573_v1  ;;  %v4169_v50 = vpop.eup %4168  ;;  %v5171_v10 = vmul.f32 %v4159_v43, %v5085_v18  ;;  %v5173_v3 = vmul.f32 %v4165_v22, %v600_v54  ;;  %v744_v24 = vpack.c.bf16 %v720_v11, %v718_v49  ;;  %v3994_v18 = vld [vmem:[%s6922_s5 + $0x40] ss:$8 sps:$4 sm:$0xff]   ;;  %v3999_v43 = vld [vmem:[%s6922_s5 + $0x54] ss:$8 sps:$4 sm:$0xff]  }
 0x11b   : > { %v5168_v38 = vpop.f32.mrb[25].mxu0  ;;  %4188 = vpow2.f32 %v575_v5  ;;  %v5176_v56 = vmul.f32 %v622_v13, %v5033_v46  ;;  %v677_v0 = vadd.f32 2.0, %v5165_v6  ;;  %v5179_v1 = vmul.f32 %v4167_v35, %v601_v14  ;;  %1523 = vmatpush1.bf16.msra.mxu0 %v3994_v18 }
 0x11c   : > { %v506_v31 = vpop.f32.mrb[26].mxu0  ;;  %v4171_v48 = vpop.eup %4170  ;;  %4190 = vrcp.f32 %v674_v52  ;;  %v678_v22 = vadd.f32 2.0, %v5173_v3  ;;  %v577_v13 = vmul.f32 1.442695, %v530_v21  ;;  %v531_v52 = vmin.f32 %v5154_v42, 20.0  ;;  %993 = vmatprep.mubr.bf16.mxu1 %v744_v24  ;;  %1524 = vmatprep.subr.bf16.mxu0 %v3999_v43 }
 0x11d   : > { %v507_v47 = vpop.f32.mrb[27].mxu0  ;;  %v4173_v49 = vpop.eup %4172  ;;  %v602_v46 = vadd.f32 2.0, %v4171_v48  ;;  %v5190_v55 = vmul.f32 %v4161_v9, %v5103_v40  ;;  %4192 = vrcp.f32 %v677_v0  ;;  %v679_v54 = vadd.f32 2.0, %v5179_v1  ;;  %v3997_v0 = vld [vmem:[%s6922_s5 + $0x50] ss:$8 sps:$4 sm:$0xff]  }
 0x11e   : > { %v4175_v35 = vpop.eup %4174  ;;  %v603_v5 = vadd.f32 2.0, %v4173_v49  ;;  %v649_v14 = vmul.f32 %v5118_v8, %v5037_v51  ;;  %4194 = vrcp.f32 %v678_v22  ;;  %v5197_v21 = vadd.f32 %v5132_v37, %v4995_v63 }
 0x11f   : > { %v4177_v11 = vpop.eup %4176  ;;  %v628_v31 = vmul.f32 %v4171_v48, %v602_v46  ;;  %4196 = vrcp.f32 %v679_v54  ;;  %v743_v9 = vpack.c.bf16 %v5138_v45, %v5125_v30  ;;  %v5207_v8 = vmul.f32 %v4169_v50, %v5106_v41  ;;  %1525 = vmatpush1.bf16.msra.mxu0 %v3997_v0 }
 0x120   : > { %v4179_v24 = vpop.eup %4178  ;;  %v5199_v58 = vmul.f32 %v4173_v49, %v603_v5  ;;  %v604_v40 = vadd.f32 2.0, %v4177_v11  ;;  %4198 = vpow2.f32 %v577_v13  ;;  %v579_v37 = vmul.f32 1.442695, %v531_v52 }
 0x121   : > { %v4181_v51 = vpop.eup %4180  ;;  %v680_v48 = vadd.f32 2.0, %v628_v31  ;;  %v724_v49 = vmul.f32 %v4175_v35, %v5128_v33  ;;  %v650_v22 = vmul.f32 %v5130_v36, %v5041_v57  ;;  %994 = vmatmul.mubr.bf16.vlgmr.msra.gmra.mrb[0].mxu1 %v743_v9  ;;  %v5216_v46 = vmul.f32 %v4179_v24, %v5145_v44 }
 0x122   : > { %v4183_v47 = vpop.eup %4182  ;;  %v681_v30 = vadd.f32 2.0, %v5199_v58  ;;  %v5213_v45 = vmul.f32 %v4177_v11, %v604_v40  ;;  %v532_v41 = vmin.f32 %v5197_v21, 20.0  ;;  %v5221_v50 = vadd.f32 %v5160_v4, %v4992_v62  ;;  %1991 = vmatpush1.bf16.msra.mxu1 %v5063_v53 }
 0x123   : > { %v4185_v18 = vpop.eup %4184  ;;  %4200 = vrcp.f32 %v680_v48  ;;  %v5224_v57 = vmul.f32 %v4181_v51, %v649_v14  ;;  %v651_v36 = vmul.f32 %v5165_v6, %v5046_v25  ;;  %v728_v4 = vmul.f32 %v4183_v47, %v650_v22 }
 0x124   : > { %v4187_v33 = vpop.eup %4186  ;;  %v682_v43 = vadd.f32 2.0, %v5213_v45  ;;  %v605_v13 = vadd.f32 2.0, %v4185_v18  ;;  %4202 = vpow2.f32 %v579_v37  ;;  %v581_v35 = vmul.f32 1.442695, %v532_v41 }
 0x125   : > { %v4189_v44 = vpop.eup %4188  ;;  %v606_v52 = vadd.f32 2.0, %v4187_v33  ;;  %v533_v54 = vmin.f32 %v5221_v50, 20.0  ;;  %4204 = vrcp.f32 %v681_v30  ;;  %v5232_v5 = vadd.f32 %v5168_v38, %v4995_v63 }
 0x126   : > { %v4191_v62 = vpop.eup %4190  ;;  %v631_v53 = vmul.f32 %v4185_v18, %v605_v13  ;;  %4206 = vpow2.f32 %v581_v35  ;;  %v746_v6 = vpack.c.bf16 %v724_v49, %v5190_v55  ;;  %v607_v40 = vadd.f32 2.0, %v4189_v44 }
 0x127   : > { %v632_v11 = vmul.f32 %v4187_v33, %v606_v52  ;;  %v583_v25 = vmul.f32 1.442695, %v533_v54  ;;  %v4193_v14 = vpop.eup %4192  ;;  %4208 = vrcp.f32 %v682_v43  ;;  %v534_v9 = vmin.f32 %v5232_v5, 20.0 }
 0x128   : > { %v683_v24 = vadd.f32 2.0, %v631_v53  ;;  %v4195_v0 = vpop.eup %4194  ;;  %v652_v51 = vmul.f32 %v5173_v3, %v5049_v28  ;;  %v653_v48 = vmul.f32 %v5179_v1, %v5055_v39  ;;  %1003 = vmatprep.mubr.bf16.mxu1 %v746_v6  ;;  %v726_v37 = vmul.f32 %v4191_v62, %v5176_v56 }
 0x129   : > { %v684_v63 = vadd.f32 2.0, %v632_v11  ;;  %4210 = vpow2.f32 %v583_v25  ;;  %v4197_v38 = vpop.eup %4196  ;;  %v729_v55 = vmul.f32 %v4193_v14, %v651_v36  ;;  %v654_v47 = vmul.f32 %v628_v31, %v5076_v15 }
 0x12a   : > { %4212 = vrcp.f32 %v683_v24  ;;  %v4199_v49 = vpop.eup %4198  ;;  %v731_v22 = vmul.f32 %v4197_v38, %v653_v48  ;;  %v585_v30 = vmul.f32 1.442695, %v534_v9  ;;  %v745_v28 = vpack.c.bf16 %v5207_v8, %v5171_v10 }
 0x12b   : > { %4214 = vrcp.f32 %v684_v63  ;;  %v633_v3 = vmul.f32 %v4189_v44, %v607_v40  ;;  %v608_v18 = vadd.f32 2.0, %v4199_v49  ;;  %v748_v39 = vpack.c.bf16 %v728_v4, %v726_v37 }
 0x12c   : > { %v747_v1 = vpack.c.bf16 %v5224_v57, %v5216_v46  ;;  %4216 = vpow2.f32 %v585_v30  ;;  %1004 = vmatmul.mubr.bf16.gmra.mrb[4].mxu1 %v745_v28  ;;  %v749_v56 = vpack.c.bf16 %v731_v22, %v729_v55  ;;  %v730_v33 = vmul.f32 %v4195_v0, %v652_v51 }
 0x12d   : > { %v4201_v41 = vpop.eup %4200  ;;  %v634_v31 = vmul.f32 %v4199_v49, %v608_v18  ;;  %1013 = vmatprep.mubr.bf16.mxu1 %v748_v39  ;;  %v685_v13 = vadd.f32 2.0, %v633_v3  ;;  %v655_v46 = vmul.f32 %v5199_v58, %v5079_v7  ;;  %v656_v57 = vmul.f32 %v5213_v45, %v5082_v16 }
 0x12e   : > { %v732_v15 = vmul.f32 %v4201_v41, %v654_v47  ;;  %v4203_v36 = vpop.eup %4202  ;;  %v657_v25 = vmul.f32 %v631_v53, %v5097_v20  ;;  %v658_v14 = vmul.f32 %v632_v11, %v5113_v27  ;;  %v659_v49 = vmul.f32 %v633_v3, %v5122_v17 }
 0x12f   : > { %v4205_v43 = vpop.eup %4204  ;;  %v609_v52 = vadd.f32 2.0, %v4203_v36  ;;  %v686_v8 = vadd.f32 2.0, %v634_v31  ;;  %4218 = vrcp.f32 %v685_v13  ;;  %v660_v18 = vmul.f32 %v634_v31, %v5151_v60  ;;  %v4009_v31 = vld [vmem:[%s6922_s5 + $0x90] ss:$8 sps:$4 sm:$0xff]  }
 0x130   : > { %v750_v35 = vpack.c.bf16 %v732_v15, %v730_v33  ;;  %v4207_v10 = vpop.eup %4206  ;;  %v733_v0 = vmul.f32 %v4205_v43, %v655_v46  ;;  %v4029_v46 = vld [vmem:[%s6922_s5 + $0xf4] ss:$8 sps:$4 sm:$0xff]  }
 0x131   : > { %v4209_v44 = vpop.eup %4208  ;;  %v635_v54 = vmul.f32 %v4203_v36, %v609_v52  ;;  %v610_v62 = vadd.f32 2.0, %v4207_v10  ;;  %4220 = vrcp.f32 %v686_v8  ;;  %v4018_v8 = vld [vmem:[%s6922_s5 + $0xc0] ss:$8 sps:$4 sm:$0xff]  }
 0x132   : > { %v734_v51 = vmul.f32 %v4209_v44, %v656_v57  ;;  %v4023_v44 = vld [vmem:[%s6922_s5 + $0xd4] ss:$8 sps:$4 sm:$0xff]   ;;  %v4027_v57 = vld [vmem:[%s6922_s5 + $0xf0] ss:$8 sps:$4 sm:$0xff]  }
 0x133   : > { %v4211_v4 = vpop.eup %4210  ;;  %v687_v24 = vadd.f32 2.0, %v635_v54  ;;  %v636_v40 = vmul.f32 %v4207_v10, %v610_v62  ;;  %v661_v22 = vmul.f32 %v635_v54, %v5154_v42  ;;  %v4015_v10 = vld [vmem:[%s6922_s5 + $0xb0] ss:$8 sps:$4 sm:$0xff]   ;;  %v4026_v62 = vld [vmem:[%s6922_s5 + $0xe4] ss:$8 sps:$4 sm:$0xff]  }
 0x134   : > { %v4213_v6 = vpop.eup %4212  ;;  %1014 = vmatmul.mubr.bf16.gmra.mrb[8].mxu1 %v747_v1  ;;  %v611_v58 = vadd.f32 2.0, %v4211_v4  ;;  %v4021_v54 = vld [vmem:[%s6922_s5 + $0xd0] ss:$8 sps:$4 sm:$0xff]  }
 0x135   : > { %v4215_v9 = vpop.eup %4214  ;;  %v735_v48 = vmul.f32 %v4213_v6, %v657_v25  ;;  %4222 = vrcp.f32 %v687_v24  ;;  %v688_v7 = vadd.f32 2.0, %v636_v40  ;;  %1023 = vmatprep.mubr.bf16.mxu1 %v750_v35  ;;  %v662_v1 = vmul.f32 %v636_v40, %v5197_v21  ;;  %v4014_v35 = vld [vmem:[%s6922_s5 + $0xa4] ss:$8 sps:$4 sm:$0xff]   ;;  %v789_v6 = vld [vmem:[%s6921_s4] sm:$0x3] }
 0x136   : > { %v736_v63 = vmul.f32 %v4215_v9, %v658_v14  ;;  %v4217_v16 = vpop.eup %4216  ;;  %v637_v27 = vmul.f32 %v4211_v4, %v611_v58  ;;  %v4024_v4 = vld [vmem:[%s6922_s5 + $0xe0] ss:$8 sps:$4 sm:$0xff]   ;;  %v4032_v25 = vld [vmem:[%s6920_s3 + $0x104] ss:$8 sps:$4 sm:$0xff]   ;;  %v5346_v14 = vrot.slane %v789_v6, %v4984_v59  ;;  %v5349_v24 = vrot.slane %v789_v6, %v4989_v61 }
 0x137   : > { %v751_v45 = vpack.c.bf16 %v735_v48, %v733_v0  ;;  %4224 = vrcp.f32 %v688_v7  ;;  %v612_v20 = vadd.f32 2.0, %v4217_v16 }
 0x138   : > { %v752_v53 = vpack.c.bf16 %v736_v63, %v734_v51  ;;  %v689_v55 = vadd.f32 2.0, %v637_v27  ;;  %v663_v52 = vmul.f32 %v637_v27, %v5221_v50  ;;  %v4008_v50 = vld [vmem:[%s6922_s5 + $0x84] ss:$8 sps:$4 sm:$0xff]  }
 0x139   : > { %v638_v11 = vmul.f32 %v4217_v16, %v612_v20  ;;  %v4219_v37 = vpop.eup %4218 }
 0x13a   : > { %v737_v28 = vmul.f32 %v4219_v37, %v659_v49 }
 0x13b   : > { %v690_v38 = vadd.f32 2.0, %v638_v11  ;;  %v4221_v47 = vpop.eup %4220  ;;  %v664_v43 = vmul.f32 %v638_v11, %v5232_v5  ;;  %v4011_v5 = vld [vmem:[%s6922_s5 + $0x94] ss:$8 sps:$4 sm:$0xff]  }
 0x13c   : > { %1024 = vmatmul.mubr.bf16.gmra.mrb[12].mxu1 %v749_v56  ;;  %v738_v33 = vmul.f32 %v4221_v47, %v660_v18 }
 0x13d   : > { %4226 = vrcp.f32 %v690_v38  ;;  %1033 = vmatprep.mubr.bf16.mxu1 %v752_v53 }
 0x13e   : > { %4228 = vrcp.f32 %v689_v55 }
 0x13f   : > { %v4223_v30 = vpop.eup %4222 }
 0x140   : > { %v739_v39 = vmul.f32 %v4223_v30, %v661_v22 }
 0x141   : > { %v4225_v41 = vpop.eup %4224 }
 0x142   : > { %v740_v56 = vmul.f32 %v4225_v41, %v662_v1  ;;  %v753_v15 = vpack.c.bf16 %v739_v39, %v737_v28 }
 0x144   : > { %1034 = vmatmul.mubr.bf16.gmra.mrb[16].mxu1 %v751_v45  ;;  %v754_v36 = vpack.c.bf16 %v740_v56, %v738_v33 }
 0x146   : > { %1043 = vmatprep.mubr.bf16.mxu1 %v754_v36 }
 0x147   : > { %v4227_v17 = vpop.eup %4226 }
 0x148   : > { %v742_v3 = vmul.f32 %v4227_v17, %v664_v43  ;;  %v4229_v13 = vpop.eup %4228 }
 0x149   : > { %v741_v60 = vmul.f32 %v4229_v13, %v663_v52 }
 0x14a   : > { %v756_v42 = vpack.c.bf16 %v742_v3, %v742_v3 }
 0x14b   : > { %v755_v21 = vpack.c.bf16 %v741_v60, %v741_v60 }
 0x14c   : > { %1044 = vmatmul.mubr.bf16.gmra.mrb[20].mxu1 %v753_v15 }
 0x14d   : > { %1053 = vmatprep.mubr.bf16.mxu1 %v756_v42 }
 0x154   : > { %1054 = vmatmul.mubr.bf16.gmra.mrb[24].mxu1 %v755_v21 }
 0x155   : > { %2022 = vmatprep.mubr.bf16.mxu1 %v4758_v2 }
 0x15c   : > { %3744 = vmatmul.mubr.msk.bf16.vlgmr.msra.gmra.mrb[28].mxu1 %vm379_vm1, %v4857_v12  ;;  %v4002_v12 = vld [vmem:[%s6922_s5 + $0x64] ss:$8 sps:$4 sm:$0xff]  }
 0x15d   : > { %2032 = vmatprep.mubr.bf16.mxu1 %v4758_v2  ;;  %1526 = vmatprep.subr.bf16.mxu0 %v4002_v12 }
 0x164   : > { %3745 = vmatmul.mubr.msk.bf16.gmra.mrb[32].mxu1 %vm379_vm1, %v4876_v19  ;;  %v4000_v19 = vld [vmem:[%s6922_s5 + $0x60] ss:$8 sps:$4 sm:$0xff]  }
 0x165   : > { %2042 = vmatprep.mubr.bf16.mxu1 %v4758_v2  ;;  %1527 = vmatpush1.bf16.msra.mxu0 %v4000_v19 }
 0x16c   : > { %3746 = vmatmul.mubr.msk.bf16.gmra.mrb[36].mxu1 %vm379_vm1, %v4886_v23  ;;  %v4005_v23 = vld [vmem:[%s6922_s5 + $0x74] ss:$8 sps:$4 sm:$0xff]  }
 0x16d   : > { %2052 = vmatprep.mubr.bf16.mxu1 %v4758_v2  ;;  %1528 = vmatprep.subr.bf16.mxu0 %v4005_v23 }
 0x174   : > { %3747 = vmatmul.mubr.msk.bf16.gmra.mrb[40].mxu1 %vm379_vm1, %v4893_v26  ;;  %v4003_v26 = vld [vmem:[%s6922_s5 + $0x70] ss:$8 sps:$4 sm:$0xff]  }
 0x175   : > { %2062 = vmatprep.mubr.bf16.mxu1 %v4758_v2  ;;  %1529 = vmatpush1.bf16.msra.mxu0 %v4003_v26 }
 0x176   : > { %1530 = vmatprep.subr.bf16.mxu0 %v4008_v50 }
 0x17c   : > { %3748 = vmatmul.mubr.msk.bf16.gmra.mrb[44].mxu1 %vm379_vm1, %v4900_v29  ;;  %v4006_v29 = vld [vmem:[%s6922_s5 + $0x80] ss:$8 sps:$4 sm:$0xff]  }
 0x17d   : > { %2072 = vmatprep.mubr.bf16.mxu1 %v4758_v2  ;;  %1531 = vmatpush1.bf16.msra.mxu0 %v4006_v29 }
 0x17e   : > { %1532 = vmatprep.subr.bf16.mxu0 %v4011_v5 }
 0x181   : > { %1533 = vmatpush1.bf16.msra.mxu0 %v4009_v31 }
 0x182   : > { %1534 = vmatprep.subr.bf16.mxu0 %v4014_v35 }
 0x184   : > { %3749 = vmatmul.mubr.msk.bf16.gmra.mrb[48].mxu1 %vm379_vm1, %v4907_v32  ;;  %v4017_v32 = vld [vmem:[%s6922_s5 + $0xb4] ss:$8 sps:$4 sm:$0xff]  }
 0x185   : > { %2082 = vmatprep.mubr.bf16.mxu1 %v4758_v2  ;;  %v4012_v2 = vld [vmem:[%s6922_s5 + $0xa0] ss:$8 sps:$4 sm:$0xff]  }
 0x186   : > { %1535 = vmatpush1.bf16.msra.mxu0 %v4012_v2 }
 0x187   : > { %1536 = vmatprep.subr.bf16.mxu0 %v4017_v32 }
 0x18a   : > { %1537 = vmatpush1.bf16.msra.mxu0 %v4015_v10 }
 0x18c   : > { %3750 = vmatmul.mubr.msk.bf16.gmra.mrb[52].mxu1 %vm379_vm1, %v4913_v34  ;;  %v4020_v34 = vld [vmem:[%s6922_s5 + $0xc4] ss:$8 sps:$4 sm:$0xff]  }
 0x18d   : > { %1538 = vmatprep.subr.bf16.mxu0 %v4020_v34 }
 0x18e   : > { %1539 = vmatpush1.bf16.msra.mxu0 %v4018_v8 }
 0x18f   : > { %1540 = vmatprep.subr.bf16.mxu0 %v4023_v44 }
 0x192   : > { %1541 = vmatpush1.bf16.msra.mxu0 %v4021_v54 }
 0x193   : > { %1542 = vmatprep.subr.bf16.mxu0 %v4026_v62 }
 0x196   : > { %1543 = vmatpush1.bf16.msra.mxu0 %v4024_v4 }
 0x197   : > { %1544 = vmatprep.subr.bf16.mxu0 %v4029_v46  ;;  %v3740_v46 = vld [vmem:[%s6919_s2 + $0x2] sm:$0x3] }
 0x19a   : > { %1545 = vmatpush1.bf16.msra.mxu0 %v4027_v57 }
 0x19b   : > { %2545 = vmatprep.subr.bf16.mxu0 %v4032_v25 }
 0x1f4   : > { %v995_v40 = vpop.f32.mrb[0].mxu1 }
 0x1f5   : > { %v5352_v9 = vadd.f32 %v995_v40, %v5346_v14  ;;  %v997_v0 = vpop.f32.mrb[1].mxu1 }
 0x1f6   : > { %v5355_v51 = vadd.f32 %v997_v0, %v5349_v24  ;;  %v999_v48 = vpop.f32.mrb[2].mxu1 }
 0x1f7   : > { %v1062_v63 = vmin.f32 %v5352_v9, 20.0  ;;  %v5359_v7 = vadd.f32 %v999_v48, %v5346_v14  ;;  %v1001_v58 = vpop.f32.mrb[3].mxu1  ;;  %v5401_v48 = vrot.slane %v3740_v46, %v4984_v59 }
 0x1f8   : > { %v1063_v16 = vmin.f32 %v5355_v51, 20.0  ;;  %v5363_v45 = vadd.f32 %v1001_v58, %v5349_v24 }
 0x1f9   : > { %v1088_v20 = vmul.f32 1.442695, %v1062_v63  ;;  %v1064_v53 = vmin.f32 %v5359_v7, 20.0 }
 0x1fa   : > { %v1090_v27 = vmul.f32 1.442695, %v1063_v16  ;;  %v1065_v11 = vmin.f32 %v5363_v45, 20.0 }
 0x1fb   : > { %4230 = vpow2.f32 %v1088_v20  ;;  %v1092_v38 = vmul.f32 1.442695, %v1064_v53 }
 0x1fc   : > { %4232 = vpow2.f32 %v1090_v27  ;;  %v1094_v37 = vmul.f32 1.442695, %v1065_v11 }
 0x1fd   : > { %4234 = vpow2.f32 %v1092_v38 }
 0x1fe   : > { %4236 = vpow2.f32 %v1094_v37 }
 0x1ff   : > { %v1005_v55 = vpop.f32.mrb[4].mxu1 }
 0x200   : > { %v5368_v47 = vadd.f32 %v1005_v55, %v5346_v14  ;;  %v1007_v49 = vpop.f32.mrb[5].mxu1  ;;  %v5412_v55 = vrot.slane %v3740_v46, %v4989_v61 }
 0x201   : > { %v5371_v22 = vadd.f32 %v1007_v49, %v5349_v24  ;;  %v1009_v30 = vpop.f32.mrb[6].mxu1 }
 0x202   : > { %v1066_v28 = vmin.f32 %v5368_v47, 20.0  ;;  %v5375_v18 = vadd.f32 %v1009_v30, %v5346_v14  ;;  %v1011_v39 = vpop.f32.mrb[7].mxu1 }
 0x203   : > { %v1067_v1 = vmin.f32 %v5371_v22, 20.0  ;;  %v5379_v41 = vadd.f32 %v1011_v39, %v5349_v24 }
 0x204   : > { %v1096_v33 = vmul.f32 1.442695, %v1066_v28  ;;  %v1068_v56 = vmin.f32 %v5375_v18, 20.0 }
 0x205   : > { %v4231_v15 = vpop.eup %4230  ;;  %v1098_v36 = vmul.f32 1.442695, %v1067_v1  ;;  %v1069_v43 = vmin.f32 %v5379_v41, 20.0 }
 0x206   : > { %v4233_v17 = vpop.eup %4232  ;;  %v1140_v3 = vadd.f32 2.0, %v4231_v15  ;;  %4238 = vpow2.f32 %v1096_v33  ;;  %v1100_v42 = vmul.f32 1.442695, %v1068_v56 }
 0x207   : > { %v4235_v13 = vpop.eup %4234  ;;  %v1141_v52 = vadd.f32 2.0, %v4233_v17  ;;  %4240 = vpow2.f32 %v1098_v36  ;;  %v1102_v60 = vmul.f32 1.442695, %v1069_v43  ;;  %v1015_v21 = vpop.f32.mrb[8].mxu1 }
 0x208   : > { %v4237_v12 = vpop.eup %4236  ;;  %v1166_v19 = vmul.f32 %v4231_v15, %v1140_v3  ;;  %v1142_v23 = vadd.f32 2.0, %v4235_v13  ;;  %4242 = vpow2.f32 %v1100_v42  ;;  %v5384_v26 = vadd.f32 %v1015_v21, %v5346_v14  ;;  %v1017_v50 = vpop.f32.mrb[9].mxu1 }
 0x209   : > { %v1167_v29 = vmul.f32 %v4233_v17, %v1141_v52  ;;  %v1143_v5 = vadd.f32 2.0, %v4237_v12  ;;  %4244 = vpow2.f32 %v1102_v60  ;;  %v5387_v31 = vadd.f32 %v1017_v50, %v5349_v24  ;;  %v1019_v35 = vpop.f32.mrb[10].mxu1 }
 0x20a   : > { %v1218_v2 = vadd.f32 2.0, %v1166_v19  ;;  %v1168_v32 = vmul.f32 %v4235_v13, %v1142_v23  ;;  %v1070_v10 = vmin.f32 %v5384_v26, 20.0  ;;  %v1021_v34 = vpop.f32.mrb[11].mxu1  ;;  %v5395_v25 = vadd.f32 %v1019_v35, %v5346_v14 }
 0x20b   : > { %v1219_v8 = vadd.f32 2.0, %v1167_v29  ;;  %v1169_v44 = vmul.f32 %v4237_v12, %v1143_v5  ;;  %v1071_v54 = vmin.f32 %v5387_v31, 20.0  ;;  %v5398_v6 = vadd.f32 %v1021_v34, %v5349_v24 }
 0x20c   : > { %4246 = vrcp.f32 %v1218_v2  ;;  %v1220_v62 = vadd.f32 2.0, %v1168_v32  ;;  %v1104_v4 = vmul.f32 1.442695, %v1070_v10  ;;  %v1072_v58 = vmin.f32 %v5395_v25, 20.0 }
 0x20d   : > { %v1106_v57 = vmul.f32 1.442695, %v1071_v54  ;;  %v1221_v40 = vadd.f32 2.0, %v1169_v44  ;;  %v1073_v16 = vmin.f32 %v5398_v6, 20.0  ;;  %v1192_v12 = vmul.f32 %v1166_v19, %v5352_v9 }
 0x20e   : > { %4248 = vrcp.f32 %v1220_v62  ;;  %v1108_v28 = vmul.f32 1.442695, %v1072_v58  ;;  %v1193_v5 = vmul.f32 %v1167_v29, %v5355_v51  ;;  %v1194_v35 = vmul.f32 %v1168_v32, %v5359_v7 }
 0x20f   : > { %4250 = vrcp.f32 %v1219_v8  ;;  %v1025_v0 = vpop.f32.mrb[12].mxu1  ;;  %v1110_v39 = vmul.f32 1.442695, %v1073_v16  ;;  %v1195_v2 = vmul.f32 %v1169_v44, %v5363_v45 }
 0x210   : > { %v4239_v63 = vpop.eup %4238  ;;  %4252 = vpow2.f32 %v1104_v4  ;;  %v5406_v20 = vadd.f32 %v1025_v0, %v5346_v14  ;;  %v1027_v53 = vpop.f32.mrb[13].mxu1 }
 0x211   : > { %v4241_v27 = vpop.eup %4240  ;;  %v1144_v11 = vadd.f32 2.0, %v4239_v63  ;;  %4254 = vpow2.f32 %v1106_v57  ;;  %v5409_v38 = vadd.f32 %v1027_v53, %v5349_v24  ;;  %v1029_v37 = vpop.f32.mrb[14].mxu1 }
 0x212   : > { %v4243_v49 = vpop.eup %4242  ;;  %v1145_v30 = vadd.f32 2.0, %v4241_v27  ;;  %v1074_v1 = vmin.f32 %v5406_v20, 20.0  ;;  %4256 = vrcp.f32 %v1221_v40  ;;  %v1031_v43 = vpop.f32.mrb[15].mxu1  ;;  %v5417_v60 = vadd.f32 %v1029_v37, %v5346_v14 }
 0x213   : > { %v4245_v33 = vpop.eup %4244  ;;  %v1170_v56 = vmul.f32 %v4239_v63, %v1144_v11  ;;  %v1146_v15 = vadd.f32 2.0, %v4243_v49  ;;  %v1075_v36 = vmin.f32 %v5409_v38, 20.0  ;;  %4258 = vpow2.f32 %v1108_v28 }
 0x214   : > { %v1171_v17 = vmul.f32 %v4241_v27, %v1145_v30  ;;  %v1147_v3 = vadd.f32 2.0, %v4245_v33  ;;  %v1112_v42 = vmul.f32 1.442695, %v1074_v1  ;;  %4260 = vpow2.f32 %v1110_v39 }
 0x215   : > { %v1222_v13 = vadd.f32 2.0, %v1170_v56  ;;  %v1172_v52 = vmul.f32 %v4243_v49, %v1146_v15  ;;  %v5426_v54 = vmul.f32 %v1170_v56, %v5368_v47  ;;  %v1114_v7 = vmul.f32 1.442695, %v1075_v36 }
 0x216   : > { %v4247_v21 = vpop.eup %4246  ;;  %v1223_v23 = vadd.f32 2.0, %v1171_v17  ;;  %v1173_v50 = vmul.f32 %v4245_v33, %v1147_v3  ;;  %4262 = vpow2.f32 %v1112_v42  ;;  %v5429_v62 = vmul.f32 %v1171_v17, %v5371_v22 }
 0x217   : > { %4264 = vrcp.f32 %v1222_v13  ;;  %v1035_v10 = vpop.f32.mrb[16].mxu1  ;;  %v5423_v8 = vmul.f32 %v4247_v21, %v1192_v12  ;;  %v5434_v51 = vmul.f32 %v1172_v52, %v5375_v18  ;;  %v1076_v45 = vmin.f32 %v5417_v60, 20.0 }
 0x218   : > { %v4249_v34 = vpop.eup %4248  ;;  %4266 = vrcp.f32 %v1223_v23  ;;  %v1037_v9 = vpop.f32.mrb[17].mxu1  ;;  %v1224_v44 = vadd.f32 2.0, %v1172_v52  ;;  %v1225_v46 = vadd.f32 2.0, %v1173_v50  ;;  %v5438_v47 = vadd.f32 %v1031_v43, %v5349_v24 }
 0x219   : > { %v4251_v19 = vpop.eup %4250  ;;  %v5431_v4 = vmul.f32 %v4249_v34, %v1194_v35  ;;  %v1039_v29 = vpop.f32.mrb[18].mxu1  ;;  %v5441_v22 = vadd.f32 %v1035_v10, %v5346_v14  ;;  %4268 = vpow2.f32 %v1114_v7  ;;  %v1116_v63 = vmul.f32 1.442695, %v1076_v45 }
 0x21a   : > { %v4253_v32 = vpop.eup %4252  ;;  %v1041_v57 = vpop.f32.mrb[19].mxu1  ;;  %v1077_v16 = vmin.f32 %v5438_v47, 20.0  ;;  %v5448_v27 = vadd.f32 %v1037_v9, %v5349_v24  ;;  %v5450_v37 = vmul.f32 %v4251_v19, %v1193_v5  ;;  %v5453_v30 = vadd.f32 %v1039_v29, %v5346_v14 }
 0x21b   : > { %v4255_v40 = vpop.eup %4254  ;;  %v1296_v0 = vpack.c.bf16 %v5431_v4, %v5423_v8  ;;  %v1148_v18 = vadd.f32 2.0, %v4253_v32  ;;  %v1078_v53 = vmin.f32 %v5441_v22, 20.0  ;;  %4270 = vpow2.f32 %v1116_v63  ;;  %v4038_v4 = vld [vmem:[%s6920_s3 + $0x124] ss:$8 sps:$4 sm:$0xff]  }
 0x21c   : > { %v1149_v58 = vadd.f32 2.0, %v4255_v40  ;;  %v4257_v11 = vpop.eup %4256  ;;  %4272 = vrcp.f32 %v1224_v44  ;;  %v5456_v39 = vmul.f32 %v1173_v50, %v5379_v41  ;;  %v1118_v33 = vmul.f32 1.442695, %v1077_v16 }
 0x21d   : > { %v1174_v49 = vmul.f32 %v4253_v32, %v1148_v18  ;;  %v4259_v28 = vpop.eup %4258  ;;  %4274 = vrcp.f32 %v1225_v46  ;;  %v1120_v43 = vmul.f32 1.442695, %v1078_v53  ;;  %v1079_v52 = vmin.f32 %v5448_v27, 20.0 }
 0x21e   : > { %v1175_v1 = vmul.f32 %v4255_v40, %v1149_v58  ;;  %v4261_v56 = vpop.eup %4260  ;;  %v1150_v36 = vadd.f32 2.0, %v4259_v28  ;;  %4276 = vpow2.f32 %v1118_v33  ;;  %v1273_v23 = vmul.f32 %v4257_v11, %v1195_v2  ;;  %v4030_v11 = vld [vmem:[%s6920_s3 + $0x100] ss:$8 sps:$4 sm:$0xff]  }
 0x21f   : > { %v1226_v15 = vadd.f32 2.0, %v1174_v49  ;;  %v1045_v17 = vpop.f32.mrb[20].mxu1  ;;  %v1151_v13 = vadd.f32 2.0, %v4261_v56  ;;  %v1080_v50 = vmin.f32 %v5453_v30, 20.0  ;;  %v5461_v34 = vmul.f32 %v1174_v49, %v5384_v26 }
 0x220   : > { %v4263_v3 = vpop.eup %4262  ;;  %v1227_v42 = vadd.f32 2.0, %v1175_v1  ;;  %v1047_v21 = vpop.f32.mrb[21].mxu1  ;;  %v1176_v5 = vmul.f32 %v4259_v28, %v1150_v36  ;;  %v5464_v19 = vadd.f32 %v1041_v57, %v5349_v24  ;;  %v5467_v45 = vmul.f32 %v1175_v1, %v5387_v31 }
 0x221   : > { %v4265_v12 = vpop.eup %4264  ;;  %v1152_v41 = vadd.f32 2.0, %v4263_v3  ;;  %v1049_v35 = vpop.f32.mrb[22].mxu1  ;;  %4278 = vrcp.f32 %v1226_v15  ;;  %v1177_v9 = vmul.f32 %v4261_v56, %v1151_v13  ;;  %v1122_v26 = vmul.f32 1.442695, %v1079_v52  ;;  %v4035_v15 = vld [vmem:[%s6920_s3 + $0x114] ss:$8 sps:$4 sm:$0xff]  }
 0x222   : > { %v4267_v10 = vpop.eup %4266  ;;  %v1051_v7 = vpop.f32.mrb[23].mxu1  ;;  %4280 = vrcp.f32 %v1227_v42  ;;  %v1228_v2 = vadd.f32 2.0, %v1176_v5  ;;  %v5472_v32 = vmul.f32 %v4265_v12, %v5426_v54  ;;  %v1124_v18 = vmul.f32 1.442695, %v1080_v50 }
 0x223   : > { %v5469_v29 = vmul.f32 %v4263_v3, %v1152_v41  ;;  %v1229_v44 = vadd.f32 2.0, %v1177_v9  ;;  %4282 = vpow2.f32 %v1120_v43  ;;  %v4269_v46 = vpop.eup %4268  ;;  %v5475_v40 = vmul.f32 %v4267_v10, %v5429_v62 }
 0x224   : > { %4284 = vrcp.f32 %v1228_v2  ;;  %v1153_v31 = vadd.f32 2.0, %v4269_v46  ;;  %v1081_v63 = vmin.f32 %v5464_v19, 20.0  ;;  %v5480_v58 = vadd.f32 %v1045_v17, %v5346_v14 }
 0x225   : > { %v1230_v57 = vadd.f32 2.0, %v5469_v29  ;;  %4286 = vrcp.f32 %v1229_v44  ;;  %v4271_v54 = vpop.eup %4270  ;;  %v5483_v16 = vadd.f32 %v1047_v21, %v5349_v24  ;;  %v5486_v53 = vadd.f32 %v1049_v35, %v5346_v14 }
 0x226   : > { %v1297_v62 = vpack.c.bf16 %v1273_v23, %v5450_v37  ;;  %v4273_v28 = vpop.eup %4272  ;;  %v1179_v1 = vmul.f32 %v4269_v46, %v1153_v31  ;;  %v1154_v33 = vadd.f32 2.0, %v4271_v54  ;;  %v1126_v56 = vmul.f32 1.442695, %v1081_v63  ;;  %v4033_v23 = vld [vmem:[%s6920_s3 + $0x110] ss:$8 sps:$4 sm:$0xff]  }
 0x227   : > { %4288 = vrcp.f32 %v1230_v57  ;;  %v1055_v49 = vpop.f32.mrb[24].mxu1  ;;  %v4275_v43 = vpop.eup %4274  ;;  %v1082_v17 = vmin.f32 %v5480_v58, 20.0  ;;  %v1083_v37 = vmin.f32 %v5483_v16, 20.0  ;;  %v1084_v3 = vmin.f32 %v5486_v53, 20.0 }
 0x228   : > { %4290 = vpow2.f32 %v1122_v26  ;;  %v1057_v36 = vpop.f32.mrb[25].mxu1  ;;  %1546 = vmatprep.mubr.bf16.mxu0 %v1297_v62  ;;  %v4277_v13 = vpop.eup %4276  ;;  %v5499_v52 = vmul.f32 %v1176_v5, %v5395_v25  ;;  %v1231_v21 = vadd.f32 2.0, %v1179_v1  ;;  %v5501_v12 = vmul.f32 %v4271_v54, %v1154_v33  ;;  %v4036_v54 = vld [vmem:[%s6920_s3 + $0x120] ss:$8 sps:$4 sm:$0xff]  }
 0x229   : > { %4292 = vpow2.f32 %v1124_v18  ;;  %v1059_v42 = vpop.f32.mrb[26].mxu1  ;;  %1547 = vmatmul.mubr.bf16.vlgmr.msra.gmra.mrb[28].mxu0 %v1296_v0  ;;  %v1155_v50 = vadd.f32 2.0, %v4277_v13  ;;  %v1128_v35 = vmul.f32 1.442695, %v1082_v17  ;;  %v1130_v10 = vmul.f32 1.442695, %v1083_v37 }
 0x22a   : > { %4294 = vpow2.f32 %v1126_v56  ;;  %v1060_v41 = vpop.f32.mrb[27].mxu1  ;;  %v5510_v2 = vadd.f32 %v1051_v7, %v5349_v24  ;;  %2546 = vmatpush1.bf16.msra.mxu0 %v4030_v11  ;;  %v5513_v5 = vmul.f32 %v4273_v28, %v5434_v51  ;;  %v1203_v44 = vmul.f32 %v1177_v9, %v5398_v6 }
 0x22b   : > { %v4279_v25 = vpop.eup %4278  ;;  %4296 = vrcp.f32 %v1231_v21  ;;  %v1232_v8 = vadd.f32 2.0, %v5501_v12  ;;  %2547 = vmatprep.subr.bf16.mxu0 %v4035_v15  ;;  %v1277_v26 = vmul.f32 %v4275_v43, %v5456_v39  ;;  %v5521_v7 = vmul.f32 %v4277_v13, %v1155_v50 }
 0x22c   : > { %v4281_v0 = vpop.eup %4280  ;;  %4298 = vpow2.f32 %v1128_v35  ;;  %v1132_v46 = vmul.f32 1.442695, %v1084_v3  ;;  %v1085_v51 = vmin.f32 %v5510_v2, 20.0  ;;  %v5525_v6 = vadd.f32 %v1055_v49, %v5346_v14 }
 0x22d   : > { %v4283_v57 = vpop.eup %4282  ;;  %4300 = vrcp.f32 %v1232_v8  ;;  %v5528_v9 = vadd.f32 %v1057_v36, %v5349_v24  ;;  %v1204_v31 = vmul.f32 %v5469_v29, %v5406_v20  ;;  %v1233_v39 = vadd.f32 2.0, %v5521_v7  ;;  %v4041_v20 = vld [vmem:[%s6920_s3 + $0x134] ss:$8 sps:$4 sm:$0xff]  }
 0x22e   : > { %v4285_v18 = vpop.eup %4284  ;;  %v1156_v63 = vadd.f32 2.0, %v4283_v57  ;;  %4302 = vpow2.f32 %v1130_v10  ;;  %2548 = vmatpush1.bf16.msra.mxu0 %v4033_v23  ;;  %v5537_v14 = vmul.f32 %v1179_v1, %v5409_v38  ;;  %v1134_v24 = vmul.f32 1.442695, %v1085_v51  ;;  %v4039_v23 = vld [vmem:[%s6920_s3 + $0x130] ss:$8 sps:$4 sm:$0xff]  }
 0x22f   : > { %v2024_v62 = vpop.f32.mrb[28].mxu1  ;;  %v4287_v11 = vpop.eup %4286  ;;  %4304 = vpow2.f32 %v1132_v46  ;;  %v1086_v49 = vmin.f32 %v5525_v6, 20.0  ;;  %2549 = vmatprep.subr.bf16.mxu0 %v4038_v4  ;;  %v5544_v33 = vmul.f32 %v4279_v25, %v5461_v34  ;;  %v1087_v15 = vmin.f32 %v5528_v9, 20.0 }
 0x230   : > { %v2026_v29 = vpop.f32.mrb[29].mxu1  ;;  %4306 = vrcp.f32 %v1233_v39  ;;  %v1182_v56 = vmul.f32 %v4283_v57, %v1156_v63  ;;  %v1281_v36 = vmul.f32 %v4287_v11, %v1203_v44  ;;  %v1299_v17 = vpack.c.bf16 %v1277_v26, %v5475_v40 }
 0x231   : > { %v4289_v28 = vpop.eup %4288  ;;  %v5547_v38 = vpop.f32.mrb[30].mxu1  ;;  %4308 = vpow2.f32 %v1134_v24  ;;  %v1136_v43 = vmul.f32 1.442695, %v1086_v49  ;;  %v1279_v42 = vmul.f32 %v4281_v0, %v5467_v45  ;;  %v1138_v21 = vmul.f32 1.442695, %v1087_v15 }
 0x232   : > { %v4291_v1 = vpop.eup %4290  ;;  %v5550_v37 = vpop.f32.mrb[31].mxu1  ;;  %v1234_v13 = vadd.f32 2.0, %v1182_v56  ;;  %2550 = vmatpush1.bf16.msra.mxu0 %v4036_v54  ;;  %1556 = vmatprep.mubr.bf16.mxu0 %v1299_v17  ;;  %v1298_v40 = vpack.c.bf16 %v5513_v5, %v5472_v32  ;;  %v5559_v35 = vadd.f32 %v2024_v62, %v5401_v48  ;;  %v4044_v45 = vld [vmem:[%s6920_s3 + $0x144] ss:$8 sps:$4 sm:$0xff]   ;;  %v1206_v10 = vmul.f32 %v5501_v12, %v5417_v60  ;;  %v4042_v60 = vld [vmem:[%s6920_s3 + $0x140] ss:$8 sps:$4 sm:$0xff]  }
 0x233   : > { %v4293_v3 = vpop.eup %4292  ;;  %v1157_v34 = vadd.f32 2.0, %v4291_v1  ;;  %4310 = vpow2.f32 %v1136_v43  ;;  %2551 = vmatprep.subr.bf16.mxu0 %v4041_v20  ;;  %v5567_v8 = vadd.f32 %v2026_v29, %v5412_v55  ;;  %v1301_v5 = vpack.c.bf16 %v1281_v36, %v1279_v42 }
 0x234   : > { %v4295_v41 = vpop.eup %4294  ;;  %v1158_v50 = vadd.f32 2.0, %v4293_v3  ;;  %4312 = vpow2.f32 %v1138_v21  ;;  %1557 = vmatmul.mubr.bf16.gmra.mrb[32].mxu0 %v1298_v40  ;;  %v2091_v32 = vmin.f32 %v5559_v35, 20.0  ;;  %v1280_v46 = vmul.f32 %v4285_v18, %v5499_v52  ;;  %v4047_v52 = vld [vmem:[%s6920_s3 + $0x154] ss:$8 sps:$4 sm:$0xff]   ;;  %v4050_v21 = vld [vmem:[%s6920_s3 + $0x164] ss:$8 sps:$4 sm:$0xff]  }
 0x235   : > { %v1183_v25 = vmul.f32 %v4291_v1, %v1157_v34  ;;  %v1159_v44 = vadd.f32 2.0, %v4295_v41  ;;  %v4297_v4 = vpop.eup %4296  ;;  %4314 = vrcp.f32 %v1234_v13  ;;  %v5576_v63 = vmul.f32 %v4289_v28, %v1204_v31  ;;  %1566 = vmatprep.mubr.bf16.mxu0 %v1301_v5 }
 0x236   : > { %v1184_v0 = vmul.f32 %v4293_v3, %v1158_v50  ;;  %v4299_v26 = vpop.eup %4298  ;;  %2552 = vmatpush1.bf16.msra.mxu0 %v4039_v23  ;;  %v1207_v54 = vmul.f32 %v5521_v7, %v5438_v47  ;;  %v5586_v49 = vmul.f32 %v1182_v56, %v5441_v22  ;;  %v2117_v20 = vmul.f32 1.442695, %v2091_v32 }
 0x237   : > { %v1235_v57 = vadd.f32 2.0, %v1183_v25  ;;  %v1185_v51 = vmul.f32 %v4295_v41, %v1159_v44  ;;  %v5574_v12 = vpop.f32.mrb[32].mxu1  ;;  %v4301_v39 = vpop.eup %4300  ;;  %v1160_v11 = vadd.f32 2.0, %v4299_v26  ;;  %2553 = vmatprep.subr.bf16.mxu0 %v4044_v45  ;;  %v5591_v7 = vmul.f32 %v4297_v4, %v5537_v14  ;;  %v4045_v14 = vld [vmem:[%s6920_s3 + $0x150] ss:$8 sps:$4 sm:$0xff]  }
 0x238   : > { %v1236_v62 = vadd.f32 2.0, %v1184_v0  ;;  %v5583_v18 = vpop.f32.mrb[33].mxu1  ;;  %v4303_v24 = vpop.eup %4302  ;;  %v2092_v1 = vmin.f32 %v5567_v8, 20.0  ;;  %v5598_v22 = vadd.f32 %v5547_v38, %v5401_v48  ;;  %v1300_v56 = vpack.c.bf16 %v1280_v46, %v5544_v33 }
 0x239   : > { %4316 = vrcp.f32 %v1235_v57  ;;  %v1237_v31 = vadd.f32 2.0, %v1185_v51  ;;  %v5588_v29 = vpop.f32.mrb[34].mxu1  ;;  %v4305_v47 = vpop.eup %4304  ;;  %v1186_v28 = vmul.f32 %v4299_v26, %v1160_v11  ;;  %v1161_v15 = vadd.f32 2.0, %v4303_v24 }
 0x23a   : > { %v5594_v36 = vpop.f32.mrb[35].mxu1  ;;  %v4307_v43 = vpop.eup %4306  ;;  %v1162_v17 = vadd.f32 2.0, %v4305_v47  ;;  %2554 = vmatpush1.bf16.msra.mxu0 %v4042_v60  ;;  %v1209_v42 = vmul.f32 %v1183_v25, %v5448_v27  ;;  %v5609_v38 = vmul.f32 %v1184_v0, %v5453_v30  ;;  %v5611_v50 = vmul.f32 %v4301_v39, %v1206_v10  ;;  %v4048_v30 = vld [vmem:[%s6920_s3 + $0x160] ss:$8 sps:$4 sm:$0xff]  }
 0x23b   : > { %4318 = vrcp.f32 %v1237_v31  ;;  %v4309_v3 = vpop.eup %4308  ;;  %v1238_v13 = vadd.f32 2.0, %v1186_v28  ;;  %v1187_v34 = vmul.f32 %v4303_v24, %v1161_v15  ;;  %2555 = vmatprep.subr.bf16.mxu0 %v4047_v52  ;;  %v2119_v45 = vmul.f32 1.442695, %v2092_v1 }
 0x23c   : > { %4320 = vrcp.f32 %v1236_v62  ;;  %v1188_v33 = vmul.f32 %v4305_v47, %v1162_v17  ;;  %v1163_v23 = vadd.f32 2.0, %v4309_v3  ;;  %v2093_v27 = vmin.f32 %v5598_v22, 20.0  ;;  %1567 = vmatmul.mubr.bf16.gmra.mrb[36].mxu0 %v1300_v56 }
 0x23d   : > { %4322 = vpow2.f32 %v2117_v20  ;;  %v4311_v41 = vpop.eup %4310  ;;  %v1239_v40 = vadd.f32 2.0, %v1187_v34  ;;  %v5614_v25 = vmul.f32 %v4307_v43, %v1207_v54  ;;  %v1211_v44 = vmul.f32 %v1185_v51, %v5464_v19  ;;  %v4053_v19 = vld [vmem:[%s6920_s3 + $0x174] ss:$8 sps:$4 sm:$0xff]  }
 0x23e   : > { %v1189_v4 = vmul.f32 %v4309_v3, %v1163_v23  ;;  %v1164_v32 = vadd.f32 2.0, %v4311_v41  ;;  %2556 = vmatpush1.bf16.msra.mxu0 %v4045_v14  ;;  %v4313_v5 = vpop.eup %4312  ;;  %v5621_v10 = vmul.f32 %v1186_v28, %v5480_v58  ;;  %4324 = vrcp.f32 %v1238_v13  ;;  %v4054_v13 = vld [vmem:[%s6920_s3 + $0x180] ss:$8 sps:$4 sm:$0xff]  }
 0x23f   : > { %v2044_v0 = vpop.f32.mrb[36].mxu1  ;;  %v2121_v26 = vmul.f32 1.442695, %v2093_v27  ;;  %v5625_v46 = vadd.f32 %v5550_v37, %v5412_v55  ;;  %2557 = vmatprep.subr.bf16.mxu0 %v4050_v21  ;;  %v4315_v51 = vpop.eup %4314  ;;  %4326 = vrcp.f32 %v1239_v40  ;;  %v1240_v60 = vadd.f32 2.0, %v1188_v33 }
 0x240   : > { %v2046_v57 = vpop.f32.mrb[37].mxu1  ;;  %v1241_v39 = vadd.f32 2.0, %v1189_v4  ;;  %v5630_v54 = vmul.f32 %v4311_v41, %v1164_v32  ;;  %v1165_v62 = vadd.f32 2.0, %v4313_v5  ;;  %4328 = vpow2.f32 %v2119_v45 }
 0x241   : > { %v5632_v58 = vpop.f32.mrb[38].mxu1  ;;  %v2094_v11 = vmin.f32 %v5625_v46, 20.0  ;;  %v5637_v37 = vadd.f32 %v5574_v12, %v5401_v48  ;;  %v5642_v31 = vmul.f32 %v1187_v34, %v5483_v16  ;;  %v5645_v20 = vmul.f32 %v1188_v33, %v5486_v53  ;;  %v4051_v12 = vld [vmem:[%s6920_s3 + $0x170] ss:$8 sps:$4 sm:$0xff]   ;;  %v4056_v53 = vld [vmem:[%s6920_s3 + $0x184] ss:$8 sps:$4 sm:$0xff]  }
 0x242   : > { %v5639_v52 = vpop.f32.mrb[39].mxu1  ;;  %4330 = vrcp.f32 %v1241_v39  ;;  %v5649_v47 = vadd.f32 %v5583_v18, %v5412_v55  ;;  %2558 = vmatpush1.bf16.msra.mxu0 %v4048_v30  ;;  %v5655_v28 = vmul.f32 %v4315_v51, %v5586_v49  ;;  %v5657_v15 = vmul.f32 %v4313_v5, %v1165_v62  ;;  %v4057_v51 = vld [vmem:[%s6920_s3 + $0x190] ss:$8 sps:$4 sm:$0xff]  }
 0x243   : > { %v4317_v24 = vpop.eup %4316  ;;  %4332 = vpow2.f32 %v2121_v26  ;;  %v2123_v16 = vmul.f32 1.442695, %v2094_v11  ;;  %2559 = vmatprep.subr.bf16.mxu0 %v4053_v19  ;;  %v1215_v18 = vmul.f32 %v1189_v4, %v5510_v2  ;;  %v2095_v43 = vmin.f32 %v5637_v37, 20.0  ;;  %v4062_v11 = vld [vmem:[%s6920_s3 + $0x1a4] ss:$8 sps:$4 sm:$0xff]  }
 0x244   : > { %4334 = vrcp.f32 %v1240_v60  ;;  %v2096_v17 = vmin.f32 %v5649_v47, 20.0  ;;  %v1287_v49 = vmul.f32 %v4317_v24, %v1209_v42  ;;  %v1242_v3 = vadd.f32 2.0, %v5630_v54 }
 0x245   : > { %v4319_v1 = vpop.eup %4318  ;;  %4336 = vpow2.f32 %v2123_v16  ;;  %v2125_v21 = vmul.f32 1.442695, %v2095_v43  ;;  %v1303_v2 = vpack.c.bf16 %v5614_v25, %v5591_v7  ;;  %v5673_v23 = vadd.f32 %v5588_v29, %v5401_v48  ;;  %v4059_v7 = vld [vmem:[%s6920_s3 + $0x194] ss:$8 sps:$4 sm:$0xff]  }
 0x246   : > { %v4321_v56 = vpop.eup %4320  ;;  %v1289_v14 = vmul.f32 %v4319_v1, %v1211_v44  ;;  %v2127_v33 = vmul.f32 1.442695, %v2096_v17  ;;  %2560 = vmatpush1.bf16.msra.mxu0 %v4051_v12  ;;  %v1243_v41 = vadd.f32 2.0, %v5657_v15  ;;  %v1302_v45 = vpack.c.bf16 %v5611_v50, %v5576_v63 }
 0x247   : > { %v4323_v34 = vpop.eup %4322  ;;  %v2054_v42 = vpop.f32.mrb[40].mxu1  ;;  %v5680_v27 = vadd.f32 %v5594_v36, %v5412_v55  ;;  %2561 = vmatprep.subr.bf16.mxu0 %v4056_v53  ;;  %v1288_v29 = vmul.f32 %v4321_v56, %v5609_v38  ;;  %4338 = vpow2.f32 %v2125_v21  ;;  %1576 = vmatprep.mubr.bf16.mxu0 %v1303_v2  ;;  %v2097_v44 = vmin.f32 %v5673_v23, 20.0  ;;  %v4065_v21 = vld [vmem:[%s6920_s3 + $0x1b4] ss:$8 sps:$4 sm:$0xff]  }
 0x248   : > { %v2169_v40 = vadd.f32 2.0, %v4323_v34  ;;  %v5685_v25 = vpop.f32.mrb[41].mxu1  ;;  %v5690_v4 = vadd.f32 %v2044_v0, %v5401_v48  ;;  %v5694_v36 = vpop.eup %4324  ;;  %4340 = vpow2.f32 %v2127_v33  ;;  %1577 = vmatmul.mubr.bf16.gmra.mrb[40].mxu0 %v1302_v45  ;;  %v5700_v30 = vadd.f32 %v2046_v57, %v5412_v55 }
 0x249   : > { %v5692_v63 = vpop.f32.mrb[42].mxu1  ;;  %v2098_v32 = vmin.f32 %v5680_v27, 20.0  ;;  %v4327_v5 = vpop.eup %4326  ;;  %4342 = vrcp.f32 %v1242_v3  ;;  %v2129_v26 = vmul.f32 1.442695, %v2097_v44  ;;  %v1305_v19 = vpack.c.bf16 %v1289_v14, %v1287_v49 }
 0x24a   : > { %v5696_v50 = vmul.f32 %v4323_v34, %v2169_v40  ;;  %v5702_v38 = vpop.f32.mrb[43].mxu1  ;;  %v2099_v0 = vmin.f32 %v5690_v4, 20.0  ;;  %2562 = vmatpush1.bf16.msra.mxu0 %v4054_v13  ;;  %v4329_v60 = vpop.eup %4328  ;;  %v5710_v39 = vmul.f32 %v5630_v54, %v5525_v6  ;;  %4344 = vrcp.f32 %v1243_v41 }
 0x24b   : > { %v2131_v62 = vmul.f32 1.442695, %v2098_v32  ;;  %2563 = vmatprep.subr.bf16.mxu0 %v4059_v7  ;;  %v2170_v12 = vadd.f32 2.0, %v4329_v60  ;;  %4346 = vpow2.f32 %v2129_v26  ;;  %v2100_v53 = vmin.f32 %v5700_v30, 20.0  ;;  %1586 = vmatprep.mubr.bf16.mxu0 %v1305_v19  ;;  %v4068_v19 = vld [vmem:[%s6920_s3 + $0x1c4] ss:$8 sps:$4 sm:$0xff]  }
 0x24c   : > { %v2247_v57 = vadd.f32 2.0, %v5696_v50  ;;  %v4331_v24 = vpop.eup %4330  ;;  %v2133_v16 = vmul.f32 1.442695, %v2099_v0  ;;  %v5718_v6 = vmul.f32 %v4327_v5, %v5642_v31  ;;  %v5724_v43 = vadd.f32 %v5632_v58, %v5401_v48  ;;  %v4060_v31 = vld [vmem:[%s6920_s3 + $0x1a0] ss:$8 sps:$4 sm:$0xff]  }
 0x24d   : > { %v4333_v1 = vpop.eup %4332  ;;  %v5720_v54 = vmul.f32 %v4331_v24, %v1215_v18  ;;  %v1304_v17 = vpack.c.bf16 %v1288_v29, %v5655_v28  ;;  %v5727_v49 = vmul.f32 %v4329_v60, %v2170_v12  ;;  %4348 = vpow2.f32 %v2131_v62  ;;  %v4063_v0 = vld [vmem:[%s6920_s3 + $0x1b0] ss:$8 sps:$4 sm:$0xff]  }
 0x24e   : > { %v4335_v56 = vpop.eup %4334  ;;  %v2171_v14 = vadd.f32 2.0, %v4333_v1  ;;  %v2135_v3 = vmul.f32 1.442695, %v2100_v53  ;;  %2564 = vmatpush1.bf16.msra.mxu0 %v4057_v51  ;;  %4350 = vpow2.f32 %v2133_v16  ;;  %v2101_v58 = vmin.f32 %v5724_v43, 20.0 }
 0x24f   : > { %v5732_v13 = vpop.f32.mrb[44].mxu1  ;;  %v4337_v18 = vpop.eup %4336  ;;  %v5737_v28 = vadd.f32 %v5639_v52, %v5412_v55  ;;  %v5740_v34 = vadd.f32 %v2054_v42, %v5401_v48  ;;  %2565 = vmatprep.subr.bf16.mxu0 %v4062_v11  ;;  %4352 = vrcp.f32 %v2247_v57  ;;  %v2248_v2 = vadd.f32 2.0, %v5727_v49 }
 0x250   : > { %v5745_v33 = vpop.f32.mrb[45].mxu1  ;;  %v2197_v41 = vmul.f32 %v4333_v1, %v2171_v14  ;;  %v2172_v40 = vadd.f32 2.0, %v4337_v18  ;;  %4354 = vpow2.f32 %v2135_v3  ;;  %v2137_v52 = vmul.f32 1.442695, %v2101_v58  ;;  %1587 = vmatmul.mubr.bf16.gmra.mrb[44].mxu0 %v1304_v17 }
 0x251   : > { %v5748_v45 = vpop.f32.mrb[46].mxu1  ;;  %v2102_v42 = vmin.f32 %v5737_v28, 20.0  ;;  %v2103_v7 = vmin.f32 %v5740_v34, 20.0  ;;  %v4339_v44 = vpop.eup %4338  ;;  %v1292_v32 = vmul.f32 %v4335_v56, %v5645_v20  ;;  %4356 = vrcp.f32 %v2248_v2 }
 0x252   : > { %v5752_v29 = vpop.f32.mrb[47].mxu1  ;;  %v2249_v5 = vadd.f32 2.0, %v2197_v41  ;;  %v2198_v26 = vmul.f32 %v4337_v18, %v2172_v40  ;;  %2566 = vmatpush1.bf16.msra.mxu0 %v4060_v31  ;;  %v4341_v51 = vpop.eup %4340  ;;  %v2173_v60 = vadd.f32 2.0, %v4339_v44  ;;  %4358 = vpow2.f32 %v2137_v52 }
 0x253   : > { %v2139_v57 = vmul.f32 1.442695, %v2102_v42  ;;  %v2141_v62 = vmul.f32 1.442695, %v2103_v7  ;;  %2567 = vmatprep.subr.bf16.mxu0 %v4065_v21  ;;  %v5761_v11 = vpop.eup %4342  ;;  %v1290_v20 = vmul.f32 %v5694_v36, %v5621_v10  ;;  %v2174_v12 = vadd.f32 2.0, %v4341_v51 }
 0x254   : > { %4360 = vrcp.f32 %v2249_v5  ;;  %v2250_v24 = vadd.f32 2.0, %v2198_v26  ;;  %v5765_v16 = vpop.eup %4344  ;;  %v2199_v53 = vmul.f32 %v4339_v44, %v2173_v60  ;;  %v5769_v1 = vadd.f32 %v5685_v25, %v5412_v55  ;;  %v4066_v25 = vld [vmem:[%s6920_s3 + $0x1c0] ss:$8 sps:$4 sm:$0xff]  }
 0x255   : > { %4362 = vpow2.f32 %v2139_v57  ;;  %v1307_v17 = vpack.c.bf16 %v5720_v54, %v5718_v6  ;;  %v4347_v56 = vpop.eup %4346  ;;  %v5775_v14 = vmul.f32 %v5657_v15, %v5528_v9  ;;  %v2200_v10 = vmul.f32 %v4341_v51, %v2174_v12  ;;  %v4071_v9 = vld [vmem:[%s6920_s3 + $0x1d4] ss:$8 sps:$4 sm:$0xff]  }
 0x256   : > { %v5779_v36 = vadd.f32 %v5692_v63, %v5401_v48  ;;  %v1306_v3 = vpack.c.bf16 %v1292_v32, %v1290_v20  ;;  %2568 = vmatpush1.bf16.msra.mxu0 %v4063_v0  ;;  %v2221_v6 = vmul.f32 %v5696_v50, %v5559_v35  ;;  %v2251_v54 = vadd.f32 2.0, %v2199_v53 }
 0x257   : > { %v5784_v31 = vpop.f32.mrb[48].mxu1  ;;  %v2175_v18 = vadd.f32 2.0, %v4347_v56  ;;  %4364 = vpow2.f32 %v2141_v62  ;;  %1596 = vmatprep.mubr.bf16.mxu0 %v1307_v17  ;;  %2569 = vmatprep.subr.bf16.mxu0 %v4068_v19  ;;  %v4349_v63 = vpop.eup %4348  ;;  %v2222_v58 = vmul.f32 %v5727_v49, %v5567_v8  ;;  %v2223_v21 = vmul.f32 %v2197_v41, %v5598_v22  ;;  %v4069_v41 = vld [vmem:[%s6920_s3 + $0x1d0] ss:$8 sps:$4 sm:$0xff]  }
 0x258   : > { %v5791_v15 = vpop.f32.mrb[49].mxu1  ;;  %4366 = vrcp.f32 %v2250_v24  ;;  %v2104_v35 = vmin.f32 %v5769_v1, 20.0  ;;  %v4351_v2 = vpop.eup %4350  ;;  %v2252_v40 = vadd.f32 2.0, %v2200_v10  ;;  %v2176_v42 = vadd.f32 2.0, %v4349_v63  ;;  %1597 = vmatmul.mubr.bf16.gmra.mrb[48].mxu0 %v1306_v3 }
 0x259   : > { %v5797_v50 = vpop.f32.mrb[50].mxu1  ;;  %v2201_v52 = vmul.f32 %v4347_v56, %v2175_v18  ;;  %v2105_v7 = vmin.f32 %v5779_v36, 20.0  ;;  %v4353_v32 = vpop.eup %4352  ;;  %v5803_v5 = vmul.f32 %v2198_v26, %v5625_v46  ;;  %v2177_v8 = vadd.f32 2.0, %v4351_v2  ;;  %v4074_v46 = vld [vmem:[%s6920_s3 + $0x1e4] ss:$8 sps:$4 sm:$0xff]  }
 0x25a   : > { %v5800_v44 = vpop.f32.mrb[51].mxu1  ;;  %v2143_v22 = vmul.f32 1.442695, %v2104_v35  ;;  %v5807_v49 = vadd.f32 %v5702_v38, %v5412_v55  ;;  %2570 = vmatpush1.bf16.msra.mxu0 %v4066_v25  ;;  %v4355_v0 = vpop.eup %4354  ;;  %v5813_v19 = vmul.f32 %v2199_v53, %v5637_v37  ;;  %4368 = vrcp.f32 %v2251_v54  ;;  %v4072_v54 = vld [vmem:[%s6920_s3 + $0x1e0] ss:$8 sps:$4 sm:$0xff]  }
 0x25b   : > { %v2253_v51 = vadd.f32 2.0, %v2201_v52  ;;  %v2202_v60 = vmul.f32 %v4349_v63, %v2176_v42  ;;  %2571 = vmatprep.subr.bf16.mxu0 %v4071_v9  ;;  %v4357_v26 = vpop.eup %4356  ;;  %v2203_v38 = vmul.f32 %v4351_v2, %v2177_v8  ;;  %v2178_v57 = vadd.f32 2.0, %v4355_v0 }
 0x25c   : > { %4370 = vpow2.f32 %v2143_v22  ;;  %v2106_v62 = vmin.f32 %v5807_v49, 20.0  ;;  %v4359_v20 = vpop.eup %4358  ;;  %v5819_v24 = vmul.f32 %v4353_v32, %v2221_v6  ;;  %v2145_v12 = vmul.f32 1.442695, %v2105_v7 }
 0x25d   : > { %4372 = vrcp.f32 %v2252_v40  ;;  %v2254_v37 = vadd.f32 2.0, %v2202_v60  ;;  %v5822_v17 = vmul.f32 %v2200_v10, %v5649_v47  ;;  %v2255_v56 = vadd.f32 2.0, %v2203_v38  ;;  %v4077_v47 = vld [vmem:[%s6920_s3 + $0x1f4] ss:$8 sps:$4 sm:$0xff]  }
 0x25e   : > { %v4361_v53 = vpop.eup %4360  ;;  %v2204_v3 = vmul.f32 %v4355_v0, %v2178_v57  ;;  %v2179_v25 = vadd.f32 2.0, %v4359_v20  ;;  %2572 = vmatpush1.bf16.msra.mxu0 %v4069_v41  ;;  %4374 = vrcp.f32 %v2253_v51  ;;  %v2147_v63 = vmul.f32 1.442695, %v2106_v62 }
 0x25f   : > { %v5827_v18 = vpop.f32.mrb[52].mxu1  ;;  %v4363_v9 = vpop.eup %4362  ;;  %v5829_v6 = vmul.f32 %v4361_v53, %v2223_v21  ;;  %v1295_v35 = vmul.f32 %v5765_v16, %v5775_v14  ;;  %2573 = vmatprep.subr.bf16.mxu0 %v4074_v46  ;;  %v5838_v2 = vmul.f32 %v4357_v26, %v2222_v58  ;;  %v5841_v40 = vmul.f32 %v2201_v52, %v5673_v23  ;;  %v4075_v23 = vld [vmem:[%s6920_s3 + $0x1f0] ss:$8 sps:$4 sm:$0xff]  }
 0x260   : > { %v5836_v10 = vpop.f32.mrb[53].mxu1  ;;  %4376 = vrcp.f32 %v2254_v37  ;;  %v2205_v21 = vmul.f32 %v4359_v20, %v2179_v25  ;;  %v2256_v16 = vadd.f32 2.0, %v2204_v3  ;;  %v2180_v14 = vadd.f32 2.0, %v4363_v9 }
 0x261   : > { %v2088_v42 = vpop.f32.mrb[54].mxu1  ;;  %v4365_v7 = vpop.eup %4364  ;;  %v2325_v32 = vpack.c.bf16 %v5829_v6, %v5819_v24  ;;  %4378 = vpow2.f32 %v2145_v12  ;;  %v5846_v41 = vmul.f32 %v2202_v60, %v5680_v27  ;;  %v1309_v51 = vpack.c.bf16 %v1295_v35, %v1295_v35 }
 0x262   : > { %v2089_v8 = vpop.f32.mrb[55].mxu1  ;;  %v4367_v22 = vpop.eup %4366  ;;  %4380 = vrcp.f32 %v2255_v56  ;;  %v2257_v58 = vadd.f32 2.0, %v2205_v21  ;;  %v2181_v0 = vadd.f32 2.0, %v4365_v7  ;;  %2574 = vmatpush1.bf16.msra.mxu0 %v4072_v54  ;;  %v2206_v52 = vmul.f32 %v4363_v9, %v2180_v14 }
 0x263   : > { %4382 = vpow2.f32 %v2147_v63  ;;  %v5853_v46 = vadd.f32 %v5732_v13, %v5401_v48  ;;  %2575 = vmatprep.subr.bf16.mxu0 %v4077_v47  ;;  %v2229_v26 = vmul.f32 %v2203_v38, %v5690_v4  ;;  %v5857_v27 = vmul.f32 %v2204_v3, %v5700_v30  ;;  %1606 = vmatprep.mubr.bf16.mxu0 %v1309_v51 }
 0x264   : > { %v5859_v60 = vmul.f32 %v4365_v7, %v2181_v0  ;;  %v5863_v57 = vadd.f32 %v5745_v33, %v5412_v55  ;;  %v4369_v62 = vpop.eup %4368  ;;  %v5866_v20 = vmul.f32 %v4367_v22, %v5803_v5  ;;  %4384 = vrcp.f32 %v2256_v16 }
 0x265   : > { %v2258_v37 = vadd.f32 2.0, %v2206_v52  ;;  %v2107_v13 = vmin.f32 %v5853_v46, 20.0  ;;  %4386 = vrcp.f32 %v2257_v58  ;;  %v5873_v38 = vadd.f32 %v5748_v45, %v5401_v48 }
 0x266   : > { %v4371_v12 = vpop.eup %4370  ;;  %v2259_v4 = vadd.f32 2.0, %v5859_v60  ;;  %v2108_v30 = vmin.f32 %v5863_v57, 20.0  ;;  %2576 = vmatpush1.bf16.msra.mxu0 %v4075_v23  ;;  %v1294_v56 = vmul.f32 %v5761_v11, %v5710_v39  ;;  %v5878_v3 = vmul.f32 %v4369_v62, %v5813_v19 }
 0x267   : > { %v4373_v33 = vpop.eup %4372  ;;  %4388 = vrcp.f32 %v2258_v37  ;;  %v2182_v5 = vadd.f32 2.0, %v4371_v12  ;;  %v2149_v53 = vmul.f32 1.442695, %v2107_v13  ;;  %v2231_v25 = vmul.f32 %v2205_v21, %v5724_v43 }
 0x268   : > { %v2151_v54 = vmul.f32 1.442695, %v2108_v30  ;;  %v2109_v9 = vmin.f32 %v5873_v38, 20.0  ;;  %v4375_v63 = vpop.eup %4374  ;;  %v1308_v45 = vpack.c.bf16 %v1294_v56, %v1294_v56  ;;  %v5886_v47 = vadd.f32 %v5752_v29, %v5412_v55 }
 0x269   : > { %v5882_v35 = vmul.f32 %v4371_v12, %v2182_v5  ;;  %4390 = vpow2.f32 %v2149_v53  ;;  %v5889_v39 = vmul.f32 %v4373_v33, %v5822_v17  ;;  %v5893_v43 = vadd.f32 %v5784_v31, %v5401_v48 }
 0x26a   : > { %v4377_v42 = vpop.eup %4376  ;;  %4392 = vpow2.f32 %v2151_v54  ;;  %v2153_v11 = vmul.f32 1.442695, %v2109_v9  ;;  %v2232_v21 = vmul.f32 %v2206_v52, %v5737_v28  ;;  %1607 = vmatmul.mubr.bf16.gmra.mrb[52].mxu0 %v1308_v45  ;;  %v2110_v29 = vmin.f32 %v5886_v47, 20.0 }
 0x26b   : > { %v4379_v19 = vpop.eup %4378  ;;  %4394 = vrcp.f32 %v2259_v4  ;;  %v2260_v7 = vadd.f32 2.0, %v5882_v35  ;;  %v2111_v17 = vmin.f32 %v5893_v43, 20.0  ;;  %v5901_v8 = vadd.f32 %v5791_v15, %v5412_v55 }
 0x26c   : > { %v4381_v16 = vpop.eup %4380  ;;  %v2183_v14 = vadd.f32 2.0, %v4379_v19  ;;  %4396 = vpow2.f32 %v2153_v11  ;;  %v5904_v22 = vmul.f32 %v4375_v63, %v5841_v40  ;;  %v2155_v28 = vmul.f32 1.442695, %v2110_v29 }
 0x26d   : > { %v4383_v31 = vpop.eup %4382  ;;  %4398 = vrcp.f32 %v2260_v7  ;;  %v5908_v58 = vadd.f32 %v5797_v50, %v5401_v48  ;;  %v2157_v52 = vmul.f32 1.442695, %v2111_v17  ;;  %v2112_v51 = vmin.f32 %v5901_v8, 20.0 }
 0x26e   : > { %v2209_v0 = vmul.f32 %v4379_v19, %v2183_v14  ;;  %v2184_v23 = vadd.f32 2.0, %v4383_v31  ;;  %v4385_v62 = vpop.eup %4384  ;;  %v2306_v37 = vmul.f32 %v4377_v42, %v5846_v41  ;;  %4400 = vpow2.f32 %v2155_v28 }
 0x26f   : > { %v2113_v15 = vmin.f32 %v5908_v58, 20.0  ;;  %v2326_v40 = vpack.c.bf16 %v5866_v20, %v5838_v2  ;;  %v4387_v13 = vpop.eup %4386  ;;  %v5915_v12 = vmul.f32 %v4381_v16, %v2229_v26  ;;  %4402 = vpow2.f32 %v2157_v52 }
 0x270   : > { %v2261_v4 = vadd.f32 2.0, %v2209_v0  ;;  %v2210_v50 = vmul.f32 %v4383_v31, %v2184_v23  ;;  %v2159_v33 = vmul.f32 1.442695, %v2112_v51  ;;  %v5919_v53 = vadd.f32 %v5800_v44, %v5412_v55 }
 0x271   : > { %v4389_v30 = vpop.eup %4388  ;;  %v2161_v5 = vmul.f32 1.442695, %v2113_v15  ;;  %2577 = vmatprep.mubr.bf16.mxu0 %v2326_v40  ;;  %v5923_v41 = vadd.f32 %v5827_v18, %v5401_v48  ;;  %v2308_v2 = vmul.f32 %v4385_v62, %v5857_v27  ;;  %v5926_v54 = vmul.f32 %v4387_v13, %v2231_v25 }
 0x272   : > { %v2310_v20 = vmul.f32 %v4389_v30, %v2232_v21  ;;  %4404 = vrcp.f32 %v2261_v4  ;;  %v2262_v26 = vadd.f32 2.0, %v2210_v50  ;;  %v2114_v9 = vmin.f32 %v5919_v53, 20.0  ;;  %2578 = vmatmul.mubr.bf16.vlgmr.msra.gmra.mrb[56].mxu0 %v2325_v32 }
 0x273   : > { %v4391_v56 = vpop.eup %4390  ;;  %4406 = vpow2.f32 %v2159_v33  ;;  %v2115_v63 = vmin.f32 %v5923_v41, 20.0  ;;  %v5935_v18 = vadd.f32 %v5836_v10, %v5412_v55  ;;  %v2328_v27 = vpack.c.bf16 %v2306_v37, %v5889_v39 }
 0x274   : > { %v4393_v44 = vpop.eup %4392  ;;  %4408 = vrcp.f32 %v2262_v26  ;;  %v2185_v48 = vadd.f32 2.0, %v4391_v56  ;;  %v2163_v42 = vmul.f32 1.442695, %v2114_v9  ;;  %v2327_v24 = vpack.c.bf16 %v5904_v22, %v5878_v3 }
 0x275   : > { %v4395_v25 = vpop.eup %4394  ;;  %v2186_v45 = vadd.f32 2.0, %v4393_v44  ;;  %4410 = vpow2.f32 %v2161_v5  ;;  %v2165_v11 = vmul.f32 1.442695, %v2115_v63  ;;  %v2116_v7 = vmin.f32 %v5935_v18, 20.0  ;;  %2587 = vmatprep.mubr.bf16.mxu0 %v2328_v27 }
 0x276   : > { %v4397_v19 = vpop.eup %4396  ;;  %v2211_v21 = vmul.f32 %v4391_v56, %v2185_v48  ;;  %v2330_v6 = vpack.c.bf16 %v2310_v20, %v2308_v2  ;;  %4412 = vpow2.f32 %v2163_v42  ;;  %v2329_v10 = vpack.c.bf16 %v5926_v54, %v5915_v12 }
 0x277   : > { %v4399_v32 = vpop.eup %4398  ;;  %v5941_v29 = vmul.f32 %v4393_v44, %v2186_v45  ;;  %v2187_v55 = vadd.f32 2.0, %v4397_v19  ;;  %4414 = vpow2.f32 %v2165_v11  ;;  %v2167_v17 = vmul.f32 1.442695, %v2116_v7 }
 0x278   : > { %v2263_v39 = vadd.f32 2.0, %v2211_v21  ;;  %v4401_v16 = vpop.eup %4400  ;;  %v2233_v28 = vmul.f32 %v5859_v60, %v5740_v34  ;;  %v2235_v23 = vmul.f32 %v2209_v0, %v5779_v36  ;;  %v2234_v37 = vmul.f32 %v5882_v35, %v5769_v1 }
 0x279   : > { %v2213_v14 = vmul.f32 %v4397_v19, %v2187_v55  ;;  %v4403_v31 = vpop.eup %4402  ;;  %v2264_v3 = vadd.f32 2.0, %v5941_v29  ;;  %v2188_v22 = vadd.f32 2.0, %v4401_v16  ;;  %v2236_v15 = vmul.f32 %v2210_v50, %v5807_v49 }
 0x27a   : > { %4416 = vrcp.f32 %v2263_v39  ;;  %v2189_v51 = vadd.f32 2.0, %v4403_v31  ;;  %2588 = vmatmul.mubr.bf16.gmra.mrb[60].mxu0 %v2327_v24  ;;  %v2311_v34 = vmul.f32 %v4395_v25, %v2233_v28  ;;  %v2312_v33 = vmul.f32 %v4399_v32, %v2234_v37 }
 0x27b   : > { %v2265_v52 = vadd.f32 2.0, %v2213_v14  ;;  %v2214_v40 = vmul.f32 %v4401_v16, %v2188_v22  ;;  %4418 = vpow2.f32 %v2167_v17  ;;  %2597 = vmatprep.mubr.bf16.mxu0 %v2330_v6  ;;  %v2237_v45 = vmul.f32 %v2211_v21, %v5853_v46 }
 0x27c   : > { %v4405_v62 = vpop.eup %4404  ;;  %v2215_v12 = vmul.f32 %v4403_v31, %v2189_v51  ;;  %v2239_v42 = vmul.f32 %v2213_v14, %v5873_v38 }
 0x27d   : > { %v4407_v13 = vpop.eup %4406  ;;  %v2313_v60 = vmul.f32 %v4405_v62, %v2235_v23  ;;  %4420 = vrcp.f32 %v2265_v52  ;;  %v2266_v36 = vadd.f32 2.0, %v2214_v40  ;;  %v2240_v39 = vmul.f32 %v2214_v40, %v5886_v47 }
 0x27e   : > { %v4409_v4 = vpop.eup %4408  ;;  %4422 = vrcp.f32 %v2264_v3  ;;  %v2190_v0 = vadd.f32 2.0, %v4407_v13  ;;  %v2267_v1 = vadd.f32 2.0, %v2215_v12  ;;  %v2241_v23 = vmul.f32 %v2215_v12, %v5893_v43 }
 0x27f   : > { %v4411_v30 = vpop.eup %4410  ;;  %v2314_v5 = vmul.f32 %v4409_v4, %v2236_v15  ;;  %v2331_v2 = vpack.c.bf16 %v2313_v60, %v2311_v34  ;;  %4424 = vrcp.f32 %v2266_v36 }
 0x280   : > { %v2216_v35 = vmul.f32 %v4407_v13, %v2190_v0  ;;  %v2191_v49 = vadd.f32 2.0, %v4411_v30  ;;  %v4413_v50 = vpop.eup %4412  ;;  %4426 = vrcp.f32 %v2267_v1  ;;  %v4087_v1 = vld [vmem:[%s6922_s5 + $0x130] ss:$8 sps:$4 sm:$0xff]  }
 0x281   : > { %v2332_v20 = vpack.c.bf16 %v2314_v5, %v2312_v33  ;;  %v4415_v26 = vpop.eup %4414  ;;  %v2192_v9 = vadd.f32 2.0, %v4413_v50  ;;  %v4086_v33 = vld [vmem:[%s6922_s5 + $0x124] ss:$8 sps:$4 sm:$0xff]   ;;  %v4084_v5 = vld [vmem:[%s6922_s5 + $0x120] ss:$8 sps:$4 sm:$0xff]  }
 0x282   : > { %v2268_v56 = vadd.f32 2.0, %v2216_v35  ;;  %v2217_v54 = vmul.f32 %v4411_v30, %v2191_v49  ;;  %2598 = vmatmul.mubr.bf16.gmra.mrb[64].mxu0 %v2329_v10  ;;  %v2193_v48 = vadd.f32 2.0, %v4415_v26  ;;  %v2238_v10 = vmul.f32 %v5941_v29, %v5863_v57  ;;  %v4081_v30 = vld [vmem:[%s6922_s5 + $0x110] ss:$8 sps:$4 sm:$0xff]   ;;  %v4090_v49 = vld [vmem:[%s6922_s5 + $0x140] ss:$8 sps:$4 sm:$0xff]  }
 0x283   : > { %v2218_v44 = vmul.f32 %v4413_v50, %v2192_v9  ;;  %2607 = vmatprep.mubr.bf16.mxu0 %v2332_v20  ;;  %v2242_v29 = vmul.f32 %v2216_v35, %v5901_v8  ;;  %v4092_v35 = vld [vmem:[%s6922_s5 + $0x144] ss:$8 sps:$4 sm:$0xff]   ;;  %v4095_v50 = vld [vmem:[%s6922_s5 + $0x154] ss:$8 sps:$4 sm:$0xff]   ;;  %v4093_v20 = vld [vmem:[%s6922_s5 + $0x150] ss:$8 sps:$4 sm:$0xff]  }
 0x284   : > { %v2269_v63 = vadd.f32 2.0, %v2217_v54  ;;  %v4417_v27 = vpop.eup %4416  ;;  %4428 = vrcp.f32 %v2268_v56  ;;  %v2219_v55 = vmul.f32 %v4415_v26, %v2193_v48  ;;  %v2243_v52 = vmul.f32 %v2217_v54, %v5908_v58  ;;  %v4098_v26 = vld [vmem:[%s6922_s5 + $0x164] ss:$8 sps:$4 sm:$0xff]   ;;  %v4096_v56 = vld [vmem:[%s6922_s5 + $0x160] ss:$8 sps:$4 sm:$0xff]  }
 0x285   : > { %v4419_v25 = vpop.eup %4418  ;;  %v2270_v11 = vadd.f32 2.0, %v2218_v44  ;;  %v2315_v6 = vmul.f32 %v4417_v27, %v2237_v45  ;;  %v2244_v62 = vmul.f32 %v2218_v44, %v5919_v53  ;;  %v4080_v53 = vld [vmem:[%s6922_s5 + $0x104] ss:$8 sps:$4 sm:$0xff]   ;;  %v4101_v54 = vld [vmem:[%s6922_s5 + $0x174] ss:$8 sps:$4 sm:$0xff]  }
 0x286   : > { %4430 = vrcp.f32 %v2269_v63  ;;  %v2194_v7 = vadd.f32 2.0, %v4419_v25  ;;  %v2271_v14 = vadd.f32 2.0, %v2219_v55  ;;  %v2245_v36 = vmul.f32 %v2219_v55, %v5923_v41  ;;  %3100 = vmatprep.subr.bf16.mxu0 %v4080_v53  ;;  %3886 = vmatprep.subr.bf16.mxu1 %v4080_v53  ;;  %v4083_v41 = vld [vmem:[%s6922_s5 + $0x114] ss:$8 sps:$4 sm:$0xff]   ;;  %v4099_v9 = vld [vmem:[%s6922_s5 + $0x170] ss:$8 sps:$4 sm:$0xff]  }
 0x287   : > { %v4421_v19 = vpop.eup %4420  ;;  %4432 = vrcp.f32 %v2270_v11  ;;  %v4104_v63 = vld [vmem:[%s6922_s5 + $0x184] ss:$8 sps:$4 sm:$0xff]   ;;  %v4102_v44 = vld [vmem:[%s6922_s5 + $0x180] ss:$8 sps:$4 sm:$0xff]   ;;  %v4107_v48 = vld [vmem:[%s6922_s5 + $0x194] ss:$8 sps:$4 sm:$0xff]  }
 0x288   : > { %v4423_v24 = vpop.eup %4422  ;;  %v2317_v32 = vmul.f32 %v4421_v19, %v2239_v42  ;;  %v2220_v16 = vmul.f32 %v4419_v25, %v2194_v7  ;;  %v4105_v27 = vld [vmem:[%s6922_s5 + $0x190] ss:$8 sps:$4 sm:$0xff]   ;;  %v4110_v25 = vld [vmem:[%s6922_s5 + $0x1a4] ss:$8 sps:$4 sm:$0xff]   ;;  %v4108_v45 = vld [vmem:[%s6922_s5 + $0x1a0] ss:$8 sps:$4 sm:$0xff]  }
 0x289   : > { %v4425_v17 = vpop.eup %4424  ;;  %v2316_v46 = vmul.f32 %v4423_v24, %v2238_v10  ;;  %v4113_v42 = vld [vmem:[%s6922_s5 + $0x1b4] ss:$8 sps:$4 sm:$0xff]   ;;  %v4111_v11 = vld [vmem:[%s6922_s5 + $0x1b0] ss:$8 sps:$4 sm:$0xff]   ;;  %v4116_v19 = vld [vmem:[%s6922_s5 + $0x1c4] ss:$8 sps:$4 sm:$0xff]  }
 0x28a   : > { %v2333_v31 = vpack.c.bf16 %v2317_v32, %v2315_v6  ;;  %v2318_v21 = vmul.f32 %v4425_v17, %v2240_v39  ;;  %v2272_v38 = vadd.f32 2.0, %v2220_v16  ;;  %2608 = vmatmul.mubr.bf16.gmra.mrb[68].mxu0 %v2331_v2  ;;  %v4427_v3 = vpop.eup %4426  ;;  %v2246_v60 = vmul.f32 %v2220_v16, %v5935_v18  ;;  %v4078_v18 = vld [vmem:[%s6922_s5 + $0x100] ss:$8 sps:$4 sm:$0xff]   ;;  %v4089_v2 = vld [vmem:[%s6922_s5 + $0x134] ss:$8 sps:$4 sm:$0xff]  }
 0x28b   : > { %v2319_v47 = vmul.f32 %v4427_v3, %v2241_v23  ;;  %3101 = vmatpush1.bf16.msra.mxu0 %v4078_v18  ;;  %3902 = vmatpush1.bf16.msra.mxu1 %v4078_v18  ;;  %v4114_v7 = vld [vmem:[%s6922_s5 + $0x1c0] ss:$8 sps:$4 sm:$0xff]   ;;  %v4119_v24 = vld [vmem:[%s6922_s5 + $0x1d4] ss:$8 sps:$4 sm:$0xff]   ;;  %v4117_v6 = vld [vmem:[%s6922_s5 + $0x1d0] ss:$8 sps:$4 sm:$0xff]  }
 0x28c   : > { %4434 = vrcp.f32 %v2272_v38  ;;  %v2334_v28 = vpack.c.bf16 %v2318_v21, %v2316_v46  ;;  %3102 = vmatprep.subr.bf16.mxu0 %v4083_v41  ;;  %3887 = vmatprep.subr.bf16.mxu1 %v4083_v41  ;;  %v4122_v32 = vld [vmem:[%s6922_s5 + $0x1e4] ss:$8 sps:$4 sm:$0xff]   ;;  %v4120_v55 = vld [vmem:[%s6922_s5 + $0x1e0] ss:$8 sps:$4 sm:$0xff]   ;;  %v4125_v39 = vld [vmem:[%s6922_s5 + $0x1f4] ss:$8 sps:$4 sm:$0xff]  }
 0x28d   : > { %4436 = vrcp.f32 %v2271_v14  ;;  %v1342_v10 = vld [vmem:[%s6923_s6] sm:$0x3]  ;;  %v4123_v16 = vld [vmem:[%s6922_s5 + $0x1f0] ss:$8 sps:$4 sm:$0xff]  }
 0x28e   : > { %v4429_v22 = vpop.eup %4428  ;;  %2617 = vmatprep.mubr.bf16.mxu0 %v2334_v28  ;;  %v6063_v17 = vrot.slane %v1342_v10, %v4984_v59 }
 0x28f   : > { %v2320_v15 = vmul.f32 %v4429_v22, %v2242_v29  ;;  %3103 = vmatpush1.bf16.msra.mxu0 %v4081_v30  ;;  %3903 = vmatpush1.bf16.msra.mxu1 %v4081_v30 }
 0x290   : > { %v4431_v57 = vpop.eup %4430  ;;  %3104 = vmatprep.subr.bf16.mxu0 %v4086_v33  ;;  %3888 = vmatprep.subr.bf16.mxu1 %v4086_v33 }
 0x291   : > { %v2321_v51 = vmul.f32 %v4431_v57, %v2243_v52  ;;  %v4433_v37 = vpop.eup %4432 }
 0x292   : > { %v2322_v40 = vmul.f32 %v4433_v37, %v2244_v62  ;;  %2618 = vmatmul.mubr.bf16.gmra.mrb[72].mxu0 %v2333_v31  ;;  %v6066_v31 = vrot.slane %v1342_v10, %v4989_v61 }
 0x293   : > { %v2335_v13 = vpack.c.bf16 %v2321_v51, %v2319_v47  ;;  %3105 = vmatpush1.bf16.msra.mxu0 %v4084_v5  ;;  %3904 = vmatpush1.bf16.msra.mxu1 %v4084_v5 }
 0x294   : > { %v2336_v34 = vpack.c.bf16 %v2322_v40, %v2320_v15  ;;  %3106 = vmatprep.subr.bf16.mxu0 %v4089_v2  ;;  %3889 = vmatprep.subr.bf16.mxu1 %v4089_v2 }
 0x296   : > { %v4435_v43 = vpop.eup %4434  ;;  %2627 = vmatprep.mubr.bf16.mxu0 %v2336_v34 }
 0x297   : > { %v2324_v58 = vmul.f32 %v4435_v43, %v2246_v60  ;;  %v4437_v12 = vpop.eup %4436  ;;  %3107 = vmatpush1.bf16.msra.mxu0 %v4087_v1  ;;  %3905 = vmatpush1.bf16.msra.mxu1 %v4087_v1 }
 0x298   : > { %v2323_v8 = vmul.f32 %v4437_v12, %v2245_v36  ;;  %3108 = vmatprep.subr.bf16.mxu0 %v4092_v35  ;;  %3890 = vmatprep.subr.bf16.mxu1 %v4092_v35 }
 0x299   : > { %v2338_v4 = vpack.c.bf16 %v2324_v58, %v2324_v58 }
 0x29a   : > { %2628 = vmatmul.mubr.bf16.gmra.mrb[76].mxu0 %v2335_v13  ;;  %v2337_v0 = vpack.c.bf16 %v2323_v8, %v2323_v8 }
 0x29b   : > { %2637 = vmatprep.mubr.bf16.mxu0 %v2338_v4  ;;  %3109 = vmatpush1.bf16.msra.mxu0 %v4090_v49 }
 0x29c   : > { %3906 = vmatpush1.bf16.msra.mxu1 %v4090_v49  ;;  %3110 = vmatprep.subr.bf16.mxu0 %v4095_v50 }
 0x29d   : > { %3891 = vmatprep.subr.bf16.mxu1 %v4095_v50 }
 0x29f   : > { %3111 = vmatpush1.bf16.msra.mxu0 %v4093_v20 }
 0x2a0   : > { %3907 = vmatpush1.bf16.msra.mxu1 %v4093_v20  ;;  %3112 = vmatprep.subr.bf16.mxu0 %v4098_v26 }
 0x2a1   : > { %3892 = vmatprep.subr.bf16.mxu1 %v4098_v26 }
 0x2a2   : > { %2638 = vmatmul.mubr.bf16.gmra.mrb[80].mxu0 %v2337_v0 }
 0x2a3   : > { %3113 = vmatpush1.bf16.msra.mxu0 %v4096_v56 }
 0x2a4   : > { %3908 = vmatpush1.bf16.msra.mxu1 %v4096_v56  ;;  %3114 = vmatprep.subr.bf16.mxu0 %v4101_v54 }
 0x2a5   : > { %3893 = vmatprep.subr.bf16.mxu1 %v4101_v54 }
 0x2a7   : > { %3115 = vmatpush1.bf16.msra.mxu0 %v4099_v9 }
 0x2a8   : > { %3909 = vmatpush1.bf16.msra.mxu1 %v4099_v9  ;;  %3116 = vmatprep.subr.bf16.mxu0 %v4104_v63 }
 0x2a9   : > { %3894 = vmatprep.subr.bf16.mxu1 %v4104_v63 }
 0x2ab   : > { %3117 = vmatpush1.bf16.msra.mxu0 %v4102_v44 }
 0x2ac   : > { %3910 = vmatpush1.bf16.msra.mxu1 %v4102_v44  ;;  %3118 = vmatprep.subr.bf16.mxu0 %v4107_v48 }
 0x2ad   : > { %3895 = vmatprep.subr.bf16.mxu1 %v4107_v48 }
 0x2af   : > { %3119 = vmatpush1.bf16.msra.mxu0 %v4105_v27 }
 0x2b0   : > { %3911 = vmatpush1.bf16.msra.mxu1 %v4105_v27  ;;  %3120 = vmatprep.subr.bf16.mxu0 %v4110_v25 }
 0x2b1   : > { %3896 = vmatprep.subr.bf16.mxu1 %v4110_v25 }
 0x2b3   : > { %3121 = vmatpush1.bf16.msra.mxu0 %v4108_v45 }
 0x2b4   : > { %3912 = vmatpush1.bf16.msra.mxu1 %v4108_v45  ;;  %3122 = vmatprep.subr.bf16.mxu0 %v4113_v42 }
 0x2b5   : > { %3897 = vmatprep.subr.bf16.mxu1 %v4113_v42 }
 0x2b7   : > { %3123 = vmatpush1.bf16.msra.mxu0 %v4111_v11 }
 0x2b8   : > { %3913 = vmatpush1.bf16.msra.mxu1 %v4111_v11  ;;  %3124 = vmatprep.subr.bf16.mxu0 %v4116_v19 }
 0x2b9   : > { %3898 = vmatprep.subr.bf16.mxu1 %v4116_v19 }
 0x2bb   : > { %3125 = vmatpush1.bf16.msra.mxu0 %v4114_v7 }
 0x2bc   : > { %3914 = vmatpush1.bf16.msra.mxu1 %v4114_v7  ;;  %3126 = vmatprep.subr.bf16.mxu0 %v4119_v24 }
 0x2bd   : > { %3899 = vmatprep.subr.bf16.mxu1 %v4119_v24 }
 0x2bf   : > { %3127 = vmatpush1.bf16.msra.mxu0 %v4117_v6 }
 0x2c0   : > { %3915 = vmatpush1.bf16.msra.mxu1 %v4117_v6  ;;  %3128 = vmatprep.subr.bf16.mxu0 %v4122_v32 }
 0x2c1   : > { %3900 = vmatprep.subr.bf16.mxu1 %v4122_v32  ;;  %v1849_v32 = vld [vmem:[%s6924_s7] sm:$0x3] }
 0x2c3   : > { %3129 = vmatpush1.bf16.msra.mxu0 %v4120_v55 }
 0x2c4   : > { %3916 = vmatpush1.bf16.msra.mxu1 %v4120_v55  ;;  %3130 = vmatprep.subr.bf16.mxu0 %v4125_v39 }
 0x2c5   : > { %3901 = vmatprep.subr.bf16.mxu1 %v4125_v39 }
 0x2c7   : > { %3131 = vmatpush1.bf16.msra.mxu0 %v4123_v16 }
 0x2c8   : > { %3917 = vmatpush1.bf16.msra.mxu1 %v4123_v16 }
 0x2fc   : > { %v1548_v46 = vpop.f32.mrb[28].mxu0 }
 0x2fd   : > { %v6069_v21 = vadd.f32 %v1548_v46, %v6063_v17  ;;  %v1550_v38 = vpop.f32.mrb[29].mxu0 }
 0x2fe   : > { %v6072_v14 = vadd.f32 %v1550_v38, %v6066_v31  ;;  %v1552_v28 = vpop.f32.mrb[30].mxu0 }
 0x2ff   : > { %v1615_v3 = vmin.f32 %v6069_v21, 20.0  ;;  %v6076_v22 = vadd.f32 %v1552_v28, %v6063_v17  ;;  %v1554_v23 = vpop.f32.mrb[31].mxu0 }
 0x300   : > { %v1616_v52 = vmin.f32 %v6072_v14, 20.0  ;;  %v6080_v57 = vadd.f32 %v1554_v23, %v6066_v31  ;;  %v3783_v23 = vld [vmem:[%s6921_s4 + $0x2] sm:$0x3] }
 0x301   : > { %v1641_v47 = vmul.f32 1.442695, %v1615_v3  ;;  %v1617_v29 = vmin.f32 %v6076_v22, 20.0  ;;  %v6120_v3 = vrot.slane %v1849_v32, %v4984_v59 }
 0x302   : > { %v1643_v51 = vmul.f32 1.442695, %v1616_v52  ;;  %v1618_v62 = vmin.f32 %v6080_v57, 20.0 }
 0x303   : > { %4438 = vpow2.f32 %v1641_v47  ;;  %v1645_v37 = vmul.f32 1.442695, %v1617_v29 }
 0x304   : > { %4440 = vpow2.f32 %v1643_v51  ;;  %v1647_v15 = vmul.f32 1.442695, %v1618_v62 }
 0x305   : > { %4442 = vpow2.f32 %v1645_v37 }
 0x306   : > { %4444 = vpow2.f32 %v1647_v15 }
 0x307   : > { %v1558_v40 = vpop.f32.mrb[32].mxu0 }
 0x308   : > { %v6085_v13 = vadd.f32 %v1558_v40, %v6063_v17  ;;  %v1560_v34 = vpop.f32.mrb[33].mxu0  ;;  %v6126_v40 = vrot.slane %v1849_v32, %v4989_v61 }
 0x309   : > { %v6088_v60 = vadd.f32 %v1560_v34, %v6066_v31  ;;  %v1562_v43 = vpop.f32.mrb[34].mxu0 }
 0x30a   : > { %v1619_v58 = vmin.f32 %v6085_v13, 20.0  ;;  %v6092_v12 = vadd.f32 %v1562_v43, %v6063_v17  ;;  %v1564_v4 = vpop.f32.mrb[35].mxu0 }
 0x30b   : > { %v1620_v36 = vmin.f32 %v6088_v60, 20.0  ;;  %v6096_v8 = vadd.f32 %v1564_v4, %v6066_v31 }
 0x30c   : > { %v1649_v53 = vmul.f32 1.442695, %v1619_v58  ;;  %v1621_v18 = vmin.f32 %v6092_v12, 20.0 }
 0x30d   : > { %v4439_v0 = vpop.eup %4438  ;;  %v1651_v30 = vmul.f32 1.442695, %v1620_v36  ;;  %v1622_v33 = vmin.f32 %v6096_v8, 20.0  ;;  %v6129_v36 = vrot.slane %v3783_v23, %v4984_v59 }
 0x30e   : > { %v4441_v41 = vpop.eup %4440  ;;  %v1693_v2 = vadd.f32 2.0, %v4439_v0  ;;  %4446 = vpow2.f32 %v1649_v53  ;;  %v1653_v1 = vmul.f32 1.442695, %v1621_v18 }
 0x30f   : > { %v4443_v5 = vpop.eup %4442  ;;  %4448 = vpow2.f32 %v1651_v30  ;;  %v1655_v50 = vmul.f32 1.442695, %v1622_v33  ;;  %v1568_v20 = vpop.f32.mrb[36].mxu0  ;;  %v1694_v48 = vadd.f32 2.0, %v4441_v41 }
 0x310   : > { %v4445_v35 = vpop.eup %4444  ;;  %v1695_v49 = vadd.f32 2.0, %v4443_v5  ;;  %4450 = vpow2.f32 %v1653_v1  ;;  %v6101_v56 = vadd.f32 %v1568_v20, %v6063_v17  ;;  %v1570_v54 = vpop.f32.mrb[37].mxu0  ;;  %v1719_v44 = vmul.f32 %v4439_v0, %v1693_v2 }
 0x311   : > { %v1696_v26 = vadd.f32 2.0, %v4445_v35  ;;  %4452 = vpow2.f32 %v1655_v50  ;;  %v1572_v63 = vpop.f32.mrb[38].mxu0  ;;  %v6105_v42 = vadd.f32 %v1570_v54, %v6066_v31  ;;  %v1720_v10 = vmul.f32 %v4441_v41, %v1694_v48 }
 0x312   : > { %v1721_v9 = vmul.f32 %v4443_v5, %v1695_v49  ;;  %v1623_v27 = vmin.f32 %v6101_v56, 20.0  ;;  %v1574_v25 = vpop.f32.mrb[39].mxu0  ;;  %v6109_v24 = vadd.f32 %v1572_v63, %v6063_v17  ;;  %v1771_v55 = vadd.f32 2.0, %v1719_v44 }
 0x313   : > { %v1722_v11 = vmul.f32 %v4445_v35, %v1696_v26  ;;  %v1624_v7 = vmin.f32 %v6105_v42, 20.0  ;;  %v6112_v6 = vadd.f32 %v1574_v25, %v6066_v31  ;;  %v1772_v37 = vadd.f32 2.0, %v1720_v10 }
 0x314   : > { %v1773_v45 = vadd.f32 2.0, %v1721_v9  ;;  %v1657_v19 = vmul.f32 1.442695, %v1623_v27  ;;  %v1625_v16 = vmin.f32 %v6109_v24, 20.0  ;;  %v1745_v20 = vmul.f32 %v1719_v44, %v6069_v21 }
 0x315   : > { %v1659_v39 = vmul.f32 1.442695, %v1624_v7  ;;  %v1626_v46 = vmin.f32 %v6112_v6, 20.0  ;;  %v1774_v28 = vadd.f32 2.0, %v1722_v11  ;;  %v6140_v26 = vmul.f32 %v1720_v10, %v6072_v14 }
 0x316   : > { %4454 = vrcp.f32 %v1773_v45  ;;  %v1661_v29 = vmul.f32 1.442695, %v1625_v16  ;;  %v6144_v63 = vrot.slane %v3783_v23, %v4989_v61  ;;  %v1747_v27 = vmul.f32 %v1721_v9, %v6076_v22 }
 0x317   : > { %4456 = vpow2.f32 %v1657_v19  ;;  %v1663_v51 = vmul.f32 1.442695, %v1626_v46  ;;  %v1748_v25 = vmul.f32 %v1722_v11, %v6080_v57 }
 0x318   : > { %v4447_v38 = vpop.eup %4446  ;;  %4458 = vpow2.f32 %v1659_v39 }
 0x319   : > { %v4449_v52 = vpop.eup %4448  ;;  %v1697_v47 = vadd.f32 2.0, %v4447_v38  ;;  %4460 = vrcp.f32 %v1771_v55 }
 0x31a   : > { %v4451_v62 = vpop.eup %4450  ;;  %v1698_v15 = vadd.f32 2.0, %v4449_v52  ;;  %4462 = vpow2.f32 %v1661_v29 }
 0x31b   : > { %v4453_v34 = vpop.eup %4452  ;;  %v1723_v43 = vmul.f32 %v4447_v38, %v1697_v47  ;;  %v1699_v58 = vadd.f32 2.0, %v4451_v62  ;;  %v1578_v4 = vpop.f32.mrb[40].mxu0  ;;  %4464 = vpow2.f32 %v1663_v51 }
 0x31c   : > { %v1724_v0 = vmul.f32 %v4449_v52, %v1698_v15  ;;  %v1700_v53 = vadd.f32 2.0, %v4453_v34  ;;  %v6132_v18 = vadd.f32 %v1578_v4, %v6063_v17  ;;  %v1580_v41 = vpop.f32.mrb[41].mxu0  ;;  %4466 = vrcp.f32 %v1774_v28 }
 0x31d   : > { %v1775_v30 = vadd.f32 2.0, %v1723_v43  ;;  %v1725_v33 = vmul.f32 %v4451_v62, %v1699_v58  ;;  %v6135_v5 = vadd.f32 %v1580_v41, %v6066_v31  ;;  %v1582_v2 = vpop.f32.mrb[42].mxu0  ;;  %4468 = vrcp.f32 %v1772_v37 }
 0x31e   : > { %v1776_v1 = vadd.f32 2.0, %v1724_v0  ;;  %v1726_v35 = vmul.f32 %v4453_v34, %v1700_v53  ;;  %v1627_v49 = vmin.f32 %v6132_v18, 20.0  ;;  %v1584_v50 = vpop.f32.mrb[43].mxu0  ;;  %v6149_v45 = vmul.f32 %v1723_v43, %v6085_v13 }
 0x31f   : > { %v1628_v54 = vmin.f32 %v6135_v5, 20.0  ;;  %4470 = vrcp.f32 %v1775_v30  ;;  %v1777_v21 = vadd.f32 2.0, %v1725_v33  ;;  %v6152_v55 = vadd.f32 %v1582_v2, %v6063_v17 }
 0x320   : > { %v4455_v48 = vpop.eup %4454  ;;  %4472 = vrcp.f32 %v1776_v1  ;;  %v1665_v44 = vmul.f32 1.442695, %v1627_v49  ;;  %v1778_v7 = vadd.f32 2.0, %v1726_v35  ;;  %v6155_v10 = vadd.f32 %v1584_v50, %v6066_v31 }
 0x321   : > { %v4457_v19 = vpop.eup %4456  ;;  %v1667_v14 = vmul.f32 1.442695, %v1628_v54  ;;  %v1825_v9 = vmul.f32 %v4455_v48, %v1747_v27  ;;  %v6158_v57 = vmul.f32 %v1724_v0, %v6088_v60  ;;  %v6161_v13 = vmul.f32 %v1725_v33, %v6092_v12 }
 0x322   : > { %v1701_v32 = vadd.f32 2.0, %v4457_v19  ;;  %v4459_v22 = vpop.eup %4458  ;;  %4474 = vpow2.f32 %v1665_v44  ;;  %v1629_v38 = vmin.f32 %v6152_v55, 20.0  ;;  %v1630_v52 = vmin.f32 %v6155_v10, 20.0 }
 0x323   : > { %v1588_v11 = vpop.f32.mrb[44].mxu0  ;;  %v4461_v39 = vpop.eup %4460  ;;  %v1702_v46 = vadd.f32 2.0, %v4459_v22  ;;  %4476 = vpow2.f32 %v1667_v14  ;;  %v6173_v2 = vmul.f32 %v1726_v35, %v6096_v8 }
 0x324   : > { %v1727_v16 = vmul.f32 %v4457_v19, %v1701_v32  ;;  %v1590_v28 = vpop.f32.mrb[45].mxu0  ;;  %v4463_v23 = vpop.eup %4462  ;;  %4478 = vrcp.f32 %v1777_v21  ;;  %v6166_v47 = vadd.f32 %v1588_v11, %v6063_v17  ;;  %v1669_v58 = vmul.f32 1.442695, %v1629_v38 }
 0x325   : > { %v6169_v60 = vadd.f32 %v1590_v28, %v6066_v31  ;;  %v1592_v12 = vpop.f32.mrb[46].mxu0  ;;  %v4465_v29 = vpop.eup %4464  ;;  %4480 = vrcp.f32 %v1778_v7  ;;  %v1728_v62 = vmul.f32 %v4459_v22, %v1702_v46  ;;  %v1703_v37 = vadd.f32 2.0, %v4463_v23 }
 0x326   : > { %v1779_v51 = vadd.f32 2.0, %v1727_v16  ;;  %v1594_v15 = vpop.f32.mrb[47].mxu0  ;;  %v4467_v34 = vpop.eup %4466  ;;  %v1704_v43 = vadd.f32 2.0, %v4465_v29  ;;  %v1671_v4 = vmul.f32 1.442695, %v1630_v52  ;;  %v1631_v0 = vmin.f32 %v6166_v47, 20.0 }
 0x327   : > { %v4469_v53 = vpop.eup %4468  ;;  %v1780_v41 = vadd.f32 2.0, %v1728_v62  ;;  %v1729_v30 = vmul.f32 %v4463_v23, %v1703_v37  ;;  %v1823_v33 = vmul.f32 %v4461_v39, %v1745_v20  ;;  %v1632_v49 = vmin.f32 %v6169_v60, 20.0 }
 0x328   : > { %4482 = vrcp.f32 %v1779_v51  ;;  %v1730_v1 = vmul.f32 %v4465_v29, %v1704_v43  ;;  %v6176_v54 = vmul.f32 %v4467_v34, %v1748_v25  ;;  %v1673_v27 = vmul.f32 1.442695, %v1631_v0 }
 0x329   : > { %4484 = vpow2.f32 %v1669_v58  ;;  %v4471_v50 = vpop.eup %4470  ;;  %v1781_v48 = vadd.f32 2.0, %v1729_v30  ;;  %v1824_v14 = vmul.f32 %v4469_v53, %v6140_v26  ;;  %v6180_v20 = vmul.f32 %v6120_v3, %v1825_v9 }
 0x32a   : > { %4486 = vrcp.f32 %v1780_v41  ;;  %v4473_v19 = vpop.eup %4472  ;;  %v1782_v21 = vadd.f32 2.0, %v1730_v1  ;;  %v1675_v8 = vmul.f32 1.442695, %v1632_v49  ;;  %v6183_v35 = vadd.f32 %v1592_v12, %v6063_v17 }
 0x32b   : > { %4488 = vpow2.f32 %v1671_v4  ;;  %v1598_v44 = vpop.f32.mrb[48].mxu0  ;;  %v1861_v25 = vmul.f32 %v6120_v3, %v1823_v33  ;;  %v6187_v22 = vmul.f32 %v1727_v16, %v6101_v56  ;;  %v6190_v11 = vadd.f32 %v1594_v15, %v6066_v31 }
 0x32c   : > { %4490 = vrcp.f32 %v1781_v48  ;;  %v1600_v7 = vpop.f32.mrb[49].mxu0  ;;  %v4475_v32 = vpop.eup %4474  ;;  %v6193_v26 = vadd.f32 %v1598_v44, %v6063_v17  ;;  %v1633_v38 = vmin.f32 %v6183_v35, 20.0  ;;  %v1754_v43 = vmul.f32 %v1728_v62, %v6105_v42 }
 0x32d   : > { %4492 = vrcp.f32 %v1782_v21  ;;  %v1602_v9 = vpop.f32.mrb[50].mxu0  ;;  %v4477_v39 = vpop.eup %4476  ;;  %v1705_v46 = vadd.f32 2.0, %v4475_v32  ;;  %v6197_v28 = vadd.f32 %v1600_v7, %v6066_v31  ;;  %v1634_v16 = vmin.f32 %v6190_v11, 20.0 }
 0x32e   : > { %4494 = vpow2.f32 %v1673_v27  ;;  %v1604_v23 = vpop.f32.mrb[51].mxu0  ;;  %v4479_v52 = vpop.eup %4478  ;;  %v1706_v56 = vadd.f32 2.0, %v4477_v39  ;;  %v1635_v12 = vmin.f32 %v6193_v26, 20.0  ;;  %v1677_v37 = vmul.f32 1.442695, %v1633_v38 }
 0x32f   : > { %4496 = vpow2.f32 %v1675_v8  ;;  %v4481_v29 = vpop.eup %4480  ;;  %v1731_v51 = vmul.f32 %v4475_v32, %v1705_v46  ;;  %v1636_v15 = vmin.f32 %v6197_v28, 20.0  ;;  %v6203_v34 = vadd.f32 %v1602_v9, %v6063_v17 }
 0x330   : > { %v1732_v58 = vmul.f32 %v4477_v39, %v1706_v56  ;;  %v1679_v4 = vmul.f32 1.442695, %v1634_v16  ;;  %v1862_v0 = vmul.f32 %v6126_v40, %v1824_v14  ;;  %v1827_v41 = vmul.f32 %v4471_v50, %v6149_v45 }
 0x331   : > { %v1783_v33 = vadd.f32 2.0, %v1731_v51  ;;  %4498 = vpow2.f32 %v1677_v37  ;;  %v1681_v49 = vmul.f32 1.442695, %v1635_v12  ;;  %v1828_v27 = vmul.f32 %v4473_v19, %v6158_v57 }
 0x332   : > { %v4483_v53 = vpop.eup %4482  ;;  %v1755_v21 = vmul.f32 %v1729_v30, %v6109_v24  ;;  %4500 = vpow2.f32 %v1679_v4  ;;  %v1683_v44 = vmul.f32 1.442695, %v1636_v15  ;;  %v1784_v7 = vadd.f32 2.0, %v1732_v58 }
 0x333   : > { %v4485_v48 = vpop.eup %4484  ;;  %v1637_v62 = vmin.f32 %v6203_v34, 20.0  ;;  %v1887_v32 = vadd.f32 %v1862_v0, %v1861_v25  ;;  %v6212_v9 = vmul.f32 %v4479_v52, %v6161_v13  ;;  %v1756_v45 = vmul.f32 %v1730_v1, %v6112_v6 }
 0x334   : > { %v4487_v8 = vpop.eup %4486  ;;  %v1707_v42 = vadd.f32 2.0, %v4485_v48  ;;  %4502 = vrcp.f32 %v1783_v33  ;;  %v6216_v50 = vadd.f32 %v1604_v23, %v6066_v31  ;;  %v6219_v46 = vmul.f32 %v4481_v29, %v6173_v2 }
 0x335   : > { %v4489_v14 = vpop.eup %4488  ;;  %4504 = vpow2.f32 %v1681_v49  ;;  %v1685_v19 = vmul.f32 1.442695, %v1637_v62  ;;  %1888 = vadd.xlane.f32.xlu1 %v1887_v32  ;;  %v1865_v25 = vmul.f32 %v6120_v3, %v1827_v41  ;;  %v1757_v1 = vmul.f32 %v1731_v51, %v6132_v18 }
 0x336   : > { %v4491_v57 = vpop.eup %4490  ;;  %v1733_v24 = vmul.f32 %v4485_v48, %v1707_v42  ;;  %v1708_v30 = vadd.f32 2.0, %v4489_v14  ;;  %4506 = vpow2.f32 %v1683_v44  ;;  %v1638_v13 = vmin.f32 %v6216_v50, 20.0 }
 0x337   : > { %v4493_v39 = vpop.eup %4492  ;;  %4508 = vrcp.f32 %v1784_v7  ;;  %v1866_v12 = vmul.f32 %v6126_v40, %v1828_v27  ;;  %v1831_v2 = vmul.f32 %v4483_v53, %v6187_v22  ;;  %v1832_v15 = vmul.f32 %v4487_v8, %v1754_v43 }
 0x338   : > { %v4495_v6 = vpop.eup %4494  ;;  %v1785_v38 = vadd.f32 2.0, %v1733_v24  ;;  %v1734_v23 = vmul.f32 %v4489_v14, %v1708_v30  ;;  %4510 = vpow2.f32 %v1685_v19  ;;  %v1687_v16 = vmul.f32 1.442695, %v1638_v13 }
 0x339   : > { %v4497_v52 = vpop.eup %4496  ;;  %v1709_v56 = vadd.f32 2.0, %v4495_v6  ;;  %v6226_v0 = vadd.f32 %v1866_v12, %v1865_v25  ;;  %v6228_v51 = vmul.f32 %v4491_v57, %v1755_v21  ;;  %v6230_v41 = vmul.f32 %v4493_v39, %v1756_v45 }
 0x33a   : > { %4512 = vrcp.f32 %v1785_v38  ;;  %v1786_v29 = vadd.f32 2.0, %v1734_v23  ;;  %v1710_v37 = vadd.f32 2.0, %v4497_v52  ;;  %v1758_v33 = vmul.f32 %v1732_v58, %v6135_v5 }
 0x33b   : > { %v1735_v4 = vmul.f32 %v4495_v6, %v1709_v56  ;;  %4514 = vpow2.f32 %v1687_v16  ;;  %6936 = vst [vmem:[#allocation4_spill] sm:$0xff] %v6226_v0  ;;  %v4499_v18 = vpop.eup %4498  ;;  %v1759_v27 = vmul.f32 %v1733_v24, %v6152_v55  ;;  %v6235_v43 = vmul.f32 %v1734_v23, %v6155_v10 }
 0x33c   : > { %v1736_v49 = vmul.f32 %v4497_v52, %v1710_v37  ;;  %v4501_v48 = vpop.eup %4500  ;;  %4516 = vrcp.f32 %v1786_v29  ;;  %v1711_v53 = vadd.f32 2.0, %v4499_v18  ;;  %v1869_v42 = vmul.f32 %v6120_v3, %v1831_v2 }
 0x33d   : > { %v1787_v22 = vadd.f32 2.0, %v1735_v4  ;;  %v1608_v44 = vpop.f32.mrb[52].mxu0  ;;  %v1712_v8 = vadd.f32 2.0, %v4501_v48  ;;  %v1870_v32 = vmul.f32 %v6126_v40, %v1832_v15  ;;  %v1864_v14 = vmul.f32 %v6126_v40, %v6176_v54 }
 0x33e   : > { %v6238_v7 = vadd.f32 %v1608_v44, %v6063_v17  ;;  %v1610_v21 = vpop.f32.mrb[53].mxu0  ;;  %v4503_v62 = vpop.eup %4502  ;;  %v1737_v5 = vmul.f32 %v4499_v18, %v1711_v53  ;;  %v6248_v45 = vmul.f32 %v1735_v4, %v6166_v47  ;;  %v1788_v17 = vadd.f32 2.0, %v1736_v49 }
 0x33f   : > { %v6242_v58 = vadd.f32 %v1610_v21, %v6066_v31  ;;  %v1612_v55 = vpop.f32.mrb[54].mxu0  ;;  %v4505_v10 = vpop.eup %4504  ;;  %v1738_v57 = vmul.f32 %v4501_v48, %v1712_v8  ;;  %4518 = vrcp.f32 %v1787_v22  ;;  %v6254_v13 = vmul.f32 %v6120_v3, %v6212_v9 }
 0x340   : > { %v1639_v24 = vmin.f32 %v6238_v7, 20.0  ;;  %v1613_v30 = vpop.f32.mrb[55].mxu0  ;;  %v4507_v19 = vpop.eup %4506  ;;  %v1713_v39 = vadd.f32 2.0, %v4505_v10  ;;  %v6257_v54 = vmul.f32 %v1736_v49, %v6169_v60  ;;  %v1789_v47 = vadd.f32 2.0, %v1737_v5 }
 0x341   : > { %v1640_v31 = vmin.f32 %v6242_v58, 20.0  ;;  %v4509_v25 = vpop.eup %4508  ;;  %v1714_v6 = vadd.f32 2.0, %v4507_v19  ;;  %v1835_v52 = vmul.f32 %v4503_v62, %v1757_v1  ;;  %v1790_v56 = vadd.f32 2.0, %v1738_v57 }
 0x342   : > { %v1689_v38 = vmul.f32 1.442695, %v1639_v24  ;;  %v4511_v23 = vpop.eup %4510  ;;  %v1739_v16 = vmul.f32 %v4505_v10, %v1713_v39  ;;  %v6259_v12 = vadd.f32 %v1870_v32, %v1869_v42  ;;  %4520 = vrcp.f32 %v1788_v17 }
 0x343   : > { %v1740_v29 = vmul.f32 %v4507_v19, %v1714_v6  ;;  %v1715_v37 = vadd.f32 2.0, %v4511_v23  ;;  %v6262_v9 = vadd.f32 %v1864_v14, %v6180_v20  ;;  %v1836_v4 = vmul.f32 %v4509_v25, %v1758_v33 }
 0x344   : > { %6937 = vst [vmem:[#allocation5_spill] sm:$0xff] %v6259_v12  ;;  %v4513_v2 = vpop.eup %4512  ;;  %v1791_v60 = vadd.f32 2.0, %v1739_v16  ;;  %4522 = vpow2.f32 %v1689_v38  ;;  %v1691_v18 = vmul.f32 1.442695, %v1640_v31  ;;  %v6265_v48 = vmul.f32 %v1737_v5, %v6183_v35 }
 0x345   : > { %6938 = vst [vmem:[#allocation6_spill] sm:$0xff] %v6262_v9  ;;  %v4515_v15 = vpop.eup %4514  ;;  %v2579_v49 = vpop.f32.mrb[56].mxu0  ;;  %4524 = vrcp.f32 %v1789_v47  ;;  %v1792_v1 = vadd.f32 2.0, %v1740_v29  ;;  %v1741_v22 = vmul.f32 %v4511_v23, %v1715_v37  ;;  %v6273_v42 = vmul.f32 %v4513_v2, %v1759_v27 }
 0x346   : > { %v2581_v53 = vpop.f32.mrb[57].mxu0  ;;  %v4517_v44 = vpop.eup %4516  ;;  %4526 = vrcp.f32 %v1790_v56  ;;  %v1716_v8 = vadd.f32 2.0, %v4515_v15  ;;  %v6268_v21 = vadd.f32 %v2579_v49, %v6129_v36  ;;  %v6276_v62 = vmul.f32 %v1738_v57, %v6190_v11 }
 0x347   : > { %v6271_v20 = vadd.f32 %v2581_v53, %v6144_v63  ;;  %v2583_v33 = vpop.f32.mrb[58].mxu0  ;;  %4528 = vrcp.f32 %v1791_v60  ;;  %v1793_v35 = vadd.f32 2.0, %v1741_v22  ;;  %v6284_v10 = vmul.f32 %v4517_v44, %v6235_v43 }
 0x348   : > { %v2585_v5 = vpop.f32.mrb[59].mxu0  ;;  %4530 = vpow2.f32 %v1691_v18  ;;  %v2646_v55 = vmin.f32 %v6268_v21, 20.0  ;;  %v6281_v14 = vadd.f32 %v2583_v33, %v6129_v36  ;;  %v6287_v27 = vmul.f32 %v1739_v16, %v6193_v26 }
 0x349   : > { %v2647_v32 = vmin.f32 %v6271_v20, 20.0  ;;  %v6290_v11 = vmul.f32 %v1740_v29, %v6197_v28  ;;  %4532 = vrcp.f32 %v1792_v1  ;;  %v4519_v17 = vpop.eup %4518  ;;  %v1742_v57 = vmul.f32 %v4515_v15, %v1716_v8 }
 0x34a   : > { %v2672_v24 = vmul.f32 1.442695, %v2646_v55  ;;  %v2648_v19 = vmin.f32 %v6281_v14, 20.0  ;;  %v6294_v39 = vmul.f32 %v1741_v22, %v6203_v34  ;;  %4534 = vrcp.f32 %v1793_v35 }
 0x34b   : > { %v2674_v30 = vmul.f32 1.442695, %v2647_v32  ;;  %v6297_v43 = vadd.f32 %v2585_v5, %v6144_v63  ;;  %v1873_v26 = vmul.f32 %v6120_v3, %v1835_v52  ;;  %v1874_v25 = vmul.f32 %v6126_v40, %v1836_v4 }
 0x34c   : > { %4536 = vpow2.f32 %v2672_v24  ;;  %v2676_v31 = vmul.f32 1.442695, %v2648_v19  ;;  %v1868_v47 = vmul.f32 %v6126_v40, %v6219_v46  ;;  %v4521_v6 = vpop.eup %4520  ;;  %v1839_v38 = vmul.f32 %v4519_v17, %v6248_v45 }
 0x34d   : > { %v2589_v28 = vpop.f32.mrb[60].mxu0  ;;  %4538 = vpow2.f32 %v2674_v30  ;;  %v2649_v34 = vmin.f32 %v6297_v43, 20.0  ;;  %v1794_v52 = vadd.f32 2.0, %v1742_v57  ;;  %v6311_v37 = vadd.f32 %v1874_v25, %v1873_v26 }
 0x34e   : > { %v6306_v23 = vadd.f32 %v2589_v28, %v6129_v36  ;;  %v2591_v56 = vpop.f32.mrb[61].mxu0  ;;  %v4523_v16 = vpop.eup %4522  ;;  %4540 = vpow2.f32 %v2676_v31  ;;  %v6318_v1 = vmul.f32 %v1742_v57, %v6216_v50  ;;  %v6325_v44 = vadd.f32 %v1868_v47, %v6254_v13 }
 0x34f   : > { %v6309_v2 = vadd.f32 %v2591_v56, %v6144_v63  ;;  %v2593_v29 = vpop.f32.mrb[62].mxu0  ;;  %6939 = vst [vmem:[#allocation7_spill] sm:$0xff] %v6311_v37  ;;  %v4525_v46 = vpop.eup %4524  ;;  %v1717_v15 = vadd.f32 2.0, %v4523_v16  ;;  %v2678_v4 = vmul.f32 1.442695, %v2649_v34  ;;  %v1840_v33 = vmul.f32 %v4521_v6, %v6257_v54 }
 0x350   : > { %v2650_v45 = vmin.f32 %v6306_v23, 20.0  ;;  %v6315_v60 = vadd.f32 %v2593_v29, %v6129_v36  ;;  %v2595_v18 = vpop.f32.mrb[63].mxu0  ;;  %v4527_v49 = vpop.eup %4526  ;;  %6940 = vst [vmem:[#allocation8_spill] sm:$0xff] %v6325_v44  ;;  %v6331_v24 = vmul.f32 %v4525_v46, %v6265_v48  ;;  %v6340_v48 = vmul.f32 %v6120_v3, %v1839_v38 }
 0x351   : > { %v2651_v22 = vmin.f32 %v6309_v2, 20.0  ;;  %v6322_v53 = vadd.f32 %v2595_v18, %v6144_v63  ;;  %v4529_v8 = vpop.eup %4528  ;;  %v1743_v35 = vmul.f32 %v4523_v16, %v1717_v15  ;;  %4542 = vpow2.f32 %v2678_v4 }
 0x352   : > { %v2680_v5 = vmul.f32 1.442695, %v2650_v45  ;;  %v4531_v55 = vpop.eup %4530  ;;  %4544 = vrcp.f32 %v1794_v52  ;;  %v2652_v50 = vmin.f32 %v6315_v60, 20.0  ;;  %6941 = vst [vmem:[#allocation9_spill] sm:$0xff] %v6331_v24  ;;  %v6334_v19 = vmul.f32 %v4527_v49, %v6276_v62 }
 0x353   : > { %v2682_v32 = vmul.f32 1.442695, %v2651_v22  ;;  %v2653_v17 = vmin.f32 %v6322_v53, 20.0  ;;  %v4533_v57 = vpop.eup %4532  ;;  %v1795_v30 = vadd.f32 2.0, %v1743_v35  ;;  %v1718_v13 = vadd.f32 2.0, %v4531_v55 }
 0x354   : > { %4546 = vpow2.f32 %v2680_v5  ;;  %6942 = vst [vmem:[#allocation10_spill] sm:$0xff] %v6334_v19  ;;  %v2684_v54 = vmul.f32 1.442695, %v2652_v50  ;;  %v4535_v28 = vpop.eup %4534  ;;  %v6343_v56 = vmul.f32 %v4529_v8, %v6287_v27  ;;  %v6346_v62 = vmul.f32 %v4533_v57, %v6290_v11 }
 0x355   : > { %4548 = vpow2.f32 %v2682_v32  ;;  %v2686_v26 = vmul.f32 1.442695, %v2653_v17  ;;  %v2599_v31 = vpop.f32.mrb[64].mxu0  ;;  %v1744_v25 = vmul.f32 %v4531_v55, %v1718_v13  ;;  %v6352_v46 = vmul.f32 %v1743_v35, %v6238_v7 }
 0x356   : > { %4550 = vrcp.f32 %v1795_v30  ;;  %v6337_v47 = vadd.f32 %v2599_v31, %v6129_v36  ;;  %v2601_v6 = vpop.f32.mrb[65].mxu0  ;;  %v4537_v34 = vpop.eup %4536  ;;  %v6355_v27 = vmul.f32 %v4535_v28, %v6294_v39  ;;  %v6363_v7 = vmul.f32 %v6126_v40, %v1840_v33 }
 0x357   : > { %4552 = vpow2.f32 %v2684_v54  ;;  %v6349_v16 = vadd.f32 %v2601_v6, %v6144_v63  ;;  %v2603_v52 = vpop.f32.mrb[66].mxu0  ;;  %v4539_v29 = vpop.eup %4538  ;;  %v1796_v15 = vadd.f32 2.0, %v1744_v25  ;;  %v2724_v4 = vadd.f32 2.0, %v4537_v34 }
 0x358   : > { %4554 = vpow2.f32 %v2686_v26  ;;  %v2605_v38 = vpop.f32.mrb[67].mxu0  ;;  %v4541_v45 = vpop.eup %4540  ;;  %6943 = vst [vmem:[#allocation11_spill] sm:$0xff] %v6355_v27  ;;  %v2725_v18 = vadd.f32 2.0, %v4539_v29  ;;  %v2654_v11 = vmin.f32 %v6337_v47, 20.0  ;;  %v6359_v49 = vadd.f32 %v2603_v52, %v6129_v36 }
 0x359   : > { %v2750_v22 = vmul.f32 %v4537_v34, %v2724_v4  ;;  %v2726_v8 = vadd.f32 2.0, %v4541_v45  ;;  %v2655_v5 = vmin.f32 %v6349_v16, 20.0  ;;  %v6366_v32 = vadd.f32 %v2605_v38, %v6144_v63 }
 0x35a   : > { %v2751_v35 = vmul.f32 %v4539_v29, %v2725_v18  ;;  %v2688_v55 = vmul.f32 1.442695, %v2654_v11  ;;  %v6370_v39 = vmul.f32 %v6120_v3, %v6228_v51  ;;  %4556 = vrcp.f32 %v1796_v15 }
 0x35b   : > { %v4543_v50 = vpop.eup %4542  ;;  %v2802_v17 = vadd.f32 2.0, %v2750_v22  ;;  %v2752_v57 = vmul.f32 %v4541_v45, %v2726_v8  ;;  %v2656_v30 = vmin.f32 %v6359_v49, 20.0  ;;  %v6376_v33 = vmul.f32 %v1744_v25, %v6242_v58 }
 0x35c   : > { %v6373_v13 = vpop.eup %4544  ;;  %v2803_v54 = vadd.f32 2.0, %v2751_v35  ;;  %v2727_v26 = vadd.f32 2.0, %v4543_v50  ;;  %4558 = vpow2.f32 %v2688_v55  ;;  %v6379_v6 = vmul.f32 %v2750_v22, %v6268_v21 }
 0x35d   : > { %v2609_v31 = vpop.f32.mrb[68].mxu0  ;;  %4560 = vrcp.f32 %v2802_v17  ;;  %v2804_v51 = vadd.f32 2.0, %v2752_v57  ;;  %v2690_v34 = vmul.f32 1.442695, %v2655_v5  ;;  %v6382_v15 = vmul.f32 %v2751_v35, %v6271_v20 }
 0x35e   : > { %v4547_v28 = vpop.eup %4546  ;;  %v2611_v52 = vpop.f32.mrb[69].mxu0  ;;  %v2753_v4 = vmul.f32 %v4543_v50, %v2727_v26  ;;  %v2657_v58 = vmin.f32 %v6366_v32, 20.0  ;;  %v2692_v11 = vmul.f32 1.442695, %v2656_v30  ;;  %v6386_v21 = vadd.f32 %v2609_v31, %v6129_v36 }
 0x35f   : > { %v4549_v29 = vpop.eup %4548  ;;  %v2728_v38 = vadd.f32 2.0, %v4547_v28  ;;  %v2613_v25 = vpop.f32.mrb[70].mxu0  ;;  %4562 = vrcp.f32 %v2804_v51  ;;  %v6389_v20 = vadd.f32 %v2611_v52, %v6144_v63  ;;  %v2778_v31 = vmul.f32 %v2752_v57, %v6281_v14 }
 0x360   : > { %v4551_v45 = vpop.eup %4550  ;;  %v2729_v18 = vadd.f32 2.0, %v4549_v29  ;;  %v2615_v22 = vpop.f32.mrb[71].mxu0  ;;  %4564 = vrcp.f32 %v2803_v54  ;;  %v2805_v5 = vadd.f32 2.0, %v2753_v4  ;;  %v2658_v26 = vmin.f32 %v6386_v21, 20.0 }
 0x361   : > { %v4553_v8 = vpop.eup %4552  ;;  %v2754_v55 = vmul.f32 %v4547_v28, %v2728_v38  ;;  %4566 = vpow2.f32 %v2690_v34  ;;  %v2694_v37 = vmul.f32 1.442695, %v2657_v58  ;;  %v6394_v54 = vmul.f32 %v4551_v45, %v6352_v46 }
 0x362   : > { %v4555_v35 = vpop.eup %4554  ;;  %v2755_v50 = vmul.f32 %v4549_v29, %v2729_v18  ;;  %v2730_v17 = vadd.f32 2.0, %v4553_v8  ;;  %4568 = vrcp.f32 %v2805_v5  ;;  %v6397_v28 = vmul.f32 %v2753_v4, %v6297_v43 }
 0x363   : > { %v2806_v51 = vadd.f32 2.0, %v2754_v55  ;;  %v2731_v30 = vadd.f32 2.0, %v4555_v35  ;;  %4570 = vpow2.f32 %v2692_v11  ;;  %v2696_v18 = vmul.f32 1.442695, %v2658_v26 }
 0x364   : > { %v2807_v44 = vadd.f32 2.0, %v2755_v50  ;;  %v2756_v12 = vmul.f32 %v4553_v8, %v2730_v17  ;;  %v4557_v29 = vpop.eup %4556  ;;  %v2659_v58 = vmin.f32 %v6389_v20, 20.0  ;;  %v6401_v57 = vmul.f32 %v2754_v55, %v6306_v23 }
 0x365   : > { %4572 = vrcp.f32 %v2806_v51  ;;  %v2757_v52 = vmul.f32 %v4555_v35, %v2731_v30  ;;  %v2619_v34 = vpop.f32.mrb[72].mxu0  ;;  %v6404_v46 = vmul.f32 %v2755_v50, %v6309_v2  ;;  %v6407_v43 = vadd.f32 %v2613_v25, %v6129_v36 }
 0x366   : > { %4574 = vrcp.f32 %v2807_v44  ;;  %v2808_v38 = vadd.f32 2.0, %v2756_v12  ;;  %v2621_v5 = vpop.f32.mrb[73].mxu0  ;;  %v4559_v14 = vpop.eup %4558  ;;  %v2698_v8 = vmul.f32 1.442695, %v2659_v58  ;;  %v6410_v35 = vadd.f32 %v2615_v22, %v6144_v63 }
 0x367   : > { %4576 = vpow2.f32 %v2694_v37  ;;  %v2623_v4 = vpop.f32.mrb[74].mxu0  ;;  %v4561_v45 = vpop.eup %4560  ;;  %v2809_v11 = vadd.f32 2.0, %v2757_v52  ;;  %v2732_v44 = vadd.f32 2.0, %v4559_v14  ;;  %v6413_v26 = vmul.f32 %v4557_v29, %v6376_v33 }
 0x368   : > { %v2625_v17 = vpop.f32.mrb[75].mxu0  ;;  %4578 = vrcp.f32 %v2808_v38  ;;  %v2660_v23 = vmin.f32 %v6407_v43, 20.0  ;;  %v6417_v2 = vadd.f32 %v2619_v34, %v6129_v36  ;;  %v6420_v25 = vmul.f32 %v4561_v45, %v6379_v6 }
 0x369   : > { %v4563_v37 = vpop.eup %4562  ;;  %v2758_v55 = vmul.f32 %v4559_v14, %v2732_v44  ;;  %4580 = vpow2.f32 %v2696_v18  ;;  %v2661_v50 = vmin.f32 %v6410_v35, 20.0  ;;  %v6427_v58 = vadd.f32 %v2621_v5, %v6144_v63 }
 0x36a   : > { %v4565_v22 = vpop.eup %4564  ;;  %v6423_v51 = vmul.f32 %v4563_v37, %v2778_v31  ;;  %4582 = vpow2.f32 %v2698_v8  ;;  %v2700_v33 = vmul.f32 1.442695, %v2660_v23  ;;  %v2662_v30 = vmin.f32 %v6417_v2, 20.0 }
 0x36b   : > { %v4567_v29 = vpop.eup %4566  ;;  %4584 = vrcp.f32 %v2809_v11  ;;  %v2810_v38 = vadd.f32 2.0, %v2758_v55  ;;  %v2702_v34 = vmul.f32 1.442695, %v2661_v50  ;;  %6944 = vst [vmem:[#allocation12_spill] sm:$0xff] %v6427_v58  ;;  %v2782_v8 = vmul.f32 %v2756_v12, %v6315_v60 }
 0x36c   : > { %v4569_v6 = vpop.eup %4568  ;;  %v2733_v14 = vadd.f32 2.0, %v4567_v29  ;;  %4586 = vpow2.f32 %v2700_v33  ;;  %v2704_v45 = vmul.f32 1.442695, %v2662_v30  ;;  %v2663_v23 = vmin.f32 %v6427_v58, 20.0 }
 0x36d   : > { %v2629_v31 = vpop.f32.mrb[76].mxu0  ;;  %v4571_v44 = vpop.eup %4570  ;;  %4588 = vrcp.f32 %v2810_v38  ;;  %v6434_v11 = vadd.f32 %v2623_v4, %v6129_v36  ;;  %v6437_v18 = vadd.f32 %v2625_v17, %v6144_v63  ;;  %v2783_v0 = vmul.f32 %v2757_v52, %v6322_v53 }
 0x36e   : > { %v2631_v37 = vpop.f32.mrb[77].mxu0  ;;  %v2759_v50 = vmul.f32 %v4567_v29, %v2733_v14  ;;  %v2734_v9 = vadd.f32 2.0, %v4571_v44  ;;  %4590 = vpow2.f32 %v2702_v34  ;;  %v2706_v12 = vmul.f32 1.442695, %v2663_v23 }
 0x36f   : > { %v4573_v5 = vpop.eup %4572  ;;  %6945 = vst [vmem:[#allocation13_spill] sm:$0xff] %v6437_v18  ;;  %v2633_v33 = vpop.f32.mrb[78].mxu0  ;;  %4592 = vpow2.f32 %v2704_v45  ;;  %v2664_v60 = vmin.f32 %v6434_v11, 20.0  ;;  %v2855_v61 = vmul.f32 %v4565_v22, %v6382_v15  ;;  %v2784_v29 = vmul.f32 %v2758_v55, %v6337_v47 }
 0x370   : > { %v4575_v30 = vpop.eup %4574  ;;  %v6441_v38 = vpop.f32.mrb[79].mxu0  ;;  %v2811_v14 = vadd.f32 2.0, %v2759_v50  ;;  %v2760_v34 = vmul.f32 %v4571_v44, %v2734_v9  ;;  %4594 = vpow2.f32 %v2706_v12  ;;  %v2665_v58 = vmin.f32 %v6437_v18, 20.0 }
 0x371   : > { %v4577_v4 = vpop.eup %4576  ;;  %v2708_v17 = vmul.f32 1.442695, %v2664_v60  ;;  %v2857_v53 = vmul.f32 %v4569_v6, %v6397_v28  ;;  %v6448_v52 = vmul.f32 %v4573_v5, %v6401_v57  ;;  %v6451_v15 = vmul.f32 %v4575_v30, %v6404_v46 }
 0x372   : > { %v2735_v59 = vadd.f32 2.0, %v4577_v4  ;;  %v4579_v27 = vpop.eup %4578  ;;  %4596 = vrcp.f32 %v2811_v14  ;;  %v2812_v45 = vadd.f32 2.0, %v2760_v34  ;;  %v2710_v9 = vmul.f32 1.442695, %v2665_v58 }
 0x373   : > { %v4581_v23 = vpop.eup %4580  ;;  %4598 = vpow2.f32 %v2708_v17  ;;  %v6454_v22 = vmul.f32 %v2759_v50, %v6349_v16  ;;  %v6457_v28 = vadd.f32 %v2629_v31, %v6129_v36  ;;  %v6460_v46 = vadd.f32 %v2631_v37, %v6144_v63 }
 0x374   : > { %v2761_v47 = vmul.f32 %v4577_v4, %v2735_v59  ;;  %v4583_v55 = vpop.eup %4582  ;;  %4600 = vrcp.f32 %v2812_v45  ;;  %v2736_v44 = vadd.f32 2.0, %v4581_v23  ;;  %v6464_v30 = vmul.f32 %v4579_v27, %v2782_v8 }
 0x375   : > { %6946 = vst [vmem:[#allocation14_spill] sm:$0xff] %v6457_v28  ;;  %v2639_v57 = vpop.f32.mrb[80].mxu0  ;;  %v4585_v6 = vpop.eup %4584  ;;  %v2737_v12 = vadd.f32 2.0, %v4583_v55  ;;  %4602 = vpow2.f32 %v2710_v9  ;;  %v2666_v50 = vmin.f32 %v6457_v28, 20.0  ;;  %v6468_v60 = vadd.f32 %v2633_v33, %v6129_v36 }
 0x376   : > { %v2813_v5 = vadd.f32 2.0, %v2761_v47  ;;  %v6462_v59 = vpop.f32.mrb[81].mxu0  ;;  %v4587_v58 = vpop.eup %4586  ;;  %v2762_v16 = vmul.f32 %v4581_v23, %v2736_v44  ;;  %v2881_v45 = vpack.c.bf16 %v2857_v53, %v2855_v61  ;;  %v6470_v18 = vmul.f32 %v4585_v6, %v2783_v0 }
 0x377   : > { %v2643_v31 = vpop.f32.mrb[82].mxu0  ;;  %v4589_v4 = vpop.eup %4588  ;;  %v2763_v14 = vmul.f32 %v4583_v55, %v2737_v12  ;;  %v2738_v17 = vadd.f32 2.0, %v4587_v58  ;;  %v2786_v19 = vmul.f32 %v2760_v34, %v6359_v49  ;;  %v2712_v8 = vmul.f32 1.442695, %v2666_v50 }
 0x378   : > { %4604 = vrcp.f32 %v2813_v5  ;;  %v2644_v9 = vpop.f32.mrb[83].mxu0  ;;  %v4591_v37 = vpop.eup %4590  ;;  %v2814_v27 = vadd.f32 2.0, %v2762_v16  ;;  %v2667_v33 = vmin.f32 %v6460_v46, 20.0  ;;  %3132 = vmatprep.mubr.bf16.mxu0 %v2881_v45  ;;  %v2787_v5 = vmul.f32 %v2761_v47, %v6366_v32 }
 0x379   : > { %v4593_v23 = vpop.eup %4592  ;;  %v2815_v44 = vadd.f32 2.0, %v2763_v14  ;;  %v2764_v28 = vmul.f32 %v4587_v58, %v2738_v17  ;;  %v2739_v24 = vadd.f32 2.0, %v4591_v37  ;;  %v2668_v61 = vmin.f32 %v6468_v60, 20.0 }
 0x37a   : > { %4606 = vrcp.f32 %v2814_v27  ;;  %v2740_v55 = vadd.f32 2.0, %v4593_v23  ;;  %v6947_v0 = vpack.c.bf16 %v6423_v51, %v6420_v25  ;;  %v4595_v49 = vpop.eup %4594  ;;  %v6479_v34 = vmul.f32 %v4589_v4, %v2784_v29 }
 0x37b   : > { %4608 = vrcp.f32 %v2815_v44  ;;  %v2816_v53 = vadd.f32 2.0, %v2764_v28  ;;  %v2765_v6 = vmul.f32 %v4591_v37, %v2739_v24  ;;  %v2788_v58 = vmul.f32 %v2762_v16, %v6386_v21 }
 0x37c   : > { %3133 = vmatmul.mubr.bf16.vlgmr.msra.gmra.mrb[84].mxu0 %v6947_v0  ;;  %v4597_v12 = vpop.eup %4596  ;;  %v6482_v50 = vmul.f32 %v4593_v23, %v2740_v55  ;;  %v2741_v32 = vadd.f32 2.0, %v4595_v49  ;;  %4610 = vpow2.f32 %v2712_v8  ;;  %v2789_v31 = vmul.f32 %v2763_v14, %v6389_v20 }
 0x37d   : > { %v4599_v47 = vpop.eup %4598  ;;  %4612 = vrcp.f32 %v2816_v53  ;;  %v2817_v17 = vadd.f32 2.0, %v2765_v6  ;;  %v2714_v25 = vmul.f32 1.442695, %v2667_v33  ;;  %v2716_v24 = vmul.f32 1.442695, %v2668_v61 }
 0x37e   : > { %v4601_v51 = vpop.eup %4600  ;;  %v2818_v29 = vadd.f32 2.0, %v6482_v50  ;;  %v6486_v4 = vmul.f32 %v4595_v49, %v2741_v32  ;;  %v2742_v45 = vadd.f32 2.0, %v4599_v47  ;;  %v6490_v21 = vadd.f32 %v6441_v38, %v6144_v63 }
 0x37f   : > { %v4603_v9 = vpop.eup %4602  ;;  %v2864_v37 = vmul.f32 %v4601_v51, %v2786_v19  ;;  %4614 = vrcp.f32 %v2817_v17  ;;  %v6493_v16 = vadd.f32 %v2639_v57, %v6129_v36  ;;  %v2790_v20 = vmul.f32 %v2764_v28, %v6407_v43 }
 0x380   : > { %4616 = vrcp.f32 %v2818_v29  ;;  %v2819_v14 = vadd.f32 2.0, %v6486_v4  ;;  %v2768_v27 = vmul.f32 %v4599_v47, %v2742_v45  ;;  %v2743_v44 = vadd.f32 2.0, %v4603_v9 }
 0x381   : > { %v2884_v23 = vpack.c.bf16 %v2864_v37, %v6479_v34  ;;  %4618 = vpow2.f32 %v2714_v25  ;;  %v2669_v19 = vmin.f32 %v6490_v21, 20.0  ;;  %v2863_v33 = vmul.f32 %v4597_v12, %v6454_v22 }
 0x382   : > { %v4605_v8 = vpop.eup %4604  ;;  %4620 = vrcp.f32 %v2819_v14  ;;  %v2820_v55 = vadd.f32 2.0, %v2768_v27  ;;  %v6500_v36 = vmul.f32 %v4603_v9, %v2743_v44  ;;  %v2670_v28 = vmin.f32 %v6493_v16, 20.0 }
 0x383   : > { %v2865_v38 = vmul.f32 %v4605_v8, %v2787_v5  ;;  %4622 = vpow2.f32 %v2716_v24  ;;  %v2718_v43 = vmul.f32 1.442695, %v2669_v19  ;;  %v6505_v61 = vadd.f32 %v6462_v59, %v6144_v63 }
 0x384   : > { %v4607_v57 = vpop.eup %4606  ;;  %4624 = vrcp.f32 %v2820_v55  ;;  %v2883_v0 = vpack.c.bf16 %v6470_v18, %v6451_v15  ;;  %v2882_v22 = vpack.c.bf16 %v6464_v30, %v6448_v52  ;;  %v2791_v34 = vmul.f32 %v2765_v6, %v6410_v35  ;;  %v6950_v55 = vld [vmem:[#allocation11_spill] sm:$0xff] }
 0x385   : > { %v4609_v5 = vpop.eup %4608  ;;  %v6511_v49 = vmul.f32 %v4607_v57, %v2788_v58  ;;  %v2821_v53 = vadd.f32 2.0, %v6500_v36  ;;  %4626 = vpow2.f32 %v2718_v43  ;;  %v2720_v47 = vmul.f32 1.442695, %v2670_v28  ;;  %v6951_v57 = vld [vmem:[#allocation12_spill] sm:$0xff] }
 0x386   : > { %v4611_v12 = vpop.eup %4610  ;;  %v2867_v32 = vmul.f32 %v4609_v5, %v2789_v31  ;;  %v2671_v63 = vmin.f32 %v6505_v61, 20.0  ;;  %3142 = vmatprep.mubr.bf16.mxu0 %v2883_v0  ;;  %v2885_v59 = vpack.c.bf16 %v2865_v38, %v2863_v33  ;;  %v6518_v52 = vadd.f32 %v6363_v7, %v6340_v48  ;;  %v6949_v33 = vld [vmem:[#allocation10_spill] sm:$0xff] }
 0x387   : > { %v4613_v17 = vpop.eup %4612  ;;  %4628 = vrcp.f32 %v2821_v53  ;;  %v2744_v18 = vadd.f32 2.0, %v4611_v12  ;;  %3143 = vmatmul.mubr.bf16.gmra.mrb[88].mxu0 %v2882_v22  ;;  %v1872_v35 = vmul.f32 %v6126_v40, %v6230_v41  ;;  %v1881_v6 = vmul.f32 %v6120_v3, %v6343_v56  ;;  %v6952_v22 = vld [vmem:[#allocation13_spill] sm:$0xff] }
 0x388   : > { %v2868_v15 = vmul.f32 %v4613_v17, %v2790_v20  ;;  %4630 = vpow2.f32 %v2720_v47  ;;  %v2722_v30 = vmul.f32 1.442695, %v2671_v63  ;;  %3152 = vmatprep.mubr.bf16.mxu1 %v2885_v59  ;;  %v1882_v48 = vmul.f32 %v6126_v40, %v6346_v62 }
 0x389   : > { %v4615_v58 = vpop.eup %4614  ;;  %v6524_v31 = vmul.f32 %v4611_v12, %v2744_v18  ;;  %3153 = vmatmul.mubr.bf16.vlgmr.msra.gmra.mrb[56].mxu1 %v2884_v23  ;;  %v6527_v25 = vadd.f32 %v1872_v35, %v6370_v39  ;;  %v1875_v41 = vmul.f32 %v6120_v3, %v6273_v42  ;;  %v1876_v56 = vmul.f32 %v6126_v40, %v6284_v10 }
 0x38a   : > { %v4617_v7 = vpop.eup %4616  ;;  %v2869_v51 = vmul.f32 %v4615_v58, %v2791_v34  ;;  %4632 = vpow2.f32 %v2722_v30  ;;  %v2886_v29 = vpack.c.bf16 %v2868_v15, %v6511_v49  ;;  %v1846_v24 = vmul.f32 %v6373_v13, %v6318_v1  ;;  %v6948_v13 = vld [vmem:[#allocation9_spill] sm:$0xff] }
 0x38b   : > { %v4619_v45 = vpop.eup %4618  ;;  %v2792_v39 = vmul.f32 %v6482_v50, %v6417_v2  ;;  %v6540_v9 = vadd.f32 %v1882_v48, %v1881_v6  ;;  %v6542_v20 = vadd.f32 %v1876_v56, %v1875_v41  ;;  %v1885_v14 = vmul.f32 %v6120_v3, %v6394_v54 }
 0x38c   : > { %v4621_v62 = vpop.eup %4620  ;;  %v2745_v37 = vadd.f32 2.0, %v4619_v45  ;;  %v2887_v42 = vpack.c.bf16 %v2869_v51, %v2867_v32  ;;  %v2794_v10 = vmul.f32 %v2768_v27, %v6434_v11  ;;  %v2822_v23 = vadd.f32 2.0, %v6524_v31  ;;  %v6953_v51 = vld [vmem:[#allocation14_spill] sm:$0xff] }
 0x38d   : > { %v4623_v8 = vpop.eup %4622  ;;  %v1886_v1 = vmul.f32 %v6126_v40, %v6413_v26  ;;  %v1879_v2 = vmul.f32 %v6120_v3, %v6948_v13  ;;  %v1880_v38 = vmul.f32 %v6126_v40, %v6949_v33  ;;  %v1883_v54 = vmul.f32 %v6120_v3, %v6950_v55 }
 0x38e   : > { %v4625_v50 = vpop.eup %4624  ;;  %v2771_v44 = vmul.f32 %v4619_v45, %v2745_v37  ;;  %v2746_v19 = vadd.f32 2.0, %v4623_v8  ;;  %3162 = vmatprep.mubr.bf16.mxu1 %v2887_v42  ;;  %v2870_v11 = vmul.f32 %v4617_v7, %v2792_v39  ;;  %v1884_v26 = vmul.f32 %v6126_v40, %v1846_v24 }
 0x38f   : > { %v4627_v43 = vpop.eup %4626  ;;  %v2872_v27 = vmul.f32 %v4625_v50, %v2794_v10  ;;  %v6556_v28 = vadd.f32 %v1886_v1, %v1885_v14  ;;  %v2793_v0 = vmul.f32 %v6486_v4, %v6951_v57  ;;  %v2795_v5 = vmul.f32 %v6500_v36, %v6952_v22 }
 0x390   : > { %v2772_v49 = vmul.f32 %v4623_v8, %v2746_v19  ;;  %v2747_v34 = vadd.f32 2.0, %v4627_v43  ;;  %v2823_v12 = vadd.f32 2.0, %v2771_v44  ;;  %v6563_v3 = vadd.f32 %v1880_v38, %v1879_v2  ;;  %v6954_v38 = vld [vmem:[#allocation2_spill] sm:$0xff] }
 0x391   : > { %v4629_v53 = vpop.eup %4628  ;;  %3163 = vmatmul.mubr.bf16.gmra.mrb[60].mxu1 %v2886_v29  ;;  %v2888_v32 = vpack.c.bf16 %v2872_v27, %v2870_v11  ;;  %v6565_v47 = vadd.f32 %v1884_v26, %v1883_v54  ;;  %v2871_v59 = vmul.f32 %v4621_v62, %v2793_v0  ;;  %4634 = vrcp.f32 %v2822_v23  ;;  %v6955_v54 = vld [vmem:[#allocation3_spill] sm:$0xff] }
 0x392   : > { %v4631_v63 = vpop.eup %4630  ;;  %v2873_v17 = vmul.f32 %v4629_v53, %v2795_v5  ;;  %v2824_v40 = vadd.f32 2.0, %v2772_v49  ;;  %v2773_v18 = vmul.f32 %v4627_v43, %v2747_v34  ;;  %v2796_v29 = vmul.f32 %v6524_v31, %v6953_v51 }
 0x393   : > { %v2748_v4 = vadd.f32 2.0, %v4631_v63  ;;  %v2798_v56 = vmul.f32 %v2772_v49, %v6468_v60  ;;  %v2797_v37 = vmul.f32 %v2771_v44, %v6460_v46  ;;  %v3848_v44 = vld [vmem:[%s6923_s6 + $0x2] sm:$0x3] }
 0x394   : > { %v4633_v35 = vpop.eup %4632  ;;  %4636 = vrcp.f32 %v2824_v40  ;;  %v2889_v36 = vpack.c.bf16 %v2873_v17, %v2871_v59  ;;  %v2825_v15 = vadd.f32 2.0, %v2773_v18  ;;  %v2799_v42 = vmul.f32 %v2773_v18, %v6490_v21  ;;  %v6577_v21 = vld [vmem:[%s6925_s8] ss:$0 sm:$0xff] }
 0x395   : > { %4638 = vrcp.f32 %v2823_v12  ;;  %v2774_v30 = vmul.f32 %v4631_v63, %v2748_v4  ;;  %v2749_v6 = vadd.f32 2.0, %v4633_v35  ;;  %v6593_v55 = vrot.slane %v3848_v44, %v6954_v38 }
 0x396   : > { %3172 = vmatprep.mubr.bf16.mxu1 %v2889_v36  ;;  %4640 = vrcp.f32 %v2825_v15  ;;  %v6596_v43 = vrot.slane %v3848_v44, %v6955_v54 }
 0x397   : > { %v2775_v58 = vmul.f32 %v4633_v35, %v2749_v6  ;;  %v2826_v48 = vadd.f32 2.0, %v2774_v30  ;;  %v2800_v50 = vmul.f32 %v2774_v30, %v6493_v16 }
 0x399   : > { %v2827_v41 = vadd.f32 2.0, %v2775_v58  ;;  %3173 = vmatmul.mubr.bf16.gmra.mrb[64].mxu1 %v2888_v32  ;;  %v2801_v1 = vmul.f32 %v2775_v58, %v6505_v61 }
 0x39b   : > { %4642 = vrcp.f32 %v2827_v41  ;;  %v4635_v7 = vpop.eup %4634 }
 0x39c   : > { %4644 = vrcp.f32 %v2826_v48  ;;  %v2874_v39 = vmul.f32 %v4635_v7, %v2796_v29 }
 0x39e   : > { %v4637_v45 = vpop.eup %4636 }
 0x39f   : > { %v4639_v24 = vpop.eup %4638  ;;  %v2876_v62 = vmul.f32 %v4637_v45, %v2798_v56 }
 0x3a0   : > { %v4641_v14 = vpop.eup %4640  ;;  %v2875_v10 = vmul.f32 %v4639_v24, %v2797_v37 }
 0x3a1   : > { %v2890_v8 = vpack.c.bf16 %v2876_v62, %v2874_v39  ;;  %v2877_v23 = vmul.f32 %v4641_v14, %v2799_v42 }
 0x3a3   : > { %v2891_v13 = vpack.c.bf16 %v2877_v23, %v2875_v10 }
 0x3a5   : > { %v4643_v2 = vpop.eup %4642  ;;  %3182 = vmatprep.mubr.bf16.mxu1 %v2891_v13 }
 0x3a6   : > { %v4645_v31 = vpop.eup %4644  ;;  %v2879_v60 = vmul.f32 %v4643_v2, %v2801_v1  ;;  %3183 = vmatmul.mubr.bf16.gmra.mrb[68].mxu1 %v2890_v8 }
 0x3a7   : > { %v2878_v33 = vmul.f32 %v4645_v31, %v2800_v50 }
 0x3a8   : > { %v2893_v19 = vpack.c.bf16 %v2879_v60, %v2879_v60 }
 0x3a9   : > { %v2892_v46 = vpack.c.bf16 %v2878_v33, %v2878_v33  ;;  %v3881_v33 = vld [vmem:[%s6924_s7 + $0x2] sm:$0x3] }
 0x3aa   : > { %3192 = vmatprep.mubr.bf16.mxu1 %v2893_v19 }
 0x3ae   : > { %3193 = vmatmul.mubr.bf16.gmra.mrb[72].mxu1 %v2892_v46 }
 0x3c2   : > { %v1889_v16 = vpop.xlane.xlu1 %1888 }
 0x3c3   : > { %v1933_v61 = vadd.f32 %v6577_v21, %v1889_v16 }
 0x3c5   : > { %1947 = vst.msk [vmem:[%s6584_s25] sm:$0xff] %vm1946_vm2, %v1933_v61 }
 0x44f   : > { %v3134_v11 = vpop.f32.mrb[84].mxu0 }
 0x450   : > { %v3135_v27 = vadd.f32 %v3134_v11, %v6593_v55  ;;  %v3136_v26 = vpop.f32.mrb[85].mxu0 }
 0x451   : > { %v6600_v57 = vadd.f32 %v3136_v26, %v6596_v43  ;;  %v3138_v0 = vpop.f32.mrb[86].mxu0 }
 0x452   : > { %v3201_v22 = vmin.f32 %v3135_v27, 20.0  ;;  %v6603_v5 = vadd.f32 %v3138_v0, %v6593_v55  ;;  %v3140_v49 = vpop.f32.mrb[87].mxu0  ;;  %v6641_v0 = vrot.slane %v3881_v33, %v6954_v38 }
 0x453   : > { %v3202_v34 = vmin.f32 %v6600_v57, 20.0  ;;  %v6607_v53 = vadd.f32 %v3140_v49, %v6596_v43 }
 0x454   : > { %v3227_v12 = vmul.f32 1.442695, %v3201_v22  ;;  %v3203_v32 = vmin.f32 %v6603_v5, 20.0 }
 0x455   : > { %v3229_v63 = vmul.f32 1.442695, %v3202_v34  ;;  %v3204_v59 = vmin.f32 %v6607_v53, 20.0 }
 0x456   : > { %4646 = vpow2.f32 %v3227_v12  ;;  %v3231_v17 = vmul.f32 1.442695, %v3203_v32  ;;  %v6646_v32 = vrot.slane %v3881_v33, %v6955_v54 }
 0x457   : > { %4648 = vpow2.f32 %v3229_v63  ;;  %v3233_v40 = vmul.f32 1.442695, %v3204_v59 }
 0x458   : > { %4650 = vpow2.f32 %v3231_v17 }
 0x459   : > { %4652 = vpow2.f32 %v3233_v40 }
 0x45a   : > { %v3144_v18 = vpop.f32.mrb[88].mxu0 }
 0x45b   : > { %v6612_v4 = vadd.f32 %v3144_v18, %v6593_v55  ;;  %v3146_v35 = vpop.f32.mrb[89].mxu0 }
 0x45c   : > { %v6615_v36 = vadd.f32 %v3146_v35, %v6596_v43  ;;  %v3148_v15 = vpop.f32.mrb[90].mxu0  ;;  %v3154_v30 = vpop.f32.mrb[56].mxu1 }
 0x45d   : > { %v3205_v6 = vmin.f32 %v6612_v4, 20.0  ;;  %v6619_v58 = vadd.f32 %v3148_v15, %v6593_v55  ;;  %v3150_v48 = vpop.f32.mrb[91].mxu0  ;;  %v6622_v41 = vadd.f32 %v3154_v30, %v6593_v55  ;;  %v3156_v7 = vpop.f32.mrb[57].mxu1 }
 0x45e   : > { %v3206_v29 = vmin.f32 %v6615_v36, 20.0  ;;  %v6626_v56 = vadd.f32 %v3150_v48, %v6596_v43  ;;  %v6629_v45 = vadd.f32 %v3156_v7, %v6596_v43  ;;  %v3158_v24 = vpop.f32.mrb[58].mxu1 }
 0x45f   : > { %v3235_v37 = vmul.f32 1.442695, %v3205_v6  ;;  %v3207_v42 = vmin.f32 %v6619_v58, 20.0  ;;  %v3209_v14 = vmin.f32 %v6622_v41, 20.0  ;;  %v3160_v8 = vpop.f32.mrb[59].mxu1  ;;  %v6653_v38 = vadd.f32 %v3158_v24, %v6593_v55 }
 0x460   : > { %v4647_v51 = vpop.eup %4646  ;;  %v3237_v1 = vmul.f32 1.442695, %v3206_v29  ;;  %v3208_v13 = vmin.f32 %v6626_v56, 20.0  ;;  %v3210_v2 = vmin.f32 %v6629_v45, 20.0 }
 0x461   : > { %v4649_v39 = vpop.eup %4648  ;;  %v3279_v62 = vadd.f32 2.0, %v4647_v51  ;;  %4654 = vpow2.f32 %v3235_v37  ;;  %v3239_v19 = vmul.f32 1.442695, %v3207_v42  ;;  %v3243_v34 = vmul.f32 1.442695, %v3209_v14 }
 0x462   : > { %v4651_v10 = vpop.eup %4650  ;;  %v3280_v23 = vadd.f32 2.0, %v4649_v39  ;;  %4656 = vpow2.f32 %v3237_v1  ;;  %v3241_v61 = vmul.f32 1.442695, %v3208_v13  ;;  %v3245_v40 = vmul.f32 1.442695, %v3210_v2 }
 0x463   : > { %v4653_v31 = vpop.eup %4652  ;;  %v3305_v60 = vmul.f32 %v4647_v51, %v3279_v62  ;;  %v3281_v50 = vadd.f32 2.0, %v4651_v10  ;;  %4658 = vpow2.f32 %v3239_v19  ;;  %v3211_v6 = vmin.f32 %v6653_v38, 20.0 }
 0x464   : > { %v3306_v46 = vmul.f32 %v4649_v39, %v3280_v23  ;;  %v3282_v16 = vadd.f32 2.0, %v4653_v31  ;;  %4660 = vpow2.f32 %v3241_v61  ;;  %v3164_v26 = vpop.f32.mrb[60].mxu1 }
 0x465   : > { %v3307_v44 = vmul.f32 %v4651_v10, %v3281_v50  ;;  %v6643_v22 = vmul.f32 %v3305_v60, %v3135_v27  ;;  %v3166_v12 = vpop.f32.mrb[61].mxu1  ;;  %v3357_v63 = vadd.f32 2.0, %v3305_v60  ;;  %v6656_v27 = vadd.f32 %v3160_v8, %v6596_v43 }
 0x466   : > { %v6638_v11 = vmul.f32 %v4653_v31, %v3282_v16  ;;  %v6649_v59 = vmul.f32 %v3306_v46, %v6600_v57  ;;  %v3168_v18 = vpop.f32.mrb[62].mxu1  ;;  %v6659_v35 = vadd.f32 %v3164_v26, %v6593_v55  ;;  %v3358_v15 = vadd.f32 2.0, %v3306_v46 }
 0x467   : > { %v3359_v49 = vadd.f32 2.0, %v3307_v44  ;;  %v3170_v54 = vpop.f32.mrb[63].mxu1  ;;  %v6662_v57 = vadd.f32 %v3166_v12, %v6596_v43  ;;  %v6665_v30 = vadd.f32 %v3168_v18, %v6593_v55  ;;  %v3212_v48 = vmin.f32 %v6656_v27, 20.0 }
 0x468   : > { %v3360_v17 = vadd.f32 2.0, %v6638_v11  ;;  %v3213_v7 = vmin.f32 %v6659_v35, 20.0  ;;  %v6673_v24 = vadd.f32 %v3170_v54, %v6596_v43  ;;  %v3247_v62 = vmul.f32 1.442695, %v3211_v6 }
 0x469   : > { %4662 = vrcp.f32 %v3359_v49  ;;  %v3214_v51 = vmin.f32 %v6662_v57, 20.0  ;;  %v3215_v29 = vmin.f32 %v6665_v30, 20.0  ;;  %v3249_v37 = vmul.f32 1.442695, %v3212_v48 }
 0x46a   : > { %4664 = vrcp.f32 %v3360_v17  ;;  %v3251_v42 = vmul.f32 1.442695, %v3213_v7  ;;  %v3333_v8 = vmul.f32 %v3307_v44, %v6603_v5  ;;  %v3216_v16 = vmin.f32 %v6673_v24, 20.0 }
 0x46b   : > { %4666 = vpow2.f32 %v3243_v34  ;;  %v4655_v39 = vpop.eup %4654  ;;  %v3253_v23 = vmul.f32 1.442695, %v3214_v51  ;;  %v3255_v31 = vmul.f32 1.442695, %v3215_v29 }
 0x46c   : > { %4668 = vpow2.f32 %v3245_v40  ;;  %v4657_v14 = vpop.eup %4656  ;;  %v3283_v10 = vadd.f32 2.0, %v4655_v39  ;;  %v3174_v1 = vpop.f32.mrb[64].mxu1  ;;  %v3334_v40 = vmul.f32 %v6638_v11, %v6607_v53  ;;  %v3257_v7 = vmul.f32 1.442695, %v3216_v16 }
 0x46d   : > { %4670 = vrcp.f32 %v3357_v63  ;;  %v4659_v13 = vpop.eup %4658  ;;  %v3284_v2 = vadd.f32 2.0, %v4657_v14  ;;  %v6677_v60 = vadd.f32 %v3174_v1, %v6593_v55  ;;  %v3176_v50 = vpop.f32.mrb[65].mxu1 }
 0x46e   : > { %4672 = vrcp.f32 %v3358_v15  ;;  %v4661_v19 = vpop.eup %4660  ;;  %v3309_v33 = vmul.f32 %v4655_v39, %v3283_v10  ;;  %v3285_v46 = vadd.f32 2.0, %v4659_v13  ;;  %v3178_v61 = vpop.f32.mrb[66].mxu1  ;;  %v6681_v44 = vadd.f32 %v3176_v50, %v6596_v43 }
 0x46f   : > { %4674 = vpow2.f32 %v3247_v62  ;;  %v3310_v26 = vmul.f32 %v4657_v14, %v3284_v2  ;;  %v3286_v5 = vadd.f32 2.0, %v4661_v19  ;;  %v3180_v49 = vpop.f32.mrb[67].mxu1  ;;  %v3217_v63 = vmin.f32 %v6677_v60, 20.0 }
 0x470   : > { %4676 = vpow2.f32 %v3249_v37  ;;  %v3361_v34 = vadd.f32 2.0, %v3309_v33  ;;  %v3311_v12 = vmul.f32 %v4659_v13, %v3285_v46  ;;  %v6687_v6 = vmul.f32 %v3309_v33, %v6612_v4 }
 0x471   : > { %4678 = vpow2.f32 %v3251_v42  ;;  %v3362_v18 = vadd.f32 2.0, %v3310_v26  ;;  %v3312_v54 = vmul.f32 %v4661_v19, %v3286_v5  ;;  %v6692_v39 = vmul.f32 %v3310_v26, %v6615_v36 }
 0x472   : > { %4680 = vpow2.f32 %v3253_v23  ;;  %v3363_v48 = vadd.f32 2.0, %v3311_v12  ;;  %v3259_v11 = vmul.f32 1.442695, %v3217_v63  ;;  %v3218_v42 = vmin.f32 %v6681_v44, 20.0 }
 0x473   : > { %v4663_v17 = vpop.eup %4662  ;;  %4682 = vpow2.f32 %v3255_v31  ;;  %v3364_v62 = vadd.f32 2.0, %v3312_v54  ;;  %v6696_v10 = vadd.f32 %v3178_v61, %v6593_v55  ;;  %v3337_v36 = vmul.f32 %v3311_v12, %v6619_v58 }
 0x474   : > { %v4665_v15 = vpop.eup %4664  ;;  %4684 = vrcp.f32 %v3361_v34  ;;  %v6689_v29 = vmul.f32 %v4663_v17, %v3333_v8  ;;  %v6699_v8 = vadd.f32 %v3180_v49, %v6596_v43  ;;  %v3261_v13 = vmul.f32 1.442695, %v3218_v42 }
 0x475   : > { %v4667_v51 = vpop.eup %4666  ;;  %4686 = vrcp.f32 %v3362_v18  ;;  %v6704_v31 = vmul.f32 %v4665_v15, %v3334_v40  ;;  %v6707_v50 = vmul.f32 %v3312_v54, %v6626_v56  ;;  %v3219_v49 = vmin.f32 %v6696_v10, 20.0 }
 0x476   : > { %v4669_v37 = vpop.eup %4668  ;;  %4688 = vrcp.f32 %v3363_v48  ;;  %v3287_v53 = vadd.f32 2.0, %v4667_v51  ;;  %v3220_v34 = vmin.f32 %v6699_v8, 20.0 }
 0x477   : > { %v4671_v14 = vpop.eup %4670  ;;  %4690 = vrcp.f32 %v3364_v62  ;;  %v3288_v4 = vadd.f32 2.0, %v4669_v37 }
 0x478   : > { %v6701_v23 = vpop.eup %4672  ;;  %v3313_v1 = vmul.f32 %v4667_v51, %v3287_v53  ;;  %4692 = vpow2.f32 %v3257_v7  ;;  %v6710_v61 = vmul.f32 %v4671_v14, %v6643_v22 }
 0x479   : > { %v4675_v2 = vpop.eup %4674  ;;  %v3314_v19 = vmul.f32 %v4669_v37, %v3288_v4  ;;  %4694 = vpow2.f32 %v3259_v11  ;;  %v3184_v40 = vpop.f32.mrb[68].mxu1  ;;  %v3263_v4 = vmul.f32 1.442695, %v3219_v49 }
 0x47a   : > { %v4677_v33 = vpop.eup %4676  ;;  %v3365_v46 = vadd.f32 2.0, %v3313_v1  ;;  %v3289_v16 = vadd.f32 2.0, %v4675_v2  ;;  %4696 = vpow2.f32 %v3261_v13  ;;  %v6715_v56 = vmul.f32 %v3313_v1, %v6622_v41  ;;  %v3186_v48 = vpop.f32.mrb[69].mxu1 }
 0x47b   : > { %v4679_v26 = vpop.eup %4678  ;;  %v3366_v58 = vadd.f32 2.0, %v3314_v19  ;;  %v3290_v5 = vadd.f32 2.0, %v4677_v33  ;;  %v6718_v54 = vmul.f32 %v3314_v19, %v6629_v45  ;;  %v6721_v53 = vadd.f32 %v3184_v40, %v6593_v55  ;;  %v3188_v41 = vpop.f32.mrb[70].mxu1 }
 0x47c   : > { %v4681_v12 = vpop.eup %4680  ;;  %4698 = vrcp.f32 %v3365_v46  ;;  %v3315_v63 = vmul.f32 %v4675_v2, %v3289_v16  ;;  %v3291_v17 = vadd.f32 2.0, %v4679_v26  ;;  %v3265_v1 = vmul.f32 1.442695, %v3220_v34  ;;  %v3190_v13 = vpop.f32.mrb[71].mxu1 }
 0x47d   : > { %v4683_v18 = vpop.eup %4682  ;;  %4700 = vrcp.f32 %v3366_v58  ;;  %v3316_v22 = vmul.f32 %v4677_v33, %v3290_v5  ;;  %v3292_v15 = vadd.f32 2.0, %v4681_v12 }
 0x47e   : > { %v4685_v7 = vpop.eup %4684  ;;  %v3367_v51 = vadd.f32 2.0, %v3315_v63  ;;  %v3317_v62 = vmul.f32 %v4679_v26, %v3291_v17  ;;  %v3293_v37 = vadd.f32 2.0, %v4683_v18  ;;  %v6727_v19 = vmul.f32 %v3315_v63, %v6653_v38 }
 0x47f   : > { %v4687_v11 = vpop.eup %4686  ;;  %v3368_v42 = vadd.f32 2.0, %v3316_v22  ;;  %v3318_v14 = vmul.f32 %v4681_v12, %v3292_v15  ;;  %v6724_v2 = vmul.f32 %v4685_v7, %v6687_v6  ;;  %v6730_v33 = vmul.f32 %v3316_v22, %v6656_v27 }
 0x480   : > { %v4689_v45 = vpop.eup %4688  ;;  %v3369_v46 = vadd.f32 2.0, %v3317_v62  ;;  %v6733_v26 = vmul.f32 %v4687_v11, %v6692_v39  ;;  %4702 = vrcp.f32 %v3367_v51  ;;  %v6738_v5 = vmul.f32 %v3317_v62, %v6659_v35 }
 0x481   : > { %v4691_v16 = vpop.eup %4690  ;;  %v6735_v58 = vmul.f32 %v4689_v45, %v3337_v36  ;;  %4704 = vrcp.f32 %v3368_v42  ;;  %v3370_v6 = vadd.f32 2.0, %v3318_v14  ;;  %v3319_v34 = vmul.f32 %v4683_v18, %v3293_v37  ;;  %v3194_v22 = vpop.f32.mrb[72].mxu1 }
 0x482   : > { %v4693_v49 = vpop.eup %4692  ;;  %v3221_v38 = vmin.f32 %v6721_v53, 20.0  ;;  %4706 = vrcp.f32 %v3369_v46  ;;  %v6742_v63 = vadd.f32 %v3186_v48, %v6596_v43  ;;  %v6745_v39 = vadd.f32 %v3188_v41, %v6593_v55  ;;  %v3196_v51 = vpop.f32.mrb[73].mxu1 }
 0x483   : > { %v4695_v12 = vpop.eup %4694  ;;  %v3294_v27 = vadd.f32 2.0, %v4693_v49  ;;  %v6748_v17 = vmul.f32 %v3318_v14, %v6662_v57  ;;  %v3371_v35 = vadd.f32 2.0, %v3319_v34  ;;  %4708 = vpow2.f32 %v3263_v4  ;;  %v3198_v11 = vpop.f32.mrb[74].mxu1 }
 0x484   : > { %v4697_v36 = vpop.eup %4696  ;;  %v3295_v40 = vadd.f32 2.0, %v4695_v12  ;;  %4710 = vpow2.f32 %v3265_v1  ;;  %v3267_v7 = vmul.f32 1.442695, %v3221_v38  ;;  %v3222_v37 = vmin.f32 %v6742_v63, 20.0  ;;  %v3199_v45 = vpop.f32.mrb[75].mxu1 }
 0x485   : > { %v3320_v18 = vmul.f32 %v4693_v49, %v3294_v27  ;;  %v3296_v15 = vadd.f32 2.0, %v4697_v36  ;;  %4712 = vrcp.f32 %v3370_v6  ;;  %v3223_v41 = vmin.f32 %v6745_v39, 20.0 }
 0x486   : > { %v4699_v62 = vpop.eup %4698  ;;  %v3321_v48 = vmul.f32 %v4695_v12, %v3295_v40  ;;  %v3416_v57 = vmul.f32 %v4691_v16, %v6707_v50  ;;  %4714 = vrcp.f32 %v3371_v35  ;;  %v3345_v1 = vmul.f32 %v3319_v34, %v6665_v30 }
 0x487   : > { %v4701_v42 = vpop.eup %4700  ;;  %v3372_v14 = vadd.f32 2.0, %v3320_v18  ;;  %v3322_v4 = vmul.f32 %v4697_v36, %v3296_v15  ;;  %v6754_v46 = vmul.f32 %v4699_v62, %v6715_v56  ;;  %4716 = vpow2.f32 %v3267_v7 }
 0x488   : > { %v3373_v49 = vadd.f32 2.0, %v3321_v48  ;;  %v3346_v6 = vmul.f32 %v3320_v18, %v6673_v24  ;;  %v3269_v12 = vmul.f32 1.442695, %v3222_v37  ;;  %v3271_v27 = vmul.f32 1.442695, %v3223_v41 }
 0x489   : > { %4718 = vrcp.f32 %v3372_v14  ;;  %v3374_v38 = vadd.f32 2.0, %v3322_v4  ;;  %v3410_v50 = vmul.f32 %v6701_v23, %v6649_v59  ;;  %v3448_v16 = vmul.f32 %v6641_v0, %v6710_v61 }
 0x48a   : > { %4720 = vrcp.f32 %v3373_v49  ;;  %v4703_v36 = vpop.eup %4702  ;;  %v3418_v56 = vmul.f32 %v4701_v42, %v6718_v54  ;;  %v6764_v30 = vadd.f32 %v3190_v13, %v6596_v43  ;;  %v3450_v24 = vmul.f32 %v6641_v0, %v6689_v29 }
 0x48b   : > { %4722 = vrcp.f32 %v3374_v38  ;;  %v4705_v34 = vpop.eup %4704  ;;  %v3347_v35 = vmul.f32 %v3321_v48, %v6677_v60  ;;  %v3449_v40 = vmul.f32 %v6646_v32, %v3410_v50  ;;  %v3451_v59 = vmul.f32 %v6646_v32, %v6704_v31 }
 0x48c   : > { %4724 = vpow2.f32 %v3269_v12  ;;  %v4707_v23 = vpop.eup %4706  ;;  %v3348_v61 = vmul.f32 %v3322_v4, %v6681_v44  ;;  %v3224_v54 = vmin.f32 %v6764_v30, 20.0  ;;  %v6775_v13 = vadd.f32 %v3194_v22, %v6593_v55 }
 0x48d   : > { %4726 = vpow2.f32 %v3271_v27  ;;  %v4709_v18 = vpop.eup %4708  ;;  %v3419_v29 = vmul.f32 %v4703_v36, %v6727_v19  ;;  %v3474_v15 = vadd.f32 %v3449_v40, %v3448_v16  ;;  %v3477_v60 = vadd.f32 %v3451_v59, %v3450_v24 }
 0x48e   : > { %v6779_v7 = vadd.f32 %v3196_v51, %v6596_v43  ;;  %v4711_v62 = vpop.eup %4710  ;;  %v3297_v48 = vadd.f32 2.0, %v4709_v18  ;;  %v3273_v31 = vmul.f32 1.442695, %v3224_v54  ;;  %v3225_v37 = vmin.f32 %v6775_v13, 20.0 }
 0x48f   : > { %v3452_v44 = vmul.f32 %v6641_v0, %v6724_v2  ;;  %v4713_v41 = vpop.eup %4712  ;;  %v3420_v55 = vmul.f32 %v4705_v34, %v6730_v33  ;;  %v3298_v22 = vadd.f32 2.0, %v4711_v62  ;;  %3475 = vadd.xlane.f32.xlu0 %v3474_v15  ;;  %v3453_v11 = vmul.f32 %v6646_v32, %v6733_v26 }
 0x490   : > { %v3226_v19 = vmin.f32 %v6779_v7, 20.0  ;;  %v4715_v43 = vpop.eup %4714  ;;  %v3323_v51 = vmul.f32 %v4709_v18, %v3297_v48  ;;  %4728 = vpow2.f32 %v3273_v31  ;;  %v3275_v42 = vmul.f32 1.442695, %v3225_v37 }
 0x491   : > { %v3454_v14 = vmul.f32 %v6641_v0, %v6735_v58  ;;  %v4717_v4 = vpop.eup %4716  ;;  %v6790_v45 = vmul.f32 %v4711_v62, %v3298_v22  ;;  %v3480_v49 = vadd.f32 %v3453_v11, %v3452_v44  ;;  %v3455_v33 = vmul.f32 %v6646_v32, %v3416_v57 }
 0x492   : > { %v3277_v2 = vmul.f32 1.442695, %v3226_v19  ;;  %v3421_v12 = vmul.f32 %v4707_v23, %v6738_v5  ;;  %v3375_v27 = vadd.f32 2.0, %v3323_v51  ;;  %v3299_v50 = vadd.f32 2.0, %v4717_v4 }
 0x493   : > { %v4719_v38 = vpop.eup %4718  ;;  %4730 = vpow2.f32 %v3275_v42  ;;  %v3422_v16 = vmul.f32 %v4713_v41, %v6748_v17  ;;  %v3423_v36 = vmul.f32 %v4715_v43, %v3345_v1  ;;  %v3376_v24 = vadd.f32 2.0, %v6790_v45  ;;  %3478 = vadd.xlane.f32.xlu0 %v3477_v60  ;;  %3481 = vadd.xlane.f32.xlu1 %v3480_v49 }
 0x494   : > { %v4721_v26 = vpop.eup %4720  ;;  %4732 = vpow2.f32 %v3277_v2  ;;  %v3424_v34 = vmul.f32 %v4719_v38, %v3346_v6  ;;  %v3325_v40 = vmul.f32 %v4717_v4, %v3299_v50  ;;  %v3483_v57 = vadd.f32 %v3455_v33, %v3454_v14 }
 0x495   : > { %v4723_v58 = vpop.eup %4722  ;;  %4734 = vrcp.f32 %v3375_v27  ;;  %v3425_v54 = vmul.f32 %v4721_v26, %v3347_v35  ;;  %v3456_v5 = vmul.f32 %v6641_v0, %v6754_v46  ;;  %v3457_v23 = vmul.f32 %v6646_v32, %v3418_v56 }
 0x496   : > { %v4725_v59 = vpop.eup %4724  ;;  %4736 = vrcp.f32 %v3376_v24  ;;  %v3426_v1 = vmul.f32 %v4723_v58, %v3348_v61  ;;  %v3377_v18 = vadd.f32 2.0, %v3325_v40  ;;  %v3458_v60 = vmul.f32 %v6641_v0, %v3419_v29 }
 0x497   : > { %v4727_v17 = vpop.eup %4726  ;;  %v3300_v15 = vadd.f32 2.0, %v4725_v59  ;;  %3484 = vadd.xlane.f32.xlu1 %v3483_v57  ;;  %v3486_v6 = vadd.f32 %v3457_v23, %v3456_v5  ;;  %v3459_v48 = vmul.f32 %v6646_v32, %v3420_v55  ;;  %v3460_v31 = vmul.f32 %v6641_v0, %v3421_v12 }
 0x498   : > { %v3301_v62 = vadd.f32 2.0, %v4727_v17  ;;  %4738 = vrcp.f32 %v3377_v18  ;;  %v3461_v37 = vmul.f32 %v6646_v32, %v3422_v16  ;;  %v3462_v46 = vmul.f32 %v6641_v0, %v3423_v36 }
 0x499   : > { %v3326_v35 = vmul.f32 %v4725_v59, %v3300_v15  ;;  %3487 = vadd.xlane.f32.xlu0 %v3486_v6  ;;  %v3489_v61 = vadd.f32 %v3459_v48, %v3458_v60  ;;  %v3463_v44 = vmul.f32 %v6646_v32, %v3424_v34  ;;  %v3464_v29 = vmul.f32 %v6641_v0, %v3425_v54 }
 0x49a   : > { %v3327_v56 = vmul.f32 %v4727_v17, %v3301_v62  ;;  %v4729_v41 = vpop.eup %4728  ;;  %v3492_v19 = vadd.f32 %v3461_v37, %v3460_v31  ;;  %v3465_v55 = vmul.f32 %v6646_v32, %v3426_v1  ;;  %v3349_v49 = vmul.f32 %v3323_v51, %v6696_v10 }
 0x49b   : > { %v3378_v22 = vadd.f32 2.0, %v3326_v35  ;;  %v3302_v43 = vadd.f32 2.0, %v4729_v41  ;;  %3490 = vadd.xlane.f32.xlu1 %v3489_v61  ;;  %v3495_v42 = vadd.f32 %v3463_v44, %v3462_v46  ;;  %v3350_v27 = vmul.f32 %v6790_v45, %v6699_v8 }
 0x49c   : > { %v3379_v11 = vadd.f32 2.0, %v3327_v56  ;;  %v3498_v4 = vadd.f32 %v3465_v55, %v3464_v29  ;;  %v3351_v57 = vmul.f32 %v3325_v40, %v6721_v53  ;;  %v3352_v23 = vmul.f32 %v3326_v35, %v6742_v63  ;;  %v6958_v55 = vld [vmem:[#allocation5_spill] sm:$0xff] }
 0x49d   : > { %v4731_v14 = vpop.eup %4730  ;;  %4740 = vrcp.f32 %v3378_v22  ;;  %v3328_v33 = vmul.f32 %v4729_v41, %v3302_v43  ;;  %3493 = vadd.xlane.f32.xlu0 %v3492_v19  ;;  %v3353_v1 = vmul.f32 %v3327_v56, %v6745_v39  ;;  %v6957_v19 = vld [vmem:[#allocation6_spill] sm:$0xff] }
 0x49e   : > { %v4733_v2 = vpop.eup %4732  ;;  %4742 = vrcp.f32 %v3379_v11  ;;  %v3303_v38 = vadd.f32 2.0, %v4731_v14  ;;  %v6960_v11 = vld [vmem:[#allocation7_spill] sm:$0xff] }
 0x49f   : > { %v4735_v12 = vpop.eup %4734  ;;  %v3304_v50 = vadd.f32 2.0, %v4733_v2  ;;  %v3380_v36 = vadd.f32 2.0, %v3328_v33  ;;  %3496 = vadd.xlane.f32.xlu1 %v3495_v42  ;;  %v3354_v62 = vmul.f32 %v3328_v33, %v6764_v30 }
 0x4a0   : > { %v4737_v26 = vpop.eup %4736  ;;  %v3427_v16 = vmul.f32 %v4735_v12, %v3349_v49  ;;  %v3329_v24 = vmul.f32 %v4731_v14, %v3303_v38 }
 0x4a1   : > { %v3428_v58 = vmul.f32 %v4737_v26, %v3350_v27  ;;  %v3330_v34 = vmul.f32 %v4733_v2, %v3304_v50  ;;  %4744 = vrcp.f32 %v3380_v36  ;;  %3499 = vadd.xlane.f32.xlu0 %v3498_v4 }
 0x4a2   : > { %v3381_v10 = vadd.f32 2.0, %v3329_v24  ;;  %v3466_v51 = vmul.f32 %v6641_v0, %v3427_v16  ;;  %v4739_v59 = vpop.eup %4738  ;;  %v3355_v37 = vmul.f32 %v3329_v24, %v6775_v13  ;;  %v6956_v13 = vld [vmem:[#allocation4_spill] sm:$0xff] }
 0x4a3   : > { %v3382_v54 = vadd.f32 2.0, %v3330_v34  ;;  %v3467_v5 = vmul.f32 %v6646_v32, %v3428_v58  ;;  %v3429_v8 = vmul.f32 %v4739_v59, %v3351_v57  ;;  %v3356_v39 = vmul.f32 %v3330_v34, %v6779_v7  ;;  %v6959_v7 = vld [vmem:[#allocation8_spill] sm:$0xff] }
 0x4a4   : > { %4746 = vrcp.f32 %v3381_v10 }
 0x4a5   : > { %4748 = vrcp.f32 %v3382_v54  ;;  %v3501_v45 = vadd.f32 %v3467_v5, %v3466_v51  ;;  %v3468_v18 = vmul.f32 %v6641_v0, %v3429_v8 }
 0x4a7   : > { %v4741_v17 = vpop.eup %4740  ;;  %3502 = vadd.xlane.f32.xlu1 %v3501_v45 }
 0x4a8   : > { %v4743_v53 = vpop.eup %4742  ;;  %v3430_v40 = vmul.f32 %v4741_v17, %v3352_v23 }
 0x4a9   : > { %v3431_v15 = vmul.f32 %v4743_v53, %v3353_v1 }
 0x4aa   : > { %v3469_v60 = vmul.f32 %v6646_v32, %v3430_v40 }
 0x4ab   : > { %v4745_v6 = vpop.eup %4744  ;;  %v3470_v63 = vmul.f32 %v6641_v0, %v3431_v15 }
 0x4ac   : > { %v3504_v48 = vadd.f32 %v3469_v60, %v3468_v18  ;;  %v3432_v31 = vmul.f32 %v4745_v6, %v3354_v62 }
 0x4ae   : > { %v4747_v35 = vpop.eup %4746  ;;  %3505 = vadd.xlane.f32.xlu0 %v3504_v48  ;;  %v3471_v61 = vmul.f32 %v6646_v32, %v3432_v31 }
 0x4af   : > { %v4749_v46 = vpop.eup %4748  ;;  %v3433_v56 = vmul.f32 %v4747_v35, %v3355_v37 }
 0x4b0   : > { %v3434_v44 = vmul.f32 %v4749_v46, %v3356_v39  ;;  %v3507_v29 = vadd.f32 %v3471_v61, %v3470_v63 }
 0x4b1   : > { %v3472_v41 = vmul.f32 %v6641_v0, %v3433_v56  ;;  %v3883_v0 = vld [vmem:[%s6925_s8 + $0x1] ss:$0 sm:$0xff] }
 0x4b2   : > { %v3473_v30 = vmul.f32 %v6646_v32, %v3434_v44  ;;  %3508 = vadd.xlane.f32.xlu1 %v3507_v29 }
 0x4b4   : > { %v3510_v22 = vadd.f32 %v3473_v30, %v3472_v41 }
 0x4b6   : > { %3511 = vadd.xlane.f32.xlu0 %v3510_v22  ;;  %1894 = vadd.xlane.f32.xlu1 %v6956_v13 }
 0x4ba   : > { %1891 = vadd.xlane.f32.xlu0 %v6957_v19  ;;  %1900 = vadd.xlane.f32.xlu1 %v6958_v55 }
 0x4be   : > { %1897 = vadd.xlane.f32.xlu0 %v6959_v7  ;;  %1906 = vadd.xlane.f32.xlu1 %v6960_v11 }
 0x4c2   : > { %1903 = vadd.xlane.f32.xlu0 %v6527_v25  ;;  %1912 = vadd.xlane.f32.xlu1 %v6518_v52 }
 0x4c6   : > { %1909 = vadd.xlane.f32.xlu0 %v6542_v20  ;;  %1918 = vadd.xlane.f32.xlu1 %v6540_v9 }
 0x4ca   : > { %1915 = vadd.xlane.f32.xlu0 %v6563_v3  ;;  %1924 = vadd.xlane.f32.xlu1 %v6556_v28 }
 0x4ce   : > { %1921 = vadd.xlane.f32.xlu0 %v6565_v47 }
 0x51c   : > { %v3476_v32 = vpop.xlane.xlu0 %3475 }
 0x51d   : > { %v3521_v43 = vadd.f32 %v3883_v0, %v3476_v32 }
 0x51f   : > { %3547 = vrot.lane.b32.xlu0 %v3521_v43, %s4759_s11 }
 0x520   : > { %v3479_v52 = vpop.xlane.xlu0 %3478  ;;  %v3482_v25 = vpop.xlane.xlu1 %3481 }
 0x521   : > { %v3522_v20 = vadd.f32 %v3883_v0, %v3479_v52  ;;  %v3523_v9 = vadd.f32 %v3883_v0, %v3482_v25 }
 0x523   : > { %3549 = vrot.lane.b32.xlu1 %v3522_v20, %s4759_s11 }
 0x524   : > { %v3485_v3 = vpop.xlane.xlu1 %3484 }
 0x525   : > { %v3524_v28 = vadd.f32 %v3883_v0, %v3485_v3 }
 0x526   : > { %v3488_v42 = vpop.xlane.xlu0 %3487 }
 0x527   : > { %3551 = vrot.lane.b32.xlu1 %v3523_v9, %s4759_s11  ;;  %v3525_v47 = vadd.f32 %v3883_v0, %v3488_v42 }
 0x528   : > { %v3491_v14 = vpop.xlane.xlu1 %3490 }
 0x529   : > { %3555 = vrot.lane.b32.xlu0 %v3525_v47, %s4759_s11  ;;  %v3526_v2 = vadd.f32 %v3883_v0, %v3491_v14 }
 0x52a   : > { %v3494_v4 = vpop.xlane.xlu0 %3493 }
 0x52b   : > { %3553 = vrot.lane.b32.xlu1 %v3524_v28, %s4759_s11  ;;  %v3527_v49 = vadd.f32 %v3883_v0, %v3494_v4 }
 0x52c   : > { %v3497_v33 = vpop.xlane.xlu1 %3496 }
 0x52d   : > { %3559 = vrot.lane.b32.xlu0 %v3527_v49, %s4759_s11  ;;  %v3528_v12 = vadd.f32 %v3883_v0, %v3497_v33 }
 0x52e   : > { %v3500_v38 = vpop.xlane.xlu0 %3499 }
 0x52f   : > { %3557 = vrot.lane.b32.xlu1 %v3526_v2, %s4759_s11  ;;  %v3529_v27 = vadd.f32 %v3883_v0, %v3500_v38 }
 0x531   : > { %3563 = vrot.lane.b32.xlu0 %v3529_v27, %s4759_s11 }
 0x533   : > { %3561 = vrot.lane.b32.xlu1 %v3528_v12, %s4759_s11 }
 0x534   : > { %v3503_v50 = vpop.xlane.xlu1 %3502 }
 0x535   : > { %v3530_v26 = vadd.f32 %v3883_v0, %v3503_v50 }
 0x537   : > { %3565 = vrot.lane.b32.xlu1 %v3530_v26, %s4759_s11 }
 0x53b   : > { %v3506_v16 = vpop.xlane.xlu0 %3505 }
 0x53c   : > { %v3531_v36 = vadd.f32 %v3883_v0, %v3506_v16 }
 0x53e   : > { %3567 = vrot.lane.b32.xlu0 %v3531_v36, %s4759_s11 }
 0x53f   : > { %v3509_v24 = vpop.xlane.xlu1 %3508 }
 0x540   : > { %v3532_v58 = vadd.f32 %v3883_v0, %v3509_v24 }
 0x542   : > { %3569 = vrot.lane.b32.xlu1 %v3532_v58, %s4759_s11 }
 0x543   : > { %v3512_v34 = vpop.xlane.xlu0 %3511  ;;  %v1895_v57 = vpop.xlane.xlu1 %1894 }
 0x544   : > { %v3533_v10 = vadd.f32 %v3883_v0, %v3512_v34  ;;  %v1935_v51 = vadd.f32 %v6577_v21, %v1895_v57 }
 0x546   : > { %3571 = vrot.lane.b32.xlu0 %v3533_v10, %s4759_s11  ;;  %1949 = vst.msk [vmem:[%s6584_s25 + $0x10] sm:$0xff] %vm1946_vm2, %v1935_v51 }
 0x547   : > { %v1892_v59 = vpop.xlane.xlu0 %1891  ;;  %v1901_v54 = vpop.xlane.xlu1 %1900 }
 0x548   : > { %v1934_v5 = vadd.f32 %v6577_v21, %v1892_v59  ;;  %v1937_v8 = vadd.f32 %v6577_v21, %v1901_v54 }
 0x54a   : > { %1948 = vst.msk [vmem:[%s6584_s25 + $0x8] sm:$0xff] %vm1946_vm2, %v1934_v5  ;;  %1951 = vst.msk [vmem:[%s6584_s25 + $0x20] sm:$0xff] %vm1946_vm2, %v1937_v8 }
 0x54b   : > { %v1898_v45 = vpop.xlane.xlu0 %1897  ;;  %v1907_v23 = vpop.xlane.xlu1 %1906 }
 0x54c   : > { %v1936_v17 = vadd.f32 %v6577_v21, %v1898_v45  ;;  %v1939_v1 = vadd.f32 %v6577_v21, %v1907_v23 }
 0x54e   : > { %1950 = vst.msk [vmem:[%s6584_s25 + $0x18] sm:$0xff] %vm1946_vm2, %v1936_v17  ;;  %1953 = vst.msk [vmem:[%s6584_s25 + $0x30] sm:$0xff] %vm1946_vm2, %v1939_v1 }
 0x54f   : > { %v1904_v53 = vpop.xlane.xlu0 %1903  ;;  %v1913_v40 = vpop.xlane.xlu1 %1912 }
 0x550   : > { %v1938_v18 = vadd.f32 %v6577_v21, %v1904_v53  ;;  %v1941_v15 = vadd.f32 %v6577_v21, %v1913_v40 }
 0x552   : > { %1952 = vst.msk [vmem:[%s6584_s25 + $0x28] sm:$0xff] %vm1946_vm2, %v1938_v18  ;;  %1955 = vst.msk [vmem:[%s6584_s25 + $0x40] sm:$0xff] %vm1946_vm2, %v1941_v15 }
 0x553   : > { %v1910_v60 = vpop.xlane.xlu0 %1909  ;;  %v1919_v62 = vpop.xlane.xlu1 %1918 }
 0x554   : > { %v1940_v6 = vadd.f32 %v6577_v21, %v1910_v60  ;;  %v1943_v48 = vadd.f32 %v6577_v21, %v1919_v62 }
 0x556   : > { %1954 = vst.msk [vmem:[%s6584_s25 + $0x38] sm:$0xff] %vm1946_vm2, %v1940_v6  ;;  %1957 = vst.msk [vmem:[%s6584_s25 + $0x50] sm:$0xff] %vm1946_vm2, %v1943_v48 }
 0x557   : > { %v1916_v31 = vpop.xlane.xlu0 %1915  ;;  %v1925_v37 = vpop.xlane.xlu1 %1924 }
 0x558   : > { %v1942_v63 = vadd.f32 %v6577_v21, %v1916_v31  ;;  %v1945_v35 = vadd.f32 %v6577_v21, %v1925_v37 }
 0x55a   : > { %1956 = vst.msk [vmem:[%s6584_s25 + $0x48] sm:$0xff] %vm1946_vm2, %v1942_v63  ;;  %1959 = vst.msk [vmem:[%s6584_s25 + $0x60] sm:$0xff] %vm1946_vm2, %v1945_v35 }
 0x55b   : > { %v1922_v39 = vpop.xlane.xlu0 %1921 }
 0x55c   : > { %v1944_v46 = vadd.f32 %v6577_v21, %v1922_v39 }
 0x55e   : > { %1958 = vst.msk [vmem:[%s6584_s25 + $0x58] sm:$0xff] %vm1946_vm2, %v1944_v46 }
 0x591   : > { %v3548_v56 = vpop.permute.xlu0 %3547 }
 0x592   : > { %3587 = vst.msk [vmem:[%s6584_s25] sm:$0xff] %vm3586_vm3, %v3548_v56 }
 0x595   : > { %v3550_v61 = vpop.permute.xlu1 %3549 }
 0x596   : > { %3588 = vst.msk [vmem:[%s6584_s25 + $0x8] sm:$0xff] %vm3586_vm3, %v3550_v61 }
 0x599   : > { %v3552_v44 = vpop.permute.xlu1 %3551 }
 0x59a   : > { %3589 = vst.msk [vmem:[%s6584_s25 + $0x10] sm:$0xff] %vm3586_vm3, %v3552_v44 }
 0x59b   : > { %v3556_v29 = vpop.permute.xlu0 %3555 }
 0x59c   : > { %3591 = vst.msk [vmem:[%s6584_s25 + $0x20] sm:$0xff] %vm3586_vm3, %v3556_v29 }
 0x59d   : > { %v3554_v21 = vpop.permute.xlu1 %3553 }
 0x59e   : > { %3590 = vst.msk [vmem:[%s6584_s25 + $0x18] sm:$0xff] %vm3586_vm3, %v3554_v21 }
 0x59f   : > { %v3560_v41 = vpop.permute.xlu0 %3559 }
 0x5a0   : > { %3593 = vst.msk [vmem:[%s6584_s25 + $0x30] sm:$0xff] %vm3586_vm3, %v3560_v41 }
 0x5a1   : > { %v3558_v30 = vpop.permute.xlu1 %3557 }
 0x5a2   : > { %3592 = vst.msk [vmem:[%s6584_s25 + $0x28] sm:$0xff] %vm3586_vm3, %v3558_v30 }
 0x5a3   : > { %v3564_v22 = vpop.permute.xlu0 %3563 }
 0x5a4   : > { %3595 = vst.msk [vmem:[%s6584_s25 + $0x40] sm:$0xff] %vm3586_vm3, %v3564_v22 }
 0x5a5   : > { %v3562_v13 = vpop.permute.xlu1 %3561 }
 0x5a6   : > { %3594 = vst.msk [vmem:[%s6584_s25 + $0x38] sm:$0xff] %vm3586_vm3, %v3562_v13 }
 0x5a9   : > { %v3566_v19 = vpop.permute.xlu1 %3565 }
 0x5aa   : > { %3596 = vst.msk [vmem:[%s6584_s25 + $0x48] sm:$0xff] %vm3586_vm3, %v3566_v19 }
 0x5b0   : > { %v3568_v55 = vpop.permute.xlu0 %3567 }
 0x5b1   : > { %3597 = vst.msk [vmem:[%s6584_s25 + $0x50] sm:$0xff] %vm3586_vm3, %v3568_v55 }
 0x5b4   : > { %v3570_v7 = vpop.permute.xlu1 %3569 }
 0x5b5   : > { %3598 = vst.msk [vmem:[%s6584_s25 + $0x58] sm:$0xff] %vm3586_vm3, %v3570_v7 }
 0x5b8   : > { %v3572_v11 = vpop.permute.xlu0 %3571 }
 0x5b9   : > { %3599 = vst.msk [vmem:[%s6584_s25 + $0x60] sm:$0xff] %vm3586_vm3, %v3572_v11 }
 0x5ba PF: > { %s19_s30 = sadd.s32 1, %s4756_s30  }
 0x5bb   : > { %p16_p4 = scmp.ge.s32.totalorder %s19_s30, 4  }
 0x5bd   :  { %18 = sbr.rel (!%p16_p4) target bundleno = 1 (0x1), region = 94 }

</bundles_post_ra>
